<compile_context>
chip_gen: v7x
topology: tpu7x:2x2x1
jax: 0.10.0
libtpu: 0.0.40
codegen_flags: <defaults>
</compile_context>

<pallas_src>
import functools

import jax
import jax.numpy as jnp
from jax.experimental import pallas as pl
from jax.experimental.pallas import tpu as pltpu


HIDDEN_SIZES = [128, 128, 64, 64]
NORMALIZATION_CONST = 10.0  # plays the role of self.normalization_const


def _softplus(x):
    # torch.nn.Softplus(beta=1, threshold=20): x if x > 20 else log1p(exp(x)).
    # exp() may overflow for very large x, but that branch is discarded by the
    # where, so the forward pass is fine (only a VJP would need a clamp).
    return jnp.where(x > 20.0, x, jnp.log1p(jnp.exp(x)))


def _mlp_kernel(x_ref,
                w1_ref, b1_ref,
                w2_ref, b2_ref,
                w3_ref, b3_ref,
                w4_ref, b4_ref,
                w5_ref, b5_ref,
                out_ref, *, act_dtype):
    # Input tile: (F, tile_b) f32, batch on the lane axis (lane-dense).
    # Normalization is already folded into w1.
    x = x_ref[...].astype(jnp.bfloat16)

    # Layer 1: (128, F) @ (F, tile_b) -> (128, tile_b). bf16 MXU operands,
    # f32 accumulate; plain dot, no transposed contraction.
    z = jnp.dot(w1_ref[...], x, preferred_element_type=jnp.float32)
    h = _softplus((z + b1_ref[...]).astype(act_dtype))          # (128, tile_b)

    # Layers 2-3: bf16 operands, f32 accumulate; softplus in act_dtype
    # (bf16 on v6e/v7x -> ~2x EUP rate, and h is produced directly as bf16).
    z = jnp.dot(w2_ref[...], h.astype(jnp.bfloat16),
                preferred_element_type=jnp.float32)
    h = _softplus((z + b2_ref[...]).astype(act_dtype))          # (128, tile_b)

    z = jnp.dot(w3_ref[...], h.astype(jnp.bfloat16),
                preferred_element_type=jnp.float32)
    h = _softplus((z + b3_ref[...]).astype(act_dtype))          # (64, tile_b)

    # Layer 4: keep the activation f32 -- it feeds the f32 VPU reduce below.
    z = jnp.dot(w4_ref[...], h.astype(jnp.bfloat16),
                preferred_element_type=jnp.float32)
    h = _softplus(z + b4_ref[...])                              # (64, tile_b)

    # Layer 5 (64 -> 1): VPU multiply + sublane reduce; lane-dense (1, tile_b).
    z = jnp.sum(w5_ref[...] * h, axis=0, keepdims=True) + b5_ref[...]
    out_ref[...] = _softplus(z).astype(out_ref.dtype)


def init_params(key, num_features, hidden_layer_sizes=HIDDEN_SIZES):
    """nn.Linear-style params: weight (out, in), bias (out,); uniform +-1/sqrt(fan_in)."""
    sizes = [num_features] + list(hidden_layer_sizes) + [1]
    params = []
    for i in range(len(sizes) - 1):
        key, kw, kb = jax.random.split(key, 3)
        fan_in, fan_out = sizes[i], sizes[i + 1]
        bound = 1.0 / float(fan_in) ** 0.5
        w = jax.random.uniform(kw, (fan_out, fan_in), jnp.float32, -bound, bound)
        b = jax.random.uniform(kb, (fan_out,), jnp.float32, -bound, bound)
        params.append((w, b))
    return params


def _prepare_params(params, normalization_const):
    """Fold normalization into W1, cast matmul weights to bf16, make biases 2-D."""
    (w1, b1), (w2, b2), (w3, b3), (w4, b4), (w5, b5) = params
    if normalization_const is not None:
        # (x / c) @ W1^T == x @ (W1 / c)^T ; bias untouched.
        w1 = w1 / jnp.float32(normalization_const)
    return (
        w1.astype(jnp.bfloat16),  b1.reshape(-1, 1).astype(jnp.float32),
        w2.astype(jnp.bfloat16),  b2.reshape(-1, 1).astype(jnp.float32),
        w3.astype(jnp.bfloat16),  b3.reshape(-1, 1).astype(jnp.float32),
        w4.astype(jnp.bfloat16),  b4.reshape(-1, 1).astype(jnp.float32),
        w5.reshape(-1, 1).astype(jnp.float32),   # (64, 1): last layer is VPU
        b5.reshape(1, 1).astype(jnp.float32),
    )


def _round_up(x, m):
    return ((x + m - 1) // m) * m


def _pick_tiling(B, tile_b):
    """Lane-align tile_b, never over-tile small batches, keep >=2 grid steps
    when possible so a "parallel" grid splits across v7x's two TensorCores."""
    tile_b = max(128, min((tile_b // 128) * 128, _round_up(B, 128)))
    if _round_up(B, tile_b) // tile_b == 1 and tile_b > 128:
        # grid of 1 would idle a v7x TensorCore: split into two balanced tiles.
        tile_b = _round_up(tile_b // 2, 128)
    Bp = _round_up(B, tile_b)
    return Bp, tile_b


def _default_act_dtype():
    """bf16 elementwise/softplus path on v6e/v7x (bf16 EUP/VPU); f32 elsewhere."""
    try:
        kind = jax.devices()[0].device_kind.lower()
    except Exception:
        return jnp.float32
    if "v6" in kind or "v7" in kind:
        return jnp.bfloat16
    return jnp.float32  # v5e/v5p/v4: no bf16 VPU/EUP path -> keep f32


def softplus_valnet_forward(state, params, *, normalization_const=None,
                            tile_b=512, act_dtype=None):
    """Pallas forward pass. state: (B, F) float32. Returns flat (B,) values."""
    B, F = state.shape
    if act_dtype is None:
        act_dtype = _default_act_dtype()

    Bp, tile_b = _pick_tiling(B, tile_b)

    # Pre-transpose to (F, Bp): batch on the lane axis -> lane-dense tiles,
    # and layer 1 becomes a plain (128, F) @ (F, tile_b) MXU matmul.
    x = state.T
    if Bp != B:
        x = jnp.pad(x, ((0, 0), (0, Bp - B)))

    prep = _prepare_params(params, normalization_const)

    # Full (untiled) blocks for the small weights / biases.
    def full_spec(arr):
        return pl.BlockSpec(arr.shape, lambda i: (0,) * arr.ndim)

    # Advisory cost estimate so XLA can schedule around this small call.
    h1, h2, h3, h4 = HIDDEN_SIZES
    weight_bytes = sum(int(a.size) * a.dtype.itemsize for a in prep)
    flops = 2 * Bp * (F * h1 + h1 * h2 + h2 * h3 + h3 * h4 + h4 * 1)
    transcendentals = 2 * Bp * (h1 + h2 + h3 + h4 + 1)   # exp + log1p per act
    bytes_accessed = Bp * F * 4 + Bp * 4 + weight_bytes

    kernel = functools.partial(_mlp_kernel, act_dtype=act_dtype)

    out = pl.pallas_call(
        kernel,
        # Lane-dense output: each grid step writes one (1, tile_b) block.
        out_shape=jax.ShapeDtypeStruct((1, Bp), jnp.float32),
        grid_spec=pltpu.PrefetchScalarGridSpec(
            num_scalar_prefetch=0,
            grid=(Bp // tile_b,),
            in_specs=[pl.BlockSpec((F, tile_b), lambda i: (0, i))]
                     + [full_spec(a) for a in prep],
            out_specs=pl.BlockSpec((1, tile_b), lambda i: (0, i)),
        ),
        compiler_params=pltpu.CompilerParams(
            dimension_semantics=("parallel",)),
        cost_estimate=pl.CostEstimate(
            flops=flops,
            transcendentals=transcendentals,
            bytes_accessed=bytes_accessed),
    )(x, *prep)

    # torch.flatten on the result (and drop batch padding).
    return out.reshape(-1)[:B]


def reference_forward(state, params, normalization_const=None):
    """Pure-JAX f32 reference of the PyTorch module for sanity checking."""
    x = state
    if normalization_const is not None:
        x = x / normalization_const
    for (w, b) in params:
        x = _softplus(x @ w.T + b)
    return x.reshape(-1)


if __name__ == "__main__":
    key = jax.random.PRNGKey(0)
    k_params, k_state = jax.random.split(key)

    num_features = 16
    batch = 500          # not a multiple of the tile -> exercises batch padding

    params = init_params(k_params, num_features)
    state = jax.random.normal(k_state, (batch, num_features), jnp.float32) * 5.0

    # tile_b=256 -> Bp=512, grid of 2 balanced "parallel" steps (both v7x TCs busy).
    out = softplus_valnet_forward(
        state, params, normalization_const=NORMALIZATION_CONST, tile_b=256)
    out = jax.block_until_ready(out)

    ref = reference_forward(state, params, normalization_const=NORMALIZATION_CONST)
    assert out.shape == (batch,)
    max_err = float(jnp.max(jnp.abs(out - ref)))
    # bf16 matmul operands (+ bf16 softplus on v6e/v7x) with f32 accumulation:
    # loosened tolerance vs. the pure-f32 reference.
    assert jnp.allclose(out, ref, atol=5e-2, rtol=5e-2), (max_err, out[:4], ref[:4])

    print("KERNEL_OK")
</pallas_src>

<mosaic_0001>
module attributes {stable_mosaic.version = 11 : i64} {
  func.func @_mlp_kernel(%arg0: i32, %arg1: memref<16x256xf32, #tpu.memory_space<vmem>>, %arg2: memref<128x16xbf16, #tpu.memory_space<vmem>>, %arg3: memref<128x1xf32, #tpu.memory_space<vmem>>, %arg4: memref<128x128xbf16, #tpu.memory_space<vmem>>, %arg5: memref<128x1xf32, #tpu.memory_space<vmem>>, %arg6: memref<64x128xbf16, #tpu.memory_space<vmem>>, %arg7: memref<64x1xf32, #tpu.memory_space<vmem>>, %arg8: memref<64x64xbf16, #tpu.memory_space<vmem>>, %arg9: memref<64x1xf32, #tpu.memory_space<vmem>>, %arg10: memref<64x1xf32, #tpu.memory_space<vmem>>, %arg11: memref<1x1xf32, #tpu.memory_space<vmem>>, %arg12: memref<1x256xf32, #tpu.memory_space<vmem>>) attributes {dimension_semantics = [#tpu.dimension_semantics<parallel>], iteration_bounds = array<i64: 2>, scalar_prefetch = 0 : i64, scratch_operands = 0 : i64, tpu.core_type = #tpu.core_type<tc>, window_params = [{transform_indices = @transform_0, window_bounds = array<i64: 16, 256>}, {pipeline_mode = #tpu.pipeline_mode<synchronous>, transform_indices = @transform_1, window_bounds = array<i64: 128, 16>}, {pipeline_mode = #tpu.pipeline_mode<synchronous>, transform_indices = @transform_2, window_bounds = array<i64: 128, 1>}, {pipeline_mode = #tpu.pipeline_mode<synchronous>, transform_indices = @transform_3, window_bounds = array<i64: 128, 128>}, {pipeline_mode = #tpu.pipeline_mode<synchronous>, transform_indices = @transform_4, window_bounds = array<i64: 128, 1>}, {pipeline_mode = #tpu.pipeline_mode<synchronous>, transform_indices = @transform_5, window_bounds = array<i64: 64, 128>}, {pipeline_mode = #tpu.pipeline_mode<synchronous>, transform_indices = @transform_6, window_bounds = array<i64: 64, 1>}, {pipeline_mode = #tpu.pipeline_mode<synchronous>, transform_indices = @transform_7, window_bounds = array<i64: 64, 64>}, {pipeline_mode = #tpu.pipeline_mode<synchronous>, transform_indices = @transform_8, window_bounds = array<i64: 64, 1>}, {pipeline_mode = #tpu.pipeline_mode<synchronous>, transform_indices = @transform_9, window_bounds = array<i64: 64, 1>}, {pipeline_mode = #tpu.pipeline_mode<synchronous>, transform_indices = @transform_10, window_bounds = array<i64: 1, 1>}, {transform_indices = @transform_11, window_bounds = array<i64: 1, 256>}]} {
    %c0 = arith.constant 0 : index
    %c0_0 = arith.constant 0 : index
    %0 = vector.load %arg1[%c0, %c0_0] : memref<16x256xf32, #tpu.memory_space<vmem>>, vector<16x256xf32>
    %1 = arith.truncf %0 : vector<16x256xf32> to vector<16x256xbf16>
    %c0_1 = arith.constant 0 : index
    %c0_2 = arith.constant 0 : index
    %2 = vector.load %arg2[%c0_1, %c0_2] : memref<128x16xbf16, #tpu.memory_space<vmem>>, vector<128x16xbf16>
    %cst = arith.constant dense<0.000000e+00> : vector<128x256xf32>
    %3 = tpu.matmul %2, %1, %cst {dimension_numbers = #tpu.dot_dimension_numbers<[1], [0], [0], [1], [0, 0, 1, 1], [], []>} : vector<128x16xbf16>, vector<16x256xbf16>, vector<128x256xf32> -> vector<128x256xf32>
    %c0_3 = arith.constant 0 : index
    %c0_4 = arith.constant 0 : index
    %4 = vector.load %arg3[%c0_3, %c0_4] : memref<128x1xf32, #tpu.memory_space<vmem>>, vector<128x1xf32>
    %5 = vector.broadcast %4 : vector<128x1xf32> to vector<128x256xf32>
    %6 = arith.addf %3, %5 : vector<128x256xf32>
    %cst_5 = arith.constant 2.000000e+01 : f32
    %7 = vector.broadcast %cst_5 : f32 to vector<128x256xf32>
    %8 = arith.cmpf ogt, %6, %7 : vector<128x256xf32>
    %9 = math.exp %6 : vector<128x256xf32>
    %10 = math.log1p %9 : vector<128x256xf32>
    %11 = arith.select %8, %6, %10 : vector<128x256xi1>, vector<128x256xf32>
    %c0_6 = arith.constant 0 : index
    %c0_7 = arith.constant 0 : index
    %12 = vector.load %arg4[%c0_6, %c0_7] : memref<128x128xbf16, #tpu.memory_space<vmem>>, vector<128x128xbf16>
    %13 = arith.truncf %11 : vector<128x256xf32> to vector<128x256xbf16>
    %cst_8 = arith.constant dense<0.000000e+00> : vector<128x256xf32>
    %14 = tpu.matmul %12, %13, %cst_8 {dimension_numbers = #tpu.dot_dimension_numbers<[1], [0], [0], [1], [0, 0, 1, 1], [], []>} : vector<128x128xbf16>, vector<128x256xbf16>, vector<128x256xf32> -> vector<128x256xf32>
    %c0_9 = arith.constant 0 : index
    %c0_10 = arith.constant 0 : index
    %15 = vector.load %arg5[%c0_9, %c0_10] : memref<128x1xf32, #tpu.memory_space<vmem>>, vector<128x1xf32>
    %16 = vector.broadcast %15 : vector<128x1xf32> to vector<128x256xf32>
    %17 = arith.addf %14, %16 : vector<128x256xf32>
    %cst_11 = arith.constant 2.000000e+01 : f32
    %18 = vector.broadcast %cst_11 : f32 to vector<128x256xf32>
    %19 = arith.cmpf ogt, %17, %18 : vector<128x256xf32>
    %20 = math.exp %17 : vector<128x256xf32>
    %21 = math.log1p %20 : vector<128x256xf32>
    %22 = arith.select %19, %17, %21 : vector<128x256xi1>, vector<128x256xf32>
    %c0_12 = arith.constant 0 : index
    %c0_13 = arith.constant 0 : index
    %23 = vector.load %arg6[%c0_12, %c0_13] : memref<64x128xbf16, #tpu.memory_space<vmem>>, vector<64x128xbf16>
    %24 = arith.truncf %22 : vector<128x256xf32> to vector<128x256xbf16>
    %cst_14 = arith.constant dense<0.000000e+00> : vector<64x256xf32>
    %25 = tpu.matmul %23, %24, %cst_14 {dimension_numbers = #tpu.dot_dimension_numbers<[1], [0], [0], [1], [0, 0, 1, 1], [], []>} : vector<64x128xbf16>, vector<128x256xbf16>, vector<64x256xf32> -> vector<64x256xf32>
    %c0_15 = arith.constant 0 : index
    %c0_16 = arith.constant 0 : index
    %26 = vector.load %arg7[%c0_15, %c0_16] : memref<64x1xf32, #tpu.memory_space<vmem>>, vector<64x1xf32>
    %27 = vector.broadcast %26 : vector<64x1xf32> to vector<64x256xf32>
    %28 = arith.addf %25, %27 : vector<64x256xf32>
    %cst_17 = arith.constant 2.000000e+01 : f32
    %29 = vector.broadcast %cst_17 : f32 to vector<64x256xf32>
    %30 = arith.cmpf ogt, %28, %29 : vector<64x256xf32>
    %31 = math.exp %28 : vector<64x256xf32>
    %32 = math.log1p %31 : vector<64x256xf32>
    %33 = arith.select %30, %28, %32 : vector<64x256xi1>, vector<64x256xf32>
    %c0_18 = arith.constant 0 : index
    %c0_19 = arith.constant 0 : index
    %34 = vector.load %arg8[%c0_18, %c0_19] : memref<64x64xbf16, #tpu.memory_space<vmem>>, vector<64x64xbf16>
    %35 = arith.truncf %33 : vector<64x256xf32> to vector<64x256xbf16>
    %cst_20 = arith.constant dense<0.000000e+00> : vector<64x256xf32>
    %36 = tpu.matmul %34, %35, %cst_20 {dimension_numbers = #tpu.dot_dimension_numbers<[1], [0], [0], [1], [0, 0, 1, 1], [], []>} : vector<64x64xbf16>, vector<64x256xbf16>, vector<64x256xf32> -> vector<64x256xf32>
    %c0_21 = arith.constant 0 : index
    %c0_22 = arith.constant 0 : index
    %37 = vector.load %arg9[%c0_21, %c0_22] : memref<64x1xf32, #tpu.memory_space<vmem>>, vector<64x1xf32>
    %38 = vector.broadcast %37 : vector<64x1xf32> to vector<64x256xf32>
    %39 = arith.addf %36, %38 : vector<64x256xf32>
    %cst_23 = arith.constant 2.000000e+01 : f32
    %40 = vector.broadcast %cst_23 : f32 to vector<64x256xf32>
    %41 = arith.cmpf ogt, %39, %40 : vector<64x256xf32>
    %42 = math.exp %39 : vector<64x256xf32>
    %43 = math.log1p %42 : vector<64x256xf32>
    %44 = arith.select %41, %39, %43 : vector<64x256xi1>, vector<64x256xf32>
    %c0_24 = arith.constant 0 : index
    %c0_25 = arith.constant 0 : index
    %45 = vector.load %arg10[%c0_24, %c0_25] : memref<64x1xf32, #tpu.memory_space<vmem>>, vector<64x1xf32>
    %46 = vector.broadcast %45 : vector<64x1xf32> to vector<64x256xf32>
    %47 = arith.mulf %46, %44 : vector<64x256xf32>
    %cst_26 = arith.constant dense<0.000000e+00> : vector<256xf32>
    %48 = vector.multi_reduction <add>, %47, %cst_26 [0] : vector<64x256xf32> to vector<256xf32>
    %49 = vector.shape_cast %48 : vector<256xf32> to vector<1x256xf32>
    %c0_27 = arith.constant 0 : index
    %c0_28 = arith.constant 0 : index
    %50 = vector.load %arg11[%c0_27, %c0_28] : memref<1x1xf32, #tpu.memory_space<vmem>>, vector<1x1xf32>
    %51 = vector.broadcast %50 : vector<1x1xf32> to vector<1x256xf32>
    %52 = arith.addf %49, %51 : vector<1x256xf32>
    %cst_29 = arith.constant 2.000000e+01 : f32
    %53 = vector.broadcast %cst_29 : f32 to vector<1x256xf32>
    %54 = arith.cmpf ogt, %52, %53 : vector<1x256xf32>
    %55 = math.exp %52 : vector<1x256xf32>
    %56 = math.log1p %55 : vector<1x256xf32>
    %57 = arith.select %54, %52, %56 : vector<1x256xi1>, vector<1x256xf32>
    %c0_30 = arith.constant 0 : index
    %c0_31 = arith.constant 0 : index
    %58 = vector.load %arg12[%c0_30, %c0_31] : memref<1x256xf32, #tpu.memory_space<vmem>>, vector<1x256xf32>
    tpu.vector_store %arg12[%c0_30, %c0_31], %57 {strides = array<i32>} : memref<1x256xf32, #tpu.memory_space<vmem>>, vector<1x256xf32>,
    return
  }
  func.func @transform_0(%arg0: i32) -> (i32, i32) {
    %c0_i32 = arith.constant 0 : i32
    %c0_i32_0 = arith.constant 0 : i32
    return %c0_i32, %arg0 : i32, i32
  }
  func.func @transform_1(%arg0: i32) -> (i32, i32) {
    %c0_i32 = arith.constant 0 : i32
    %c0_i32_0 = arith.constant 0 : i32
    %c0_i32_1 = arith.constant 0 : i32
    return %c0_i32, %c0_i32_0 : i32, i32
  }
  func.func @transform_2(%arg0: i32) -> (i32, i32) {
    %c0_i32 = arith.constant 0 : i32
    %c0_i32_0 = arith.constant 0 : i32
    %c0_i32_1 = arith.constant 0 : i32
    return %c0_i32, %c0_i32_0 : i32, i32
  }
  func.func @transform_3(%arg0: i32) -> (i32, i32) {
    %c0_i32 = arith.constant 0 : i32
    %c0_i32_0 = arith.constant 0 : i32
    %c0_i32_1 = arith.constant 0 : i32
    return %c0_i32, %c0_i32_0 : i32, i32
  }
  func.func @transform_4(%arg0: i32) -> (i32, i32) {
    %c0_i32 = arith.constant 0 : i32
    %c0_i32_0 = arith.constant 0 : i32
    %c0_i32_1 = arith.constant 0 : i32
    return %c0_i32, %c0_i32_0 : i32, i32
  }
  func.func @transform_5(%arg0: i32) -> (i32, i32) {
    %c0_i32 = arith.constant 0 : i32
    %c0_i32_0 = arith.constant 0 : i32
    %c0_i32_1 = arith.constant 0 : i32
    return %c0_i32, %c0_i32_0 : i32, i32
  }
  func.func @transform_6(%arg0: i32) -> (i32, i32) {
    %c0_i32 = arith.constant 0 : i32
    %c0_i32_0 = arith.constant 0 : i32
    %c0_i32_1 = arith.constant 0 : i32
    return %c0_i32, %c0_i32_0 : i32, i32
  }
  func.func @transform_7(%arg0: i32) -> (i32, i32) {
    %c0_i32 = arith.constant 0 : i32
    %c0_i32_0 = arith.constant 0 : i32
    %c0_i32_1 = arith.constant 0 : i32
    return %c0_i32, %c0_i32_0 : i32, i32
  }
  func.func @transform_8(%arg0: i32) -> (i32, i32) {
    %c0_i32 = arith.constant 0 : i32
    %c0_i32_0 = arith.constant 0 : i32
    %c0_i32_1 = arith.constant 0 : i32
    return %c0_i32, %c0_i32_0 : i32, i32
  }
  func.func @transform_9(%arg0: i32) -> (i32, i32) {
    %c0_i32 = arith.constant 0 : i32
    %c0_i32_0 = arith.constant 0 : i32
    %c0_i32_1 = arith.constant 0 : i32
    return %c0_i32, %c0_i32_0 : i32, i32
  }
  func.func @transform_10(%arg0: i32) -> (i32, i32) {
    %c0_i32 = arith.constant 0 : i32
    %c0_i32_0 = arith.constant 0 : i32
    %c0_i32_1 = arith.constant 0 : i32
    return %c0_i32, %c0_i32_0 : i32, i32
  }
  func.func @transform_11(%arg0: i32) -> (i32, i32) {
    %c0_i32 = arith.constant 0 : i32
    %c0_i32_0 = arith.constant 0 : i32
    return %c0_i32, %arg0 : i32, i32
  }
}

</mosaic_0001>

<bundles_post_ra>
// kernel: tpu_custom_call.1
= control target key start
LH: loop header
LB: loop body
LE: loop exit
PB: predicated region body
PF: predicated region fallthrough
CT: control target
= control target key end

     0   :  { %s5565_s0 = inlined_call_operand.vmem [shape: f32[16,512], index: 0, kind: input, shape index: {}]   ;;  %s5566_s1 = inlined_call_operand.vmem [shape: bf16[128,16], index: 1, kind: input, shape index: {}]   ;;  %s5567_s2 = inlined_call_operand.vmem [shape: f32[128,1], index: 2, kind: input, shape index: {}]   ;;  %s5568_s3 = inlined_call_operand.vmem [shape: bf16[128,128], index: 3, kind: input, shape index: {}]   ;;  %s5569_s4 = inlined_call_operand.vmem [shape: f32[128,1], index: 4, kind: input, shape index: {}]   ;;  %s5570_s5 = inlined_call_operand.vmem [shape: bf16[64,128], index: 5, kind: input, shape index: {}]   ;;  %s5571_s6 = inlined_call_operand.vmem [shape: f32[64,1], index: 6, kind: input, shape index: {}]   ;;  %s5572_s7 = inlined_call_operand.vmem [shape: bf16[64,64], index: 7, kind: input, shape index: {}]   ;;  %s5573_s8 = inlined_call_operand.vmem [shape: f32[64,1], index: 8, kind: input, shape index: {}]   ;;  %s5574_s9 = inlined_call_operand.vmem [shape: f32[64,1], index: 9, kind: input, shape index: {}]   ;;  %s5575_s10 = inlined_call_operand.<no memory space> [shape: f32[1,1], index: 10, kind: input, shape index: {}]   ;;  %s5576_s11 = inlined_call_operand.hbm [shape: f32[1,512], index: 11, kind: output, shape index: {}]  }
   0x1   :  { %v16_v0 = vstv %s5575_s10 }
   0x2   :  { %17 = vst [vmem:[#allocation2] sm:$0x1] %v16_v0 }
   0x3   :  { %18 = vsyncpa [#allocation5], 0 }
   0x4   :  { %20 = vsyncpa [#allocation5 + $0x1], 0  ;;  %s3468_s19 = smov 0   ;;  %s3470_s20 = smov 0  }
   0x5   :  { %s3472_s21 = smov 0   ;;  %s3474_s22 = smov 0  }
   0x6 LB: > { %s2818_s10 = sadd.s32 4294967295, %s3400_s22   ;;  %s2819_s23 = sadd.s32 4294967294, %s3400_s22   ;;  %s3400_s22 = sphi %s3474_s22, %s5713_s22   ;;  %s3396_s21 = sphi %s3472_s21, %s5712_s21   ;;  %s3392_s20 = sphi %s3470_s20, %s5711_s20   ;;  %s3388_s19 = sphi %s3468_s19, %s5710_s19  }
   0x7   : > { %s3491_s24 = sadd.s32 1, %s3400_s22   ;;  %s33_s25 = sadd.s32 1, %s3396_s21 }
   0x8   : > { %s30_s26 = ssub.s32 %s3400_s22, %s3491_s24  ;;  %p40_p0 = scmp.ne.s32.totalorder %s3396_s21, %s3392_s20 }
   0x9   : > { %p31_p1 = scmp.eq.s32.totalorder %s30_s26, 0  ;;  %p41_p2 = scmp.eq.s32.totalorder %s3400_s22, 0 }
   0xa   : > { %p280_p3 = scmp.eq.s32.totalorder %s2818_s10, 1  ;;  %p285_p4 = scmp.ne.s32.totalorder %s3392_s20, %s3388_s19 }
   0xb   : > { %s3504_s27 = scalar_select %p31_p1, %s3396_s21, %s33_s25  }
   0xc   : > { %p42_p5 = por %p41_p2, %p40_p0  ;;  %p3506_p6 = por %p280_p3, %p40_p0 }
   0xd   : > { %p286_p7 = scmp.eq.s32.totalorder %s2819_s23, 1  ;;  %p2821_p9 = scmp.ge.s32.totalorder %s3400_s22, 2 }
   0xf   : > { %p3510_p8 = por %p286_p7, %p285_p4  ;;  %332 = sbr.rel (%p2821_p9) target bundleno = 29 (0x1d), region = 56 }
  0x16   : > { %335 = sbr.rel (!%p42_p5) target bundleno = 29 (0x1d), region = 60  ;;  %s337_s30 = sand.u32 (%p42_p5), 1, %s3396_s21  }
  0x17   : > { %s2869_s12 = sshll.u32 (%p42_p5), %s3400_s22, 4  ;;  %s2822_s13 = sshll.u32 (%p42_p5), %s337_s30, 5 }
  0x18   : > { %s342_s16 = scalar_lea.vmem (%p42_p5), %s5565_s0, %s2869_s12  ;;  %s339_s17 = scalar_lea.vmem (%p42_p5), [#allocation3], %s2822_s13 }
  0x19   : > { %v355_v1 = vld [vmem:[%s342_s16] sm:$0xff] (%p42_p5)  ;;  %v357_v2 = vld [vmem:[%s342_s16 + $0x8] sm:$0xff] (%p42_p5) }
  0x1a   : > { %v359_v3 = vld [vmem:[%s342_s16 + $0x20] sm:$0xff] (%p42_p5)  ;;  %356 = vst [vmem:[%s339_s17] sm:$0xff] (%p42_p5), %v355_v1  ;;  %358 = vst [vmem:[%s339_s17 + $0x8] sm:$0xff] (%p42_p5), %v357_v2  ;;  %v361_v4 = vld [vmem:[%s342_s16 + $0x28] sm:$0xff] (%p42_p5) }
  0x1b   : > { %360 = vst [vmem:[%s339_s17 + $0x10] sm:$0xff] (%p42_p5), %v359_v3  ;;  %362 = vst [vmem:[%s339_s17 + $0x18] sm:$0xff] (%p42_p5), %v361_v4 }
  0x1d PF: > { %p2825_p10 = scmp.ge.s32.totalorder %s3400_s22, 1  ;;  %p367_p11 = scmp.lt.s32.totalorder %s3400_s22, 3 }
  0x1f   : > { %p368_p12 = pnand %p2825_p10, %p367_p11 }
  0x20   : > { %s3525_s18 = sand.u32 (!%p368_p12), 1, %s3392_s20   ;;  %v438_v5 = vld [vmem:[%s5567_s2] sm:$0xff] (!%p368_p12)  ;;  %v5577_v6 = vmov (!%p368_p12), 0   ;;  %v440_v7 = vld [vmem:[%s5567_s2 + $0x10] sm:$0xff] (!%p368_p12)  ;;  %v439_v8 = vld [vmem:[%s5567_s2 + $0x8] sm:$0xff] (!%p368_p12)  ;;  %vm574_vm0 = vcmask (!%p368_p12), 130048  }
  0x21   : > { %371 = sbr.rel (%p368_p12) target bundleno = 1386 (0x56a), region = 83  ;;  %s2826_s26 = sshll.u32 (!%p368_p12), %s3525_s18, 5  ;;  %2920 = vset.pattern.permute.xlu0 (!%p368_p12), %v5577_v6  ;;  %631 = vmatprep.mubr.bf16.mxu0 (!%p368_p12), %v5577_v6  ;;  %v441_v14 = vld [vmem:[%s5567_s2 + $0x18] sm:$0xff] (!%p368_p12)  ;;  %v2922_v16 = vld [vmem:[%s5566_s1] sm:$0xff] (!%p368_p12)   ;;  %v443_v18 = vld [vmem:[%s5567_s2 + $0x28] sm:$0xff] (!%p368_p12) }
  0x22   : > { %456 = vperm.xlu0 (!%p368_p12), %2920, %v438_v5   ;;  %2921 = vset.pattern.permute.xlu1 (!%p368_p12), %v5577_v6  ;;  %s376_s15 = scalar_lea.vmem (!%p368_p12), [#allocation3], %s2826_s26  ;;  %v442_v17 = vld [vmem:[%s5567_s2 + $0x20] sm:$0xff] (!%p368_p12)  ;;  %v444_v19 = vld [vmem:[%s5567_s2 + $0x30] sm:$0xff] (!%p368_p12)  ;;  %v445_v20 = vld [vmem:[%s5567_s2 + $0x38] sm:$0xff] (!%p368_p12)  ;;  %s2827_s26 = sshll.u32 (!%p368_p12), %s3525_s18, 1 }
  0x23   : > { %v417_v9 = vld [vmem:[%s376_s15 + $0x8] sm:$0xff] (!%p368_p12)  ;;  %v419_v10 = vld [vmem:[%s376_s15 + $0x18] sm:$0xff] (!%p368_p12)  ;;  %v416_v11 = vld [vmem:[%s376_s15] sm:$0xff] (!%p368_p12)  ;;  %466 = vperm.xlu1 (!%p368_p12), %2921, %v440_v7   ;;  %1336 = vmatprep.mubr.bf16.mxu1 (!%p368_p12), %v5577_v6  ;;  %s2870_s30 = sshll.u32 (!%p368_p12), %s2818_s10, 5  ;;  %s412_s12 = scalar_lea.vmem (!%p368_p12), [#allocation4], %s2827_s26 }
  0x24   : > { %v421_v12 = vpack.c.bf16 (!%p368_p12), %v419_v10, %v417_v9  ;;  %v418_v13 = vld [vmem:[%s376_s15 + $0x10] sm:$0xff] (!%p368_p12)  ;;  %v2923_v21 = vld [vmem:[%s5566_s1 + $0x8] sm:$0xff] (!%p368_p12)   ;;  %v446_v22 = vld [vmem:[%s5567_s2 + $0x40] sm:$0xff] (!%p368_p12)  ;;  %s2754_s13 = sshll.u32 (!%p368_p12), %s412_s12, 4  ;;  %s5521_s16 = scalar_lea.hbm (!%p368_p12), %s5576_s11, %s2870_s30  ;;  %s5523_s13 = int_to_ptr.vmem [resolvable:$true] %s2754_s13 }
  0x25   : > { %v420_v15 = vpack.c.bf16 (!%p368_p12), %v418_v13, %v416_v11  ;;  %v447_v23 = vld [vmem:[%s5567_s2 + $0x48] sm:$0xff] (!%p368_p12)  ;;  %v448_v24 = vld [vmem:[%s5567_s2 + $0x50] sm:$0xff] (!%p368_p12)  ;;  %v449_v25 = vld [vmem:[%s5567_s2 + $0x58] sm:$0xff] (!%p368_p12)  ;;  %s2740_s17 = scalar_lea.sflag (!%p368_p12), [#allocation5], %s3525_s18  ;;  %s3338_s23 = scalar_lea.vmem (!%p368_p12), %s5523_s13, 32 }
  0x26   : > { %599 = vmatprep.subr.bf16.mxu0 (!%p368_p12), %v421_v12  ;;  %461 = vperm.xlu0 (!%p368_p12), %2920, %v439_v8   ;;  %v2924_v26 = vld [vmem:[%s5566_s1 + $0x10] sm:$0xff] (!%p368_p12)   ;;  %v450_v27 = vld [vmem:[%s5567_s2 + $0x60] sm:$0xff] (!%p368_p12)  ;;  %v451_v28 = vld [vmem:[%s5567_s2 + $0x68] sm:$0xff] (!%p368_p12)  ;;  %p3339_p13 = scmp.ne.s32.totalorder (!%p368_p12), %s5523_s13, %s3338_s23  ;;  %s3404_s10 = smov (!%p368_p12), [#allocation4]  }
  0x27   : > { %600 = vmatpush1.bf16.msra.mxu0 (!%p368_p12), %v420_v15  ;;  %471 = vperm.xlu1 (!%p368_p12), %2921, %v441_v14   ;;  %v452_v29 = vld [vmem:[%s5567_s2 + $0x70] sm:$0xff] (!%p368_p12)  ;;  %v2925_v30 = vld [vmem:[%s5566_s1 + $0x18] sm:$0xff] (!%p368_p12)   ;;  %v1160_v32 = vld [vmem:[%s5569_s4] sm:$0xff] (!%p368_p12)  ;;  %s3342_s25 = sshll.u32 (!%p368_p12), %s3404_s10, 4  ;;  %s3343_s25 = int_to_ptr.vmem [resolvable:$false] %s3342_s25 }
  0x28   : > { %v453_v31 = vld [vmem:[%s5567_s2 + $0x78] sm:$0xff]  ;;  %v1161_v33 = vld [vmem:[%s5569_s4 + $0x8] sm:$0xff]  ;;  %v1162_v34 = vld [vmem:[%s5569_s4 + $0x10] sm:$0xff]  ;;  %p3340_p0 = pnand %p3339_p13, %p3506_p6  ;;  %s3344_s26 = scalar_lea.vmem %s3343_s25, 64 }
  0x29   : > { %v1163_v35 = vld [vmem:[%s5569_s4 + $0x18] sm:$0xff]  ;;  %v2926_v36 = vld [vmem:[%s5566_s1 + $0x20] sm:$0xff]   ;;  %v1165_v38 = vld [vmem:[%s5569_s4 + $0x28] sm:$0xff]  ;;  %p3345_p2 = scmp.lt.s32.totalorder %s5523_s13, %s3343_s25  ;;  %p3346_p3 = scmp.lt.s32.totalorder %s3344_s26, %s3338_s23 }
  0x2a   : > { %2836 = vmatmul.mubr.msk.bf16.vlgmr.msra.gmra.mrb[0].mxu0 %vm574_vm0, %v2922_v16  ;;  %476 = vperm.xlu0 %2920, %v442_v17   ;;  %v1164_v37 = vld [vmem:[%s5569_s4 + $0x20] sm:$0xff]  ;;  %v1166_v39 = vld [vmem:[%s5569_s4 + $0x30] sm:$0xff]  ;;  %v1167_v40 = vld [vmem:[%s5569_s4 + $0x38] sm:$0xff]  ;;  %p3341_p1 = pneg %p3340_p0 }
  0x2b   : > { %641 = vmatprep.mubr.bf16.mxu0 %v5577_v6  ;;  %481 = vperm.xlu1 %2921, %v443_v18   ;;  %v2927_v41 = vld [vmem:[%s5566_s1 + $0x28] sm:$0xff]   ;;  %v1168_v42 = vld [vmem:[%s5569_s4 + $0x40] sm:$0xff]  ;;  %v1170_v44 = vld [vmem:[%s5569_s4 + $0x50] sm:$0xff]  ;;  %p3347_p4 = por %p3346_p3, %p3345_p2 }
  0x2c   : > { %v1169_v43 = vld [vmem:[%s5569_s4 + $0x48] sm:$0xff]  ;;  %v1171_v45 = vld [vmem:[%s5569_s4 + $0x58] sm:$0xff]  ;;  %v2928_v46 = vld [vmem:[%s5566_s1 + $0x30] sm:$0xff]  }
  0x2d   : > { %v1172_v47 = vld [vmem:[%s5569_s4 + $0x60] sm:$0xff]  ;;  %v1173_v48 = vld [vmem:[%s5569_s4 + $0x68] sm:$0xff]  ;;  %v1174_v49 = vld [vmem:[%s5569_s4 + $0x70] sm:$0xff]  ;;  %p3348_p5 = pnand %p3347_p4, %p3341_p1 }
  0x2e   : > { %486 = vperm.xlu0 %2920, %v444_v19   ;;  %v1175_v50 = vld [vmem:[%s5569_s4 + $0x78] sm:$0xff]  ;;  %v1857_v52 = vld [vmem:[%s5571_s6] sm:$0xff]  ;;  %v1858_v53 = vld [vmem:[%s5571_s6 + $0x8] sm:$0xff] }
  0x2f   : > { %491 = vperm.xlu1 %2921, %v445_v20   ;;  %v2929_v51 = vld [vmem:[%s5566_s1 + $0x38] sm:$0xff]   ;;  %v1859_v54 = vld [vmem:[%s5571_s6 + $0x10] sm:$0xff]  ;;  %v1861_v56 = vld [vmem:[%s5571_s6 + $0x20] sm:$0xff] }
  0x30   : > { %v1860_v55 = vld [vmem:[%s5571_s6 + $0x18] sm:$0xff]  ;;  %v1862_v57 = vld [vmem:[%s5571_s6 + $0x28] sm:$0xff]  ;;  %v1863_v58 = vld [vmem:[%s5571_s6 + $0x30] sm:$0xff] }
  0x31   : > { %v1864_v59 = vld [vmem:[%s5571_s6 + $0x38] sm:$0xff]  ;;  %v2226_v60 = vld [vmem:[%s5573_s8] sm:$0xff]  ;;  %v2227_v61 = vld [vmem:[%s5573_s8 + $0x8] sm:$0xff] }
  0x32   : > { %2837 = vmatmul.mubr.msk.bf16.gmra.mrb[4].mxu0 %vm574_vm0, %v2923_v21  ;;  %496 = vperm.xlu0 %2920, %v446_v22   ;;  %v2228_v62 = vld [vmem:[%s5573_s8 + $0x10] sm:$0xff]  ;;  %v2229_v63 = vld [vmem:[%s5573_s8 + $0x18] sm:$0xff]  ;;  %v2230_v0 = vld [vmem:[%s5573_s8 + $0x20] sm:$0xff] }
  0x33   : > { %651 = vmatprep.mubr.bf16.mxu0 %v5577_v6  ;;  %501 = vperm.xlu1 %2921, %v447_v23   ;;  %v2231_v1 = vld [vmem:[%s5573_s8 + $0x28] sm:$0xff]  ;;  %v2232_v2 = vld [vmem:[%s5573_s8 + $0x30] sm:$0xff]  ;;  %v2233_v3 = vld [vmem:[%s5573_s8 + $0x38] sm:$0xff] }
  0x34   : > { %v2588_v4 = vld [vmem:[%s5574_s9] sm:$0xff]  ;;  %v2589_v5 = vld [vmem:[%s5574_s9 + $0x8] sm:$0xff]  ;;  %v2590_v7 = vld [vmem:[%s5574_s9 + $0x10] sm:$0xff] }
  0x35   : > { %v2591_v8 = vld [vmem:[%s5574_s9 + $0x18] sm:$0xff]  ;;  %v2592_v9 = vld [vmem:[%s5574_s9 + $0x20] sm:$0xff]  ;;  %v2593_v10 = vld [vmem:[%s5574_s9 + $0x28] sm:$0xff] }
  0x36   : > { %506 = vperm.xlu0 %2920, %v448_v24   ;;  %v2594_v11 = vld [vmem:[%s5574_s9 + $0x30] sm:$0xff]  ;;  %v2595_v12 = vld [vmem:[%s5574_s9 + $0x38] sm:$0xff]  ;;  %v2678_v13 = vld [vmem:[#allocation2] sm:$0x1] }
  0x37   : > { %511 = vperm.xlu1 %2921, %v449_v25  }
  0x3a   : > { %2838 = vmatmul.mubr.msk.bf16.gmra.mrb[8].mxu0 %vm574_vm0, %v2924_v26  ;;  %516 = vperm.xlu0 %2920, %v450_v27  }
  0x3b   : > { %661 = vmatprep.mubr.bf16.mxu0 %v5577_v6  ;;  %521 = vperm.xlu1 %2921, %v451_v28  }
  0x3e   : > { %526 = vperm.xlu0 %2920, %v452_v29  }
  0x3f   : > { %531 = vperm.xlu1 %2921, %v453_v31  }
  0x42   : > { %2839 = vmatmul.mubr.msk.bf16.gmra.mrb[12].mxu0 %vm574_vm0, %v2925_v30  ;;  %1178 = vperm.xlu0 %2920, %v1160_v32  }
  0x43   : > { %671 = vmatprep.mubr.bf16.mxu0 %v5577_v6  ;;  %1183 = vperm.xlu1 %2921, %v1161_v33  }
  0x46   : > { %1188 = vperm.xlu0 %2920, %v1162_v34  }
  0x47   : > { %1193 = vperm.xlu1 %2921, %v1163_v35  }
  0x4a   : > { %2840 = vmatmul.mubr.msk.bf16.gmra.mrb[16].mxu0 %vm574_vm0, %v2926_v36  ;;  %1198 = vperm.xlu0 %2920, %v1164_v37  }
  0x4b   : > { %681 = vmatprep.mubr.bf16.mxu0 %v5577_v6  ;;  %1203 = vperm.xlu1 %2921, %v1165_v38  }
  0x4e   : > { %1208 = vperm.xlu0 %2920, %v1166_v39  }
  0x4f   : > { %1213 = vperm.xlu1 %2921, %v1167_v40  }
  0x52   : > { %2841 = vmatmul.mubr.msk.bf16.gmra.mrb[20].mxu0 %vm574_vm0, %v2927_v41  ;;  %1218 = vperm.xlu0 %2920, %v1168_v42  }
  0x53   : > { %691 = vmatprep.mubr.bf16.mxu0 %v5577_v6  ;;  %1223 = vperm.xlu1 %2921, %v1169_v43  }
  0x56   : > { %1228 = vperm.xlu0 %2920, %v1170_v44  }
  0x57   : > { %1233 = vperm.xlu1 %2921, %v1171_v45  }
  0x5a   : > { %2842 = vmatmul.mubr.msk.bf16.gmra.mrb[24].mxu0 %vm574_vm0, %v2928_v46  ;;  %1238 = vperm.xlu0 %2920, %v1172_v47  }
  0x5b   : > { %701 = vmatprep.mubr.bf16.mxu0 %v5577_v6  ;;  %1243 = vperm.xlu1 %2921, %v1173_v48  }
  0x5e   : > { %1248 = vperm.xlu0 %2920, %v1174_v49  }
  0x5f   : > { %1253 = vperm.xlu1 %2921, %v1175_v50  }
  0x62   : > { %2843 = vmatmul.mubr.msk.bf16.gmra.mrb[28].mxu0 %vm574_vm0, %v2929_v51  ;;  %1867 = vperm.xlu0 %2920, %v1857_v52  }
  0x63   : > { %1872 = vperm.xlu1 %2921, %v1858_v53   ;;  %1961 = vmatprep.mubr.bf16.mxu0 %v5577_v6 }
  0x66   : > { %1877 = vperm.xlu0 %2920, %v1859_v54  }
  0x67   : > { %1882 = vperm.xlu1 %2921, %v1860_v55  }
  0x6a   : > { %1887 = vperm.xlu0 %2920, %v1861_v56  }
  0x6b   : > { %1892 = vperm.xlu1 %2921, %v1862_v57  }
  0x6e   : > { %1897 = vperm.xlu0 %2920, %v1863_v58  }
  0x6f   : > { %1902 = vperm.xlu1 %2921, %v1864_v59  }
  0x72   : > { %2236 = vperm.xlu0 %2920, %v2226_v60  }
  0x73   : > { %2241 = vperm.xlu1 %2921, %v2227_v61  }
  0x76   : > { %2246 = vperm.xlu0 %2920, %v2228_v62  }
  0x77   : > { %2251 = vperm.xlu1 %2921, %v2229_v63  }
  0x7a   : > { %2256 = vperm.xlu0 %2920, %v2230_v0  }
  0x7b   : > { %2261 = vperm.xlu1 %2921, %v2231_v1  }
  0x7e   : > { %2266 = vperm.xlu0 %2920, %v2232_v2  }
  0x7f   : > { %2271 = vperm.xlu1 %2921, %v2233_v3  }
  0x82   : > { %2598 = vperm.xlu0 %2920, %v2588_v4  }
  0x83   : > { %2603 = vperm.xlu1 %2921, %v2589_v5  }
  0x86   : > { %2608 = vperm.xlu0 %2920, %v2590_v7  }
  0x87   : > { %2613 = vperm.xlu1 %2921, %v2591_v8  }
  0x8a   : > { %2618 = vperm.xlu0 %2920, %v2592_v9  }
  0x8b   : > { %2623 = vperm.xlu1 %2921, %v2593_v10  }
  0x8e   : > { %2628 = vperm.xlu0 %2920, %v2594_v11  }
  0x8f   : > { %2633 = vperm.xlu1 %2921, %v2595_v12  }
  0x92   : > { %2681 = vperm.xlu0 %2920, %v2678_v13  }
  0xa1   : > { %v457_v14 = vpop.permute.xlu0 %456 }
  0xa2   : > { %v467_v29 = vpop.permute.xlu1 %466 }
  0xa5   : > { %v462_v18 = vpop.permute.xlu0 %461 }
  0xa6   : > { %v472_v36 = vpop.permute.xlu1 %471 }
  0xa9   : > { %v477_v43 = vpop.permute.xlu0 %476 }
  0xaa   : > { %v482_v52 = vpop.permute.xlu1 %481 }
  0xad   : > { %v487_v58 = vpop.permute.xlu0 %486 }
  0xfd   : > { %v633_v15 = vpop.f32.mrb[0].mxu0 }
  0xfe   : > { %v3740_v16 = vadd.f32 %v633_v15, %v457_v14  ;;  %v635_v17 = vpop.f32.mrb[1].mxu0 }
  0xff   : > { %v3742_v19 = vadd.f32 %v635_v17, %v457_v14  ;;  %v637_v20 = vpop.f32.mrb[2].mxu0 }
 0x100   : > { %v744_v21 = vmul.f32 1.442695, %v3740_v16  ;;  %v3745_v22 = vadd.f32 %v637_v20, %v462_v18  ;;  %v639_v23 = vpop.f32.mrb[3].mxu0  ;;  %vm712_vm3 = vcmp.gt.f32.partialorder %v3740_v16, 20.0 }
 0x101   : > { %v746_v24 = vmul.f32 1.442695, %v3742_v19  ;;  %v3748_v25 = vadd.f32 %v639_v23, %v462_v18  ;;  %vm713_vm1 = vcmp.gt.f32.partialorder %v3742_v19, 20.0 }
 0x102   : > { %2946 = vpow2.f32 %v744_v21  ;;  %v748_v27 = vmul.f32 1.442695, %v3745_v22  ;;  %v492_v21 = vpop.permute.xlu1 %491  ;;  %vm714_vm5 = vcmp.gt.f32.partialorder %v3745_v22, 20.0 }
 0x103   : > { %2948 = vpow2.f32 %v746_v24  ;;  %v750_v26 = vmul.f32 1.442695, %v3748_v25  ;;  %vm715_vm2 = vcmp.gt.f32.partialorder %v3748_v25, 20.0 }
 0x105   : > { %v643_v28 = vpop.f32.mrb[4].mxu0  ;;  %2950 = vpow2.f32 %v750_v26 }
 0x106   : > { %v645_v30 = vpop.f32.mrb[5].mxu0  ;;  %2952 = vpow2.f32 %v748_v27  ;;  %v3763_v45 = vadd.f32 %v643_v28, %v467_v29 }
 0x107   : > { %v3752_v31 = vadd.f32 %v645_v30, %v467_v29  ;;  %v647_v32 = vpop.f32.mrb[6].mxu0 }
 0x108   : > { %v649_v33 = vpop.f32.mrb[7].mxu0  ;;  %v3765_v46 = vadd.f32 %v647_v32, %v472_v36  ;;  %v752_v54 = vmul.f32 1.442695, %v3763_v45  ;;  %vm716_vm13 = vcmp.gt.f32.partialorder %v3763_v45, 20.0 }
 0x109   : > { %v754_v34 = vmul.f32 1.442695, %v3752_v31  ;;  %v3759_v38 = vadd.f32 %v649_v33, %v472_v36  ;;  %vm717_vm9 = vcmp.gt.f32.partialorder %v3752_v31, 20.0 }
 0x10a   : > { %v756_v55 = vmul.f32 1.442695, %v3765_v46  ;;  %vm718_vm14 = vcmp.gt.f32.partialorder %v3765_v46, 20.0 }
 0x10b   : > { %2954 = vpow2.f32 %v754_v34  ;;  %v758_v49 = vmul.f32 1.442695, %v3759_v38  ;;  %vm719_vm10 = vcmp.gt.f32.partialorder %v3759_v38, 20.0 }
 0x10c   : > { %v3755_v35 = vpop.eup %2946 }
 0x10d   : > { %v3757_v37 = vpop.eup %2948  ;;  %v653_v39 = vpop.f32.mrb[8].mxu0  ;;  %v808_v40 = vadd.f32 1.0, %v3755_v35  ;;  %v811_v61 = vmul.f32 -0.5, %v3755_v35  ;;  %v814_v7 = vand.u32 2147483647, %v3755_v35 }
 0x10e   : > { %v655_v41 = vpop.f32.mrb[9].mxu0  ;;  %v817_v42 = vadd.f32 1.0, %v3757_v37  ;;  %v3772_v51 = vadd.f32 %v653_v39, %v477_v43  ;;  %v820_v2 = vmul.f32 -0.5, %v3757_v37  ;;  %v823_v14 = vand.u32 2147483647, %v3757_v37 }
 0x10f   : > { %v657_v44 = vpop.f32.mrb[10].mxu0  ;;  %2956 = vlog2.f32 %v808_v40  ;;  %v3767_v48 = vpop.eup %2950  ;;  %v3774_v53 = vadd.f32 %v655_v41, %v477_v43  ;;  %v812_v24 = vadd.f32 1.0, %v811_v61  ;;  %vm3805_vm4 = vcmp.lt.f32.partialorder %v814_v7, 0.0004427343 }
 0x110   : > { %v659_v47 = vpop.f32.mrb[11].mxu0  ;;  %2958 = vlog2.f32 %v817_v42  ;;  %v3770_v50 = vpop.eup %2952  ;;  %v3778_v56 = vadd.f32 %v657_v44, %v482_v52  ;;  %v835_v57 = vadd.f32 1.0, %v3767_v48  ;;  %v760_v63 = vmul.f32 1.442695, %v3772_v51 }
 0x111   : > { %2960 = vpow2.f32 %v758_v49  ;;  %v3781_v59 = vadd.f32 %v659_v47, %v482_v52  ;;  %v826_v62 = vadd.f32 1.0, %v3770_v50  ;;  %v762_v3 = vmul.f32 1.442695, %v3774_v53 }
 0x112   : > { %2962 = vlog2.f32 %v835_v57  ;;  %v764_v9 = vmul.f32 1.442695, %v3778_v56  ;;  %v838_v11 = vmul.f32 -0.5, %v3767_v48  ;;  %v821_v18 = vadd.f32 1.0, %v820_v2  ;;  %v502_v2 = vpop.permute.xlu1 %501 }
 0x113   : > { %2964 = vlog2.f32 %v826_v62  ;;  %v766_v13 = vmul.f32 1.442695, %v3781_v59  ;;  %v829_v20 = vmul.f32 -0.5, %v3770_v50  ;;  %v841_v29 = vand.u32 2147483647, %v3767_v48 }
 0x114   : > { %2966 = vpow2.f32 %v752_v54  ;;  %v839_v28 = vadd.f32 1.0, %v838_v11  ;;  %v822_v39 = vmul.f32 %v3757_v37, %v821_v18  ;;  %vm3815_vm6 = vcmp.lt.f32.partialorder %v823_v14, 0.0004427343  ;;  %v497_v54 = vpop.permute.xlu0 %496 }
 0x115   : > { %v663_v60 = vpop.f32.mrb[12].mxu0  ;;  %v3793_v8 = vpop.eup %2954  ;;  %2968 = vpow2.f32 %v756_v55  ;;  %v830_v41 = vadd.f32 1.0, %v829_v20  ;;  %v813_v47 = vmul.f32 %v3755_v35, %v812_v24  ;;  %v832_v49 = vand.u32 2147483647, %v3770_v50 }
 0x116   : > { %v3786_v0 = vadd.f32 %v663_v60, %v487_v58  ;;  %v665_v1 = vpop.f32.mrb[13].mxu0  ;;  %2970 = vpow2.f32 %v760_v63  ;;  %v853_v34 = vadd.f32 1.0, %v3793_v8  ;;  %v840_v57 = vmul.f32 %v3767_v48, %v839_v28 }
 0x117   : > { %v3790_v4 = vadd.f32 %v665_v1, %v487_v58  ;;  %v667_v5 = vpop.f32.mrb[14].mxu0  ;;  %2972 = vpow2.f32 %v762_v3  ;;  %vm3827_vm7 = vcmp.lt.f32.partialorder %v841_v29, 0.0004427343  ;;  %vm833_vm8 = vcmp.lt.f32.partialorder %v832_v49, 0.0004427343  ;;  %v512_v49 = vpop.permute.xlu1 %511 }
 0x118   : > { %v669_v10 = vpop.f32.mrb[15].mxu0  ;;  %v768_v17 = vmul.f32 1.442695, %v3786_v0  ;;  %2974 = vpow2.f32 %v764_v9  ;;  %v3809_v27 = vadd.f32 %v667_v5, %v492_v21  ;;  %v831_v5 = vmul.f32 %v3770_v50, %v830_v41 }
 0x119   : > { %v2957_v12 = vpop.eup %2956  ;;  %v770_v23 = vmul.f32 1.442695, %v3790_v4  ;;  %2976 = vpow2.f32 %v766_v13  ;;  %v3821_v43 = vadd.f32 %v669_v10, %v492_v21 }
 0x11a   : > { %v2959_v15 = vpop.eup %2958  ;;  %v810_v33 = vmul.f32 0.6931472, %v2957_v12  ;;  %2978 = vpow2.f32 %v768_v17  ;;  %v772_v55 = vmul.f32 1.442695, %v3809_v27 }
 0x11b   : > { %v819_v32 = vmul.f32 0.6931472, %v2959_v15  ;;  %v3819_v42 = vpop.eup %2960  ;;  %2980 = vpow2.f32 %v770_v23  ;;  %v774_v10 = vmul.f32 1.442695, %v3821_v43 }
 0x11c   : > { %v2963_v52 = vpop.eup %2962  ;;  %2982 = vlog2.f32 %v853_v34  ;;  %v816_v63 = vsel %vm3805_vm4, %v813_v47, %v810_v33  ;;  %v871_v7 = vadd.f32 1.0, %v3819_v42  ;;  %vm723_vm4 = vcmp.gt.f32.partialorder %v3781_v59, 20.0 }
 0x11d   : > { %v673_v30 = vpop.f32.mrb[16].mxu0  ;;  %v2965_v60 = vpop.eup %2964  ;;  %v825_v35 = vsel %vm3815_vm6, %v822_v39, %v819_v32  ;;  %v837_v62 = vmul.f32 0.6931472, %v2963_v52  ;;  %v1096_v17 = vsel %vm712_vm3, %v3740_v16, %v816_v63  ;;  %v856_v16 = vmul.f32 -0.5, %v3793_v8 }
 0x11e   : > { %v675_v36 = vpop.f32.mrb[17].mxu0  ;;  %v3831_v61 = vadd.f32 %v673_v30, %v497_v54  ;;  %v3837_v1 = vpop.eup %2966  ;;  %v828_v48 = vmul.f32 0.6931472, %v2965_v60  ;;  %v1097_v14 = vsel %vm713_vm1, %v3742_v19, %v825_v35  ;;  %2984 = vlog2.f32 %v871_v7 }
 0x11f   : > { %v677_v44 = vpop.f32.mrb[18].mxu0  ;;  %v3839_v3 = vadd.f32 %v675_v36, %v497_v54  ;;  %v3843_v9 = vpop.eup %2968  ;;  %v843_v12 = vsel %vm3827_vm7, %v840_v57, %v837_v62  ;;  %2986 = vpow2.f32 %v772_v55  ;;  %v874_v39 = vmul.f32 -0.5, %v3819_v42 }
 0x120   : > { %v679_v37 = vpop.f32.mrb[19].mxu0  ;;  %v3846_v11 = vadd.f32 %v677_v44, %v502_v2  ;;  %v3850_v13 = vpop.eup %2970  ;;  %v1099_v50 = vsel %vm715_vm2, %v3748_v25, %v843_v12  ;;  %v834_v15 = vsel %vm833_vm8, %v831_v5, %v828_v48  ;;  %v776_v20 = vmul.f32 1.442695, %v3831_v61 }
 0x121   : > { %v3861_v18 = vpop.eup %2972  ;;  %v3864_v21 = vadd.f32 %v679_v37, %v502_v2  ;;  %v1145_v23 = vpack.c.bf16 %v1099_v50, %v1097_v14  ;;  %v1098_v19 = vsel %vm714_vm5, %v3745_v22, %v834_v15  ;;  %v778_v25 = vmul.f32 1.442695, %v3839_v3  ;;  %v507_v22 = vpop.permute.xlu0 %506 }
 0x122   : > { %v3869_v26 = vpop.eup %2974  ;;  %v1144_v28 = vpack.c.bf16 %v1098_v19, %v1096_v17  ;;  %v780_v32 = vmul.f32 1.442695, %v3846_v11  ;;  %2988 = vpow2.f32 %v774_v10  ;;  %v857_v54 = vadd.f32 1.0, %v856_v16 }
 0x123   : > { %v3873_v30 = vpop.eup %2976  ;;  %1304 = vmatprep.subr.bf16.mxu1 %v1145_v23  ;;  %2990 = vpow2.f32 %v776_v20  ;;  %v782_v41 = vmul.f32 1.442695, %v3864_v21  ;;  %v844_v55 = vadd.f32 1.0, %v3837_v1  ;;  %v859_v57 = vand.u32 2147483647, %v3793_v8 }
 0x124   : > { %v3876_v34 = vpop.eup %2978  ;;  %1305 = vmatpush1.bf16.msra.mxu1 %v1144_v28  ;;  %2992 = vpow2.f32 %v778_v25  ;;  %v875_v60 = vadd.f32 1.0, %v874_v39  ;;  %v877_v35 = vand.u32 2147483647, %v3819_v42  ;;  %v862_v62 = vadd.f32 1.0, %v3843_v9 }
 0x125   : > { %v683_v24 = vpop.f32.mrb[20].mxu0  ;;  %v3879_v40 = vpop.eup %2980  ;;  %2994 = vpow2.f32 %v780_v32  ;;  %v858_v10 = vmul.f32 %v3793_v8, %v857_v54  ;;  %v847_v12 = vmul.f32 -0.5, %v3837_v1  ;;  %vm3901_vm11 = vcmp.lt.f32.partialorder %v859_v57, 0.0004427343 }
 0x126   : > { %v685_v29 = vpop.f32.mrb[21].mxu0  ;;  %v3882_v44 = vadd.f32 %v683_v24, %v507_v22  ;;  %v2983_v47 = vpop.eup %2982  ;;  %2996 = vpow2.f32 %v782_v41  ;;  %v876_v24 = vmul.f32 %v3819_v42, %v875_v60  ;;  %vm3909_vm12 = vcmp.lt.f32.partialorder %v877_v35, 0.0004427343 }
 0x127   : > { %v687_v33 = vpop.f32.mrb[22].mxu0  ;;  %v3884_v52 = vadd.f32 %v685_v29, %v507_v22  ;;  %v855_v2 = vmul.f32 0.6931472, %v2983_v47  ;;  %v517_v5 = vpop.permute.xlu0 %516  ;;  %2998 = vlog2.f32 %v844_v55  ;;  %v865_v25 = vmul.f32 -0.5, %v3843_v9 }
 0x128   : > { %v689_v36 = vpop.f32.mrb[23].mxu0  ;;  %v3888_v37 = vadd.f32 %v687_v33, %v512_v49  ;;  %v784_v63 = vmul.f32 1.442695, %v3882_v44  ;;  %3000 = vlog2.f32 %v862_v62  ;;  %v2985_v23 = vpop.eup %2984  ;;  %v889_v33 = vadd.f32 1.0, %v3861_v18 }
 0x129   : > { %v3891_v58 = vadd.f32 %v689_v36, %v512_v49  ;;  %v786_v7 = vmul.f32 1.442695, %v3884_v52  ;;  %v3914_v29 = vpop.eup %2986  ;;  %v861_v16 = vsel %vm3901_vm11, %v858_v10, %v855_v2  ;;  %v873_v32 = vmul.f32 0.6931472, %v2985_v23  ;;  %v522_v57 = vpop.permute.xlu1 %521 }
 0x12a   : > { %v788_v50 = vmul.f32 1.442695, %v3888_v37  ;;  %3002 = vpow2.f32 %v784_v63  ;;  %v848_v42 = vadd.f32 1.0, %v847_v12  ;;  %v850_v36 = vand.u32 2147483647, %v3837_v1 }
 0x12b   : > { %v790_v19 = vmul.f32 1.442695, %v3891_v58  ;;  %3004 = vpow2.f32 %v786_v7  ;;  %v868_v39 = vand.u32 2147483647, %v3843_v9  ;;  %v879_v47 = vsel %vm3909_vm12, %v876_v24, %v873_v32 }
 0x12c   : > { %v3919_v22 = vpop.eup %2988  ;;  %3006 = vpow2.f32 %v788_v50  ;;  %v1101_v60 = vsel %vm717_vm9, %v3752_v31, %v861_v16  ;;  %v1103_v35 = vsel %vm719_vm10, %v3759_v38, %v879_v47  ;;  %v866_v62 = vadd.f32 1.0, %v865_v25  ;;  %v527_v47 = vpop.permute.xlu0 %526 }
 0x12d   : > { %v693_v48 = vpop.f32.mrb[24].mxu0  ;;  %v3923_v41 = vpop.eup %2990  ;;  %3008 = vpow2.f32 %v790_v19  ;;  %v1147_v2 = vpack.c.bf16 %v1103_v35, %v1101_v60  ;;  %v849_v7 = vmul.f32 %v3837_v1, %v848_v42  ;;  %vm3945_vm15 = vcmp.lt.f32.partialorder %v850_v36, 0.0004427343 }
 0x12e   : > { %v695_v14 = vpop.f32.mrb[25].mxu0  ;;  %v3905_v17 = vadd.f32 %v693_v48, %v517_v5  ;;  %v3930_v55 = vpop.eup %2992  ;;  %3010 = vlog2.f32 %v889_v33  ;;  %vm3949_vm0 = vcmp.lt.f32.partialorder %v868_v39, 0.0004427343  ;;  %v907_v38 = vadd.f32 1.0, %v3873_v30 }
 0x12f   : > { %v697_v20 = vpop.f32.mrb[26].mxu0  ;;  %v3928_v54 = vadd.f32 %v695_v14, %v517_v5  ;;  %v3939_v63 = vpop.eup %2994  ;;  %1306 = vmatprep.subr.bf16.mxu1 %v1147_v2  ;;  %v880_v1 = vadd.f32 1.0, %v3850_v13  ;;  %v867_v19 = vmul.f32 %v3843_v9, %v866_v62  ;;  %v892_v24 = vmul.f32 -0.5, %v3861_v18 }
 0x130   : > { %v699_v28 = vpop.f32.mrb[27].mxu0  ;;  %v792_v49 = vmul.f32 1.442695, %v3905_v17  ;;  %v3942_v48 = vadd.f32 %v697_v20, %v522_v57  ;;  %v3954_v14 = vpop.eup %2996  ;;  %v898_v8 = vadd.f32 1.0, %v3869_v26  ;;  %v883_v36 = vmul.f32 -0.5, %v3850_v13 }
 0x131   : > { %v794_v50 = vmul.f32 1.442695, %v3928_v54  ;;  %v3957_v15 = vadd.f32 %v699_v28, %v522_v57  ;;  %v2999_v23 = vpop.eup %2998  ;;  %v910_v28 = vmul.f32 -0.5, %v3873_v30  ;;  %v901_v9 = vmul.f32 -0.5, %v3869_v26 }
 0x132   : > { %3012 = vpow2.f32 %v792_v49  ;;  %v3001_v16 = vpop.eup %3000  ;;  %v846_v32 = vmul.f32 0.6931472, %v2999_v23  ;;  %v796_v33 = vmul.f32 1.442695, %v3942_v48  ;;  %v895_v60 = vand.u32 2147483647, %v3861_v18 }
 0x133   : > { %3014 = vlog2.f32 %v907_v38  ;;  %v864_v42 = vmul.f32 0.6931472, %v3001_v16  ;;  %v798_v57 = vmul.f32 1.442695, %v3957_v15  ;;  %v893_v2 = vadd.f32 1.0, %v892_v24 }
 0x134   : > { %3016 = vlog2.f32 %v880_v1  ;;  %v3971_v39 = vpop.eup %3002  ;;  %v852_v49 = vsel %vm3945_vm15, %v849_v7, %v846_v32  ;;  %v913_v38 = vand.u32 2147483647, %v3873_v30  ;;  %vm721_vm1 = vcmp.gt.f32.partialorder %v3774_v53, 20.0 }
 0x135   : > { %v703_v5 = vpop.f32.mrb[28].mxu0  ;;  %3018 = vlog2.f32 %v898_v8  ;;  %v3977_v35 = vpop.eup %3004  ;;  %v870_v62 = vsel %vm3949_vm0, %v867_v19, %v864_v42  ;;  %v1100_v7 = vsel %vm716_vm13, %v3763_v45, %v852_v49  ;;  %v886_v31 = vand.u32 2147483647, %v3850_v13 }
 0x136   : > { %v705_v12 = vpop.f32.mrb[29].mxu0  ;;  %3020 = vpow2.f32 %v794_v50  ;;  %v3982_v1 = vadd.f32 %v703_v5, %v527_v47  ;;  %v3984_v23 = vpop.eup %3006  ;;  %v1102_v10 = vsel %vm718_vm14, %v3765_v46, %v870_v62  ;;  %v911_v50 = vadd.f32 1.0, %v910_v28 }
 0x137   : > { %v3960_v20 = vpop.f32.mrb[30].mxu0  ;;  %v3994_v19 = vpop.eup %3008  ;;  %v1146_v24 = vpack.c.bf16 %v1102_v10, %v1100_v7  ;;  %v884_v5 = vadd.f32 1.0, %v883_v36  ;;  %v902_v8 = vadd.f32 1.0, %v901_v9  ;;  %v904_v16 = vand.u32 2147483647, %v3869_v26 }
 0x138   : > { %v3965_v25 = vpop.f32.mrb[31].mxu0  ;;  %v3011_v32 = vpop.eup %3010  ;;  %vm720_vm2 = vcmp.gt.f32.partialorder %v3772_v51, 20.0  ;;  %vm722_vm3 = vcmp.gt.f32.partialorder %v3778_v56, 20.0  ;;  %3022 = vpow2.f32 %v796_v33  ;;  %v4000_v45 = vadd.f32 %v705_v12, %v527_v47 }
 0x139   : > { %v925_v46 = vadd.f32 1.0, %v3879_v40  ;;  %1307 = vmatpush1.bf16.msra.mxu1 %v1146_v24  ;;  %3024 = vpow2.f32 %v798_v57  ;;  %v891_v28 = vmul.f32 0.6931472, %v3011_v32  ;;  %vm4003_vm5 = vcmp.lt.f32.partialorder %v895_v60, 0.0004427343 }
 0x13a   : > { %v800_v36 = vmul.f32 1.442695, %v3982_v1  ;;  %v894_v49 = vmul.f32 %v3861_v18, %v893_v2  ;;  %v912_v62 = vmul.f32 %v3873_v30, %v911_v50  ;;  %vm4012_vm6 = vcmp.lt.f32.partialorder %v913_v38, 0.0004427343  ;;  %v532_v30 = vpop.permute.xlu1 %531 }
 0x13b   : > { %vm4016_vm7 = vcmp.lt.f32.partialorder %v886_v31, 0.0004427343  ;;  %v885_v57 = vmul.f32 %v3850_v13, %v884_v5  ;;  %v903_v60 = vmul.f32 %v3869_v26, %v902_v8  ;;  %vm4022_vm8 = vcmp.lt.f32.partialorder %v904_v16, 0.0004427343 }
 0x13c   : > { %v4008_v9 = vpop.eup %3012  ;;  %3026 = vlog2.f32 %v925_v46  ;;  %v897_v2 = vsel %vm4003_vm5, %v894_v49, %v891_v28  ;;  %v802_v10 = vmul.f32 1.442695, %v4000_v45  ;;  %v943_v50 = vadd.f32 1.0, %v3919_v22 }
 0x13d   : > { %v3015_v47 = vpop.eup %3014  ;;  %3028 = vpow2.f32 %v800_v36  ;;  %v4031_v13 = vadd.f32 %v3960_v20, %v532_v30  ;;  %v4034_v26 = vadd.f32 %v3965_v25, %v532_v30  ;;  %v928_v32 = vmul.f32 -0.5, %v3879_v40 }
 0x13e   : > { %v3017_v18 = vpop.eup %3016  ;;  %v909_v38 = vmul.f32 0.6931472, %v3015_v47  ;;  %3030 = vlog2.f32 %v943_v50  ;;  %v1105_v46 = vsel %vm721_vm1, %v3774_v53, %v897_v2  ;;  %v916_v28 = vadd.f32 1.0, %v3876_v34 }
 0x13f   : > { %v3019_v31 = vpop.eup %3018  ;;  %v882_v24 = vmul.f32 0.6931472, %v3017_v18  ;;  %v931_v49 = vand.u32 2147483647, %v3879_v40  ;;  %v919_v12 = vmul.f32 -0.5, %v3876_v34  ;;  %vm725_vm9 = vcmp.gt.f32.partialorder %v3790_v4, 20.0 }
 0x140   : > { %v4036_v5 = vpop.eup %3020  ;;  %v915_v8 = vsel %vm4012_vm6, %v912_v62, %v909_v38  ;;  %v900_v16 = vmul.f32 0.6931472, %v3019_v31  ;;  %v946_v62 = vmul.f32 -0.5, %v3919_v22  ;;  %3032 = vlog2.f32 %v916_v28 }
 0x141   : > { %v1107_v20 = vsel %vm723_vm4, %v3781_v59, %v915_v8  ;;  %v888_v25 = vsel %vm4016_vm7, %v885_v57, %v882_v24  ;;  %3034 = vpow2.f32 %v802_v10  ;;  %v934_v57 = vadd.f32 1.0, %v3914_v29 }
 0x142   : > { %v1149_v42 = vpack.c.bf16 %v1107_v20, %v1105_v46  ;;  %v906_v36 = vsel %vm4022_vm8, %v903_v60, %v900_v16  ;;  %v1104_v53 = vsel %vm720_vm2, %v3772_v51, %v888_v25  ;;  %v4061_v33 = vpop.eup %3022  ;;  %vm727_vm10 = vcmp.gt.f32.partialorder %v3821_v43, 20.0 }
 0x143   : > { %v1106_v59 = vsel %vm722_vm3, %v3778_v56, %v906_v36  ;;  %v4064_v60 = vpop.eup %3024  ;;  %v806_v51 = vmul.f32 1.442695, %v4034_v26  ;;  %v929_v7 = vadd.f32 1.0, %v928_v32  ;;  %v949_v56 = vand.u32 2147483647, %v3919_v22 }
 0x144   : > { %1308 = vmatprep.subr.bf16.mxu1 %v1149_v42  ;;  %v1148_v47 = vpack.c.bf16 %v1106_v59, %v1104_v53  ;;  %v961_v18 = vadd.f32 1.0, %v3930_v55  ;;  %v947_v30 = vadd.f32 1.0, %v946_v62  ;;  %v922_v2 = vand.u32 2147483647, %v3876_v34 }
 0x145   : > { %3036 = vlog2.f32 %v934_v57  ;;  %v937_v38 = vmul.f32 -0.5, %v3914_v29  ;;  %v4074_v50 = vmul.f32 1.442695, %v4031_v13  ;;  %vm4076_vm11 = vcmp.lt.f32.partialorder %v931_v49, 0.0004427343 }
 0x146   : > { %1309 = vmatpush1.bf16.msra.mxu1 %v1148_v47  ;;  %v3027_v10 = vpop.eup %3026  ;;  %v920_v24 = vadd.f32 1.0, %v919_v12  ;;  %3038 = vlog2.f32 %v961_v18  ;;  %v940_v16 = vand.u32 2147483647, %v3914_v29  ;;  %v964_v32 = vmul.f32 -0.5, %v3930_v55 }
 0x147   : > { %v927_v8 = vmul.f32 0.6931472, %v3027_v10  ;;  %v979_v46 = vadd.f32 1.0, %v3954_v14  ;;  %v4083_v20 = vpop.eup %3028  ;;  %3040 = vpow2.f32 %v806_v51  ;;  %v930_v25 = vmul.f32 %v3879_v40, %v929_v7 }
 0x148   : > { %vm4086_vm12 = vcmp.lt.f32.partialorder %v949_v56, 0.0004427343  ;;  %v952_v42 = vadd.f32 1.0, %v3923_v41  ;;  %v3031_v36 = vpop.eup %3030  ;;  %v948_v49 = vmul.f32 %v3919_v22, %v947_v30  ;;  %vm4092_vm13 = vcmp.lt.f32.partialorder %v922_v2, 0.0004427343 }
 0x149   : > { %v938_v53 = vadd.f32 1.0, %v937_v38  ;;  %3042 = vlog2.f32 %v979_v46  ;;  %vm724_vm14 = vcmp.gt.f32.partialorder %v3786_v0, 20.0  ;;  %vm726_vm15 = vcmp.gt.f32.partialorder %v3809_v27, 20.0 }
 0x14a   : > { %v933_v40 = vsel %vm4076_vm11, %v930_v25, %v927_v8  ;;  %v945_v59 = vmul.f32 0.6931472, %v3031_v36  ;;  %v921_v12 = vmul.f32 %v3876_v34, %v920_v24  ;;  %v967_v47 = vand.u32 2147483647, %v3930_v55  ;;  %v3033_v7 = vpop.eup %3032 }
 0x14b   : > { %vm4102_vm0 = vcmp.lt.f32.partialorder %v940_v16, 0.0004427343  ;;  %v965_v57 = vadd.f32 1.0, %v964_v32  ;;  %3044 = vlog2.f32 %v952_v42  ;;  %v970_v51 = vadd.f32 1.0, %v3939_v63  ;;  %v4112_v2 = vpop.eup %3034 }
 0x14c   : > { %v951_v56 = vsel %vm4086_vm12, %v948_v49, %v945_v59  ;;  %v982_v18 = vmul.f32 -0.5, %v3954_v14  ;;  %v985_v30 = vand.u32 2147483647, %v3954_v14  ;;  %v955_v34 = vmul.f32 -0.5, %v3923_v41 }
 0x14d   : > { %v1109_v38 = vsel %vm725_vm9, %v3790_v4, %v933_v40  ;;  %v1111_v10 = vsel %vm727_vm10, %v3821_v43, %v951_v56  ;;  %v918_v31 = vmul.f32 0.6931472, %v3033_v7  ;;  %3046 = vlog2.f32 %v970_v51 }
 0x14e   : > { %vm729_vm1 = vcmp.gt.f32.partialorder %v3839_v3, 20.0  ;;  %vm731_vm2 = vcmp.gt.f32.partialorder %v3864_v21, 20.0  ;;  %v1151_v24 = vpack.c.bf16 %v1111_v10, %v1109_v38  ;;  %v958_v8 = vand.u32 2147483647, %v3923_v41 }
 0x14f   : > { %v973_v16 = vmul.f32 -0.5, %v3939_v63  ;;  %v997_v32 = vadd.f32 1.0, %v3977_v35  ;;  %v3037_v46 = vpop.eup %3036  ;;  %v939_v4 = vmul.f32 %v3914_v29, %v938_v53  ;;  %v966_v25 = vmul.f32 %v3930_v55, %v965_v57 }
 0x150   : > { %vm4127_vm3 = vcmp.lt.f32.partialorder %v967_v47, 0.0004427343  ;;  %v1015_v28 = vadd.f32 1.0, %v3994_v19  ;;  %v3039_v42 = vpop.eup %3038  ;;  %1310 = vmatprep.subr.bf16.mxu1 %v1151_v24  ;;  %v924_v36 = vsel %vm4092_vm13, %v921_v12, %v918_v31  ;;  %v936_v49 = vmul.f32 0.6931472, %v3037_v46 }
 0x151   : > { %v983_v40 = vadd.f32 1.0, %v982_v18  ;;  %3048 = vlog2.f32 %v997_v32  ;;  %v963_v59 = vmul.f32 0.6931472, %v3039_v42  ;;  %vm4134_vm4 = vcmp.lt.f32.partialorder %v985_v30, 0.0004427343  ;;  %v4138_v55 = vpop.eup %3040 }
 0x152   : > { %v956_v29 = vadd.f32 1.0, %v955_v34  ;;  %3050 = vlog2.f32 %v1015_v28  ;;  %vm728_vm5 = vcmp.gt.f32.partialorder %v3831_v61, 20.0  ;;  %vm730_vm6 = vcmp.gt.f32.partialorder %v3846_v11, 20.0 }
 0x153   : > { %v942_v62 = vsel %vm4102_vm0, %v939_v4, %v936_v49  ;;  %vm4144_vm7 = vcmp.lt.f32.partialorder %v958_v8, 0.0004427343  ;;  %v974_v12 = vadd.f32 1.0, %v973_v16  ;;  %v988_v47 = vadd.f32 1.0, %v3971_v39  ;;  %v3043_v57 = vpop.eup %3042 }
 0x154   : > { %v1108_v7 = vsel %vm724_vm14, %v3786_v0, %v924_v36  ;;  %v1110_v56 = vsel %vm726_vm15, %v3809_v27, %v942_v62  ;;  %v1000_v18 = vmul.f32 -0.5, %v3977_v35  ;;  %v1018_v22 = vmul.f32 -0.5, %v3994_v19 }
 0x155   : > { %v1150_v30 = vpack.c.bf16 %v1110_v56, %v1108_v7  ;;  %v969_v34 = vsel %vm4127_vm3, %v966_v25, %v963_v59  ;;  %v981_v38 = vmul.f32 0.6931472, %v3043_v57  ;;  %v984_v10 = vmul.f32 %v3954_v14, %v983_v40  ;;  %v3045_v31 = vpop.eup %3044 }
 0x156   : > { %v957_v24 = vmul.f32 %v3923_v41, %v956_v29  ;;  %v976_v0 = vand.u32 2147483647, %v3939_v63  ;;  %v1003_v8 = vand.u32 2147483647, %v3977_v35  ;;  %3052 = vlog2.f32 %v988_v47 }
 0x157   : > { %vm733_vm8 = vcmp.gt.f32.partialorder %v3884_v52, 20.0  ;;  %vm735_vm9 = vcmp.gt.f32.partialorder %v3891_v58, 20.0  ;;  %1311 = vmatpush1.bf16.msra.mxu1 %v1150_v30  ;;  %v987_v27 = vsel %vm4134_vm4, %v984_v10, %v981_v38  ;;  %v954_v16 = vmul.f32 0.6931472, %v3045_v31  ;;  %v3047_v46 = vpop.eup %3046 }
 0x158   : > { %v975_v32 = vmul.f32 %v3939_v63, %v974_v12  ;;  %v1006_v14 = vadd.f32 1.0, %v3984_v23  ;;  %v1113_v41 = vsel %vm729_vm1, %v3839_v3, %v969_v34  ;;  %v1115_v4 = vsel %vm731_vm2, %v3864_v21, %v987_v27 }
 0x159   : > { %v1001_v25 = vadd.f32 1.0, %v1000_v18  ;;  %v1019_v43 = vadd.f32 1.0, %v1018_v22  ;;  %v1153_v28 = vpack.c.bf16 %v1115_v4, %v1113_v41  ;;  %v960_v42 = vsel %vm4144_vm7, %v957_v24, %v954_v16 }
 0x15a   : > { %v972_v36 = vmul.f32 0.6931472, %v3047_v46  ;;  %3054 = vlog2.f32 %v1006_v14  ;;  %vm977_vm10 = vcmp.lt.f32.partialorder %v976_v0, 0.0004427343  ;;  %v1021_v63 = vand.u32 2147483647, %v3994_v19 }
 0x15b   : > { %v991_v49 = vmul.f32 -0.5, %v3971_v39  ;;  %v1033_v40 = vadd.f32 1.0, %v4036_v5  ;;  %v3049_v3 = vpop.eup %3048  ;;  %1312 = vmatprep.subr.bf16.mxu1 %v1153_v28  ;;  %vm4180_vm11 = vcmp.lt.f32.partialorder %v1003_v8, 0.0004427343  ;;  %v1009_v51 = vmul.f32 -0.5, %v3984_v23 }
 0x15c   : > { %v978_v59 = vsel %vm977_vm10, %v975_v32, %v972_v36  ;;  %v1051_v29 = vadd.f32 1.0, %v4064_v60  ;;  %v3051_v62 = vpop.eup %3050  ;;  %v1112_v53 = vsel %vm728_vm5, %v3831_v61, %v960_v42  ;;  %v999_v47 = vmul.f32 0.6931472, %v3049_v3 }
 0x15d   : > { %v1114_v12 = vsel %vm730_vm6, %v3846_v11, %v978_v59  ;;  %v1002_v57 = vmul.f32 %v3977_v35, %v1001_v25  ;;  %v1017_v56 = vmul.f32 0.6931472, %v3051_v62  ;;  %v1020_v18 = vmul.f32 %v3994_v19, %v1019_v43 }
 0x15e   : > { %v1152_v7 = vpack.c.bf16 %v1114_v12, %v1112_v53  ;;  %3056 = vlog2.f32 %v1033_v40  ;;  %vm732_vm12 = vcmp.gt.f32.partialorder %v3882_v44, 20.0  ;;  %vm734_vm13 = vcmp.gt.f32.partialorder %v3888_v37, 20.0 }
 0x15f   : > { %v1005_v22 = vsel %vm4180_vm11, %v1002_v57, %v999_v47  ;;  %vm1022_vm14 = vcmp.lt.f32.partialorder %v1021_v63, 0.0004427343  ;;  %v992_v61 = vadd.f32 1.0, %v991_v49  ;;  %3058 = vlog2.f32 %v1051_v29 }
 0x160   : > { %1313 = vmatpush1.bf16.msra.mxu1 %v1152_v7  ;;  %v1023_v11 = vsel %vm1022_vm14, %v1020_v18, %v1017_v56  ;;  %v994_v30 = vand.u32 2147483647, %v3971_v39  ;;  %v1010_v35 = vadd.f32 1.0, %v1009_v51  ;;  %v1036_v34 = vmul.f32 -0.5, %v4036_v5  ;;  %v3053_v38 = vpop.eup %3052 }
 0x161   : > { %3060 = vpow2.f32 %v4074_v50  ;;  %v1117_v19 = vsel %vm733_vm8, %v3884_v52, %v1005_v22  ;;  %v1119_v10 = vsel %vm735_vm9, %v3891_v58, %v1023_v11  ;;  %v1024_v31 = vadd.f32 1.0, %v4008_v9 }
 0x162   : > { %v1155_v24 = vpack.c.bf16 %v1119_v10, %v1117_v19  ;;  %v990_v0 = vmul.f32 0.6931472, %v3053_v38  ;;  %v1012_v8 = vand.u32 2147483647, %v3984_v23  ;;  %v1054_v27 = vmul.f32 -0.5, %v4064_v60 }
 0x163   : > { %v993_v16 = vmul.f32 %v3971_v39, %v992_v61  ;;  %v1039_v50 = vand.u32 2147483647, %v4036_v5  ;;  %3062 = vlog2.f32 %v1024_v31  ;;  %v1042_v32 = vadd.f32 1.0, %v4061_v33 }
 0x164   : > { %v3055_v52 = vpop.eup %3054  ;;  %vm737_vm15 = vcmp.gt.f32.partialorder %v3928_v54, 20.0  ;;  %1314 = vmatprep.subr.bf16.mxu1 %v1155_v24  ;;  %vm4214_vm0 = vcmp.lt.f32.partialorder %v994_v30, 0.0004427343  ;;  %v1011_v14 = vmul.f32 %v3984_v23, %v1010_v35  ;;  %v1037_v46 = vadd.f32 1.0, %v1036_v34 }
 0x165   : > { %v996_v41 = vsel %vm4214_vm0, %v993_v16, %v990_v0  ;;  %v1008_v39 = vmul.f32 0.6931472, %v3055_v52  ;;  %v1027_v4 = vmul.f32 -0.5, %v4008_v9  ;;  %3064 = vlog2.f32 %v1042_v32 }
 0x166   : > { %vm1013_vm1 = vcmp.lt.f32.partialorder %v1012_v8, 0.0004427343  ;;  %v1055_v25 = vadd.f32 1.0, %v1054_v27  ;;  %v1057_v43 = vand.u32 2147483647, %v4064_v60  ;;  %v1069_v28 = vadd.f32 1.0, %v4112_v2 }
 0x167   : > { %v1014_v42 = vsel %vm1013_vm1, %v1011_v14, %v1008_v39  ;;  %vm4224_vm2 = vcmp.lt.f32.partialorder %v1039_v50, 0.0004427343  ;;  %v1045_v23 = vmul.f32 -0.5, %v4061_v33  ;;  %v1087_v63 = vadd.f32 1.0, %v4138_v55 }
 0x168   : > { %v3057_v49 = vpop.eup %3056  ;;  %v1116_v40 = vsel %vm732_vm12, %v3882_v44, %v996_v41  ;;  %v1118_v3 = vsel %vm734_vm13, %v3888_v37, %v1014_v42  ;;  %v1038_v59 = vmul.f32 %v4036_v5, %v1037_v46  ;;  %3066 = vlog2.f32 %v1069_v28 }
 0x169   : > { %v3059_v21 = vpop.eup %3058  ;;  %v1154_v51 = vpack.c.bf16 %v1118_v3, %v1116_v40  ;;  %v1035_v29 = vmul.f32 0.6931472, %v3057_v49  ;;  %v1028_v62 = vadd.f32 1.0, %v1027_v4  ;;  %3068 = vlog2.f32 %v1087_v63 }
 0x16a   : > { %v1053_v53 = vmul.f32 0.6931472, %v3059_v21  ;;  %v1056_v12 = vmul.f32 %v4064_v60, %v1055_v25  ;;  %vm1058_vm3 = vcmp.lt.f32.partialorder %v1057_v43, 0.0004427343  ;;  %v1072_v47 = vmul.f32 -0.5, %v4112_v2 }
 0x16b   : > { %v4239_v57 = vpop.eup %3060  ;;  %1315 = vmatpush1.bf16.msra.mxu1 %v1154_v51  ;;  %v1041_v44 = vsel %vm4224_vm2, %v1038_v59, %v1035_v29  ;;  %v1030_v37 = vand.u32 2147483647, %v4008_v9  ;;  %v1046_v5 = vadd.f32 1.0, %v1045_v23  ;;  %v1060_v7 = vadd.f32 1.0, %v4083_v20 }
 0x16c   : > { %vm739_vm4 = vcmp.gt.f32.partialorder %v3957_v15, 20.0  ;;  %v1059_v56 = vsel %vm1058_vm3, %v1056_v12, %v1053_v53  ;;  %v1048_v18 = vand.u32 2147483647, %v4061_v33  ;;  %v1090_v60 = vmul.f32 -0.5, %v4138_v55  ;;  %v2934_v53 = vld [vmem:[%s5568_s3 + $0x20] sm:$0xff]   ;;  %v2935_v12 = vld [vmem:[%s5568_s3 + $0x28] sm:$0xff]  }
 0x16d   : > { %v3063_v22 = vpop.eup %3062  ;;  %v1121_v61 = vsel %vm737_vm15, %v3928_v54, %v1041_v44  ;;  %v1123_v11 = vsel %vm739_vm4, %v3957_v15, %v1059_v56  ;;  %v1029_v30 = vmul.f32 %v4008_v9, %v1028_v62  ;;  %3070 = vlog2.f32 %v1060_v7  ;;  %v2931_v62 = vld [vmem:[%s5568_s3 + $0x8] sm:$0xff]   ;;  %v1179_v44 = vpop.permute.xlu0 %1178 }
 0x16e   : > { %v1157_v35 = vpack.c.bf16 %v1123_v11, %v1121_v61  ;;  %v1026_v34 = vmul.f32 0.6931472, %v3063_v22  ;;  %v1073_v38 = vadd.f32 1.0, %v1072_v47  ;;  %v1078_v19 = vadd.f32 1.0, %v4239_v57  ;;  %v2936_v47 = vld [vmem:[%s5568_s3 + $0x30] sm:$0xff]   ;;  %v1184_v56 = vpop.permute.xlu1 %1183 }
 0x16f   : > { %v3065_v10 = vpop.eup %3064  ;;  %vm4254_vm5 = vcmp.lt.f32.partialorder %v1030_v37, 0.0004427343  ;;  %v1047_v24 = vmul.f32 %v4061_v33, %v1046_v5  ;;  %v1075_v0 = vand.u32 2147483647, %v4112_v2  ;;  %v1091_v9 = vadd.f32 1.0, %v1090_v60 }
 0x170   : > { %1316 = vmatprep.subr.bf16.mxu1 %v1157_v35  ;;  %v1032_v54 = vsel %vm4254_vm5, %v1029_v30, %v1026_v34  ;;  %v1044_v15 = vmul.f32 0.6931472, %v3065_v10  ;;  %3072 = vlog2.f32 %v1078_v19  ;;  %vm1049_vm6 = vcmp.lt.f32.partialorder %v1048_v18, 0.0004427343 }
 0x171   : > { %v1093_v8 = vand.u32 2147483647, %v4138_v55  ;;  %v1063_v27 = vmul.f32 -0.5, %v4083_v20  ;;  %vm736_vm7 = vcmp.gt.f32.partialorder %v3905_v17, 20.0  ;;  %vm738_vm8 = vcmp.gt.f32.partialorder %v3942_v48, 20.0  ;;  %v1189_v30 = vpop.permute.xlu0 %1188 }
 0x172   : > { %v3067_v16 = vpop.eup %3066  ;;  %v1050_v33 = vsel %vm1049_vm6, %v1047_v24, %v1044_v15  ;;  %v1074_v50 = vmul.f32 %v4112_v2, %v1073_v38  ;;  %v1120_v52 = vsel %vm736_vm7, %v3905_v17, %v1032_v54  ;;  %v1081_v46 = vmul.f32 -0.5, %v4239_v57  ;;  %v1194_v10 = vpop.permute.xlu1 %1193 }
 0x173   : > { %v3069_v32 = vpop.eup %3068  ;;  %v1122_v58 = vsel %vm738_vm8, %v3942_v48, %v1050_v33  ;;  %v1071_v14 = vmul.f32 0.6931472, %v3067_v16  ;;  %vm1076_vm9 = vcmp.lt.f32.partialorder %v1075_v0, 0.0004427343  ;;  %v1092_v4 = vmul.f32 %v4138_v55, %v1091_v9 }
 0x174   : > { %v1156_v41 = vpack.c.bf16 %v1122_v58, %v1120_v52  ;;  %v1089_v39 = vmul.f32 0.6931472, %v3069_v32  ;;  %vm1094_vm10 = vcmp.lt.f32.partialorder %v1093_v8, 0.0004427343  ;;  %v1064_v43 = vadd.f32 1.0, %v1063_v27 }
 0x175   : > { %v1077_v25 = vsel %vm1076_vm9, %v1074_v50, %v1071_v14  ;;  %vm741_vm11 = vcmp.gt.f32.partialorder %v4000_v45, 20.0  ;;  %vm743_vm12 = vcmp.gt.f32.partialorder %v4034_v26, 20.0  ;;  %v1066_v17 = vand.u32 2147483647, %v4083_v20  ;;  %v4330_v27 = vpop.permute.xlu0 %1198 }
 0x176   : > { %1317 = vmatpush1.bf16.msra.mxu1 %v1156_v41  ;;  %v1095_v2 = vsel %vm1094_vm10, %v1092_v4, %v1089_v39  ;;  %v1125_v28 = vsel %vm741_vm11, %v4000_v45, %v1077_v25  ;;  %v1082_v36 = vadd.f32 1.0, %v1081_v46  ;;  %v1084_v55 = vand.u32 2147483647, %v4239_v57  ;;  %v4337_v41 = vpop.permute.xlu1 %1203 }
 0x177   : > { %v3071_v48 = vpop.eup %3070  ;;  %v1127_v42 = vsel %vm743_vm12, %v4034_v26, %v1095_v2  ;;  %v1065_v49 = vmul.f32 %v4083_v20, %v1064_v43  ;;  %vm1067_vm13 = vcmp.lt.f32.partialorder %v1066_v17, 0.0004427343  ;;  %vm740_vm15 = vcmp.gt.f32.partialorder %v3982_v1, 20.0  ;;  %v2930_v20 = vld [vmem:[%s5568_s3] sm:$0xff]  }
 0x178   : > { %v1159_v23 = vpack.c.bf16 %v1127_v42, %v1125_v28  ;;  %v1062_v63 = vmul.f32 0.6931472, %v3071_v48  ;;  %v1083_v21 = vmul.f32 %v4239_v57, %v1082_v36  ;;  %vm1085_vm14 = vcmp.lt.f32.partialorder %v1084_v55, 0.0004427343  ;;  %v2937_v57 = vld [vmem:[%s5568_s3 + $0x38] sm:$0xff]  }
 0x179   : > { %vm742_vm0 = vcmp.gt.f32.partialorder %v4031_v13, 20.0 }
 0x17a   : > { %v3073_v40 = vpop.eup %3072  ;;  %1318 = vmatprep.subr.bf16.mxu1 %v1159_v23  ;;  %v1068_v3 = vsel %vm1067_vm13, %v1065_v49, %v1062_v63  ;;  %v4352_v23 = vpop.permute.xlu0 %1208 }
 0x17b   : > { %v1080_v59 = vmul.f32 0.6931472, %v3073_v40  ;;  %v1124_v26 = vsel %vm740_vm15, %v3982_v1, %v1068_v3  ;;  %v2932_v1 = vld [vmem:[%s5568_s3 + $0x10] sm:$0xff]  }
 0x17d   : > { %v1086_v45 = vsel %vm1085_vm14, %v1083_v21, %v1080_v59 }
 0x17e   : > { %v1126_v51 = vsel %vm742_vm0, %v4031_v13, %v1086_v45  ;;  %v2933_v13 = vld [vmem:[%s5568_s3 + $0x18] sm:$0xff]  }
 0x17f   : > { %v1158_v29 = vpack.c.bf16 %v1126_v51, %v1124_v26 }
 0x181   : > { %1319 = vmatpush1.bf16.msra.mxu1 %v1158_v29 }
 0x184   : > { %1337 = vmatmul.mubr.bf16.vlgmr.msra.gmra.mrb[0].mxu1 %v2930_v20 }
 0x185   : > { %1346 = vmatprep.mubr.bf16.mxu1 %v5577_v6 }
 0x18c   : > { %1347 = vmatmul.mubr.bf16.gmra.mrb[4].mxu1 %v2931_v62 }
 0x18d   : > { %1356 = vmatprep.mubr.bf16.mxu1 %v5577_v6 }
 0x194   : > { %1357 = vmatmul.mubr.bf16.gmra.mrb[8].mxu1 %v2932_v1 }
 0x195   : > { %1366 = vmatprep.mubr.bf16.mxu1 %v5577_v6 }
 0x19c   : > { %1367 = vmatmul.mubr.bf16.gmra.mrb[12].mxu1 %v2933_v13  ;;  %v4371_v13 = vpop.permute.xlu1 %1213 }
 0x19d   : > { %1376 = vmatprep.mubr.bf16.mxu1 %v5577_v6 }
 0x1a4   : > { %1377 = vmatmul.mubr.bf16.gmra.mrb[16].mxu1 %v2934_v53 }
 0x1a5   : > { %1386 = vmatprep.mubr.bf16.mxu1 %v5577_v6 }
 0x1ac   : > { %1387 = vmatmul.mubr.bf16.gmra.mrb[20].mxu1 %v2935_v12 }
 0x1ad   : > { %1396 = vmatprep.mubr.bf16.mxu1 %v5577_v6 }
 0x1b4   : > { %1397 = vmatmul.mubr.bf16.gmra.mrb[24].mxu1 %v2936_v47 }
 0x1b5   : > { %1406 = vmatprep.mubr.bf16.mxu1 %v5577_v6 }
 0x1bc   : > { %1407 = vmatmul.mubr.bf16.gmra.mrb[28].mxu1 %v2937_v57 }
 0x1bd   : > { %2349 = vmatprep.mubr.bf16.mxu1 %v5577_v6 }
 0x257   : > { %v1338_v37 = vpop.f32.mrb[0].mxu1 }
 0x258   : > { %v4315_v5 = vadd.f32 %v1338_v37, %v1179_v44  ;;  %v1340_v7 = vpop.f32.mrb[1].mxu1 }
 0x259   : > { %v1342_v18 = vpop.f32.mrb[2].mxu1  ;;  %v4321_v34 = vadd.f32 %v1340_v7, %v1179_v44 }
 0x25a   : > { %v1449_v60 = vmul.f32 1.442695, %v4315_v5  ;;  %v4318_v22 = vadd.f32 %v1342_v18, %v1184_v56  ;;  %v1344_v61 = vpop.f32.mrb[3].mxu1  ;;  %vm1417_vm1 = vcmp.gt.f32.partialorder %v4315_v5, 20.0 }
 0x25b   : > { %v1451_v15 = vmul.f32 1.442695, %v4321_v34  ;;  %v4332_v33 = vadd.f32 %v1344_v61, %v1184_v56  ;;  %vm1418_vm14 = vcmp.gt.f32.partialorder %v4321_v34, 20.0 }
 0x25c   : > { %3074 = vpow2.f32 %v1449_v60  ;;  %v1453_v11 = vmul.f32 1.442695, %v4318_v22  ;;  %vm1419_vm2 = vcmp.gt.f32.partialorder %v4318_v22, 20.0 }
 0x25d   : > { %v1455_v25 = vmul.f32 1.442695, %v4332_v33  ;;  %vm1420_vm15 = vcmp.gt.f32.partialorder %v4332_v33, 20.0 }
 0x25e   : > { %3076 = vpow2.f32 %v1453_v11 }
 0x25f   : > { %v1348_v35 = vpop.f32.mrb[4].mxu1 }
 0x260   : > { %v4323_v38 = vadd.f32 %v1348_v35, %v1189_v30  ;;  %v1350_v19 = vpop.f32.mrb[5].mxu1 }
 0x261   : > { %v1352_v31 = vpop.f32.mrb[6].mxu1  ;;  %v4339_v39 = vadd.f32 %v1350_v19, %v1189_v30 }
 0x262   : > { %v1457_v24 = vmul.f32 1.442695, %v4323_v38  ;;  %v4326_v0 = vadd.f32 %v1352_v31, %v1194_v10  ;;  %v1354_v54 = vpop.f32.mrb[7].mxu1  ;;  %vm1421_vm5 = vcmp.gt.f32.partialorder %v4323_v38, 20.0 }
 0x263   : > { %v1459_v36 = vmul.f32 1.442695, %v4339_v39  ;;  %v4355_v55 = vadd.f32 %v1354_v54, %v1194_v10 }
 0x264   : > { %3078 = vpow2.f32 %v1457_v24  ;;  %v1461_v9 = vmul.f32 1.442695, %v4326_v0  ;;  %vm1423_vm6 = vcmp.gt.f32.partialorder %v4326_v0, 20.0 }
 0x265   : > { %v1463_v12 = vmul.f32 1.442695, %v4355_v55 }
 0x266   : > { %v3075_v8 = vpop.eup %3074  ;;  %3080 = vpow2.f32 %v1461_v9 }
 0x267   : > { %v1513_v16 = vadd.f32 1.0, %v3075_v8  ;;  %v1358_v50 = vpop.f32.mrb[8].mxu1  ;;  %3082 = vpow2.f32 %v1451_v15  ;;  %v1516_v17 = vmul.f32 -0.5, %v3075_v8  ;;  %v1519_v45 = vand.u32 2147483647, %v3075_v8 }
 0x268   : > { %v3077_v32 = vpop.eup %3076  ;;  %v4335_v52 = vadd.f32 %v1358_v50, %v4330_v27  ;;  %v1360_v58 = vpop.f32.mrb[9].mxu1 }
 0x269   : > { %3084 = vlog2.f32 %v1513_v16  ;;  %v1531_v14 = vadd.f32 1.0, %v3077_v32  ;;  %v1362_v46 = vpop.f32.mrb[10].mxu1  ;;  %v1534_v42 = vmul.f32 -0.5, %v3077_v32  ;;  %v1517_v3 = vadd.f32 1.0, %v1516_v17 }
 0x26a   : > { %v1465_v4 = vmul.f32 1.442695, %v4335_v52  ;;  %v4344_v43 = vadd.f32 %v1362_v46, %v4337_v41  ;;  %v4346_v2 = vpop.f32.mrb[11].mxu1  ;;  %v1537_v53 = vand.u32 2147483647, %v3077_v32  ;;  %v4398_v54 = vadd.f32 %v1360_v58, %v4330_v27  ;;  %v4411_v27 = vpop.permute.xlu0 %1218 }
 0x26b   : > { %3086 = vlog2.f32 %v1531_v14  ;;  %v1535_v20 = vadd.f32 1.0, %v1534_v42  ;;  %v1518_v44 = vmul.f32 %v3075_v8, %v1517_v3  ;;  %vm4379_vm3 = vcmp.lt.f32.partialorder %v1519_v45, 0.0004427343 }
 0x26c   : > { %3088 = vpow2.f32 %v1465_v4  ;;  %v1469_v48 = vmul.f32 1.442695, %v4344_v43  ;;  %vm4392_vm4 = vcmp.lt.f32.partialorder %v1537_v53, 0.0004427343  ;;  %v1467_v3 = vmul.f32 1.442695, %v4398_v54  ;;  %v4447_v53 = vpop.permute.xlu1 %1223 }
 0x26d   : > { %3090 = vpow2.f32 %v1455_v25  ;;  %v1536_v19 = vmul.f32 %v3077_v32, %v1535_v20  ;;  %vm1425_vm9 = vcmp.gt.f32.partialorder %v4335_v52, 20.0  ;;  %vm1427_vm10 = vcmp.gt.f32.partialorder %v4344_v43, 20.0 }
 0x26e   : > { %v4349_v28 = vpop.eup %3078  ;;  %3092 = vpow2.f32 %v1469_v48 }
 0x26f   : > { %v1549_v63 = vadd.f32 1.0, %v4349_v28  ;;  %v1368_v49 = vpop.f32.mrb[12].mxu1  ;;  %v1552_v37 = vmul.f32 -0.5, %v4349_v28  ;;  %v1555_v50 = vand.u32 2147483647, %v4349_v28 }
 0x270   : > { %v4357_v40 = vpop.eup %3080  ;;  %v4360_v59 = vadd.f32 %v1368_v49, %v4352_v23  ;;  %v4362_v21 = vpop.f32.mrb[13].mxu1 }
 0x271   : > { %3094 = vlog2.f32 %v1549_v63  ;;  %v1567_v26 = vadd.f32 1.0, %v4357_v40  ;;  %v1372_v51 = vpop.f32.mrb[14].mxu1  ;;  %v4365_v29 = vpop.eup %3082  ;;  %v1570_v60 = vmul.f32 -0.5, %v4357_v40  ;;  %v1553_v16 = vadd.f32 1.0, %v1552_v37 }
 0x272   : > { %3096 = vpow2.f32 %v1459_v36  ;;  %v4369_v62 = vpop.f32.mrb[15].mxu1  ;;  %v1473_v47 = vmul.f32 1.442695, %v4360_v59  ;;  %v4377_v7 = vadd.f32 %v1372_v51, %v4371_v13  ;;  %v1522_v61 = vadd.f32 1.0, %v4365_v29 }
 0x273   : > { %v3085_v1 = vpop.eup %3084  ;;  %3098 = vlog2.f32 %v1567_v26  ;;  %v4390_v10 = vmul.f32 -0.5, %v4365_v29  ;;  %v1528_v9 = vand.u32 2147483647, %v4365_v29  ;;  %v1571_v25 = vadd.f32 1.0, %v1570_v60 }
 0x274   : > { %v1515_v57 = vmul.f32 0.6931472, %v3085_v1  ;;  %3100 = vpow2.f32 %v1473_v47  ;;  %v1477_v32 = vmul.f32 1.442695, %v4377_v7  ;;  %v4429_v36 = vadd.f32 %v4346_v2, %v4337_v41 }
 0x275   : > { %v3087_v56 = vpop.eup %3086  ;;  %v1573_v49 = vand.u32 2147483647, %v4357_v40  ;;  %v1554_v41 = vmul.f32 %v4349_v28, %v1553_v16  ;;  %v4444_v2 = vadd.f32 %v4362_v21, %v4352_v23  ;;  %vm4449_vm7 = vcmp.lt.f32.partialorder %v1555_v50, 0.0004427343 }
 0x276   : > { %v4385_v11 = vpop.eup %3088  ;;  %v1521_v30 = vsel %vm4379_vm3, %v1518_v44, %v1515_v57  ;;  %v1533_v35 = vmul.f32 0.6931472, %v3087_v56  ;;  %v1572_v57 = vmul.f32 %v4357_v40, %v1571_v25  ;;  %v1471_v18 = vmul.f32 1.442695, %v4429_v36 }
 0x277   : > { %v1585_v24 = vadd.f32 1.0, %v4385_v11  ;;  %v1378_v15 = vpop.f32.mrb[16].mxu1  ;;  %v4409_v46 = vpop.eup %3090  ;;  %v4416_v58 = vsel %vm1417_vm1, %v4315_v5, %v1521_v30  ;;  %v1588_v44 = vmul.f32 -0.5, %v4385_v11  ;;  %vm1574_vm8 = vcmp.lt.f32.partialorder %v1573_v49, 0.0004427343 }
 0x278   : > { %v1539_v8 = vsel %vm4392_vm4, %v1536_v19, %v1533_v35  ;;  %v4407_v14 = vpop.f32.mrb[17].mxu1  ;;  %v4423_v48 = vpop.eup %3092  ;;  %v4432_v5 = vadd.f32 %v1378_v15, %v4411_v27  ;;  %v1475_v30 = vmul.f32 1.442695, %v4444_v2  ;;  %v4482_v31 = vadd.f32 %v4369_v62, %v4371_v13 }
 0x279   : > { %v4421_v4 = vsel %vm1419_vm2, %v4318_v22, %v1539_v8  ;;  %3102 = vlog2.f32 %v1585_v24  ;;  %v1382_v17 = vpop.f32.mrb[18].mxu1  ;;  %v1603_v45 = vadd.f32 1.0, %v4423_v48  ;;  %v1606_v56 = vmul.f32 -0.5, %v4423_v48 }
 0x27a   : > { %v1841_v42 = vpack.c.bf16 %v4421_v4, %v4416_v58  ;;  %3104 = vpow2.f32 %v1477_v32  ;;  %v4434_v63 = vpop.f32.mrb[19].mxu1  ;;  %v1481_v20 = vmul.f32 1.442695, %v4432_v5  ;;  %v4458_v23 = vadd.f32 %v1382_v17, %v4447_v53 }
 0x27b   : > { %v3095_v22 = vpop.eup %3094  ;;  %3106 = vlog2.f32 %v1522_v61  ;;  %v1607_v62 = vadd.f32 1.0, %v1606_v56  ;;  %v1526_v25 = vadd.f32 1.0, %v4390_v10  ;;  %v1540_v17 = vadd.f32 1.0, %v4409_v46 }
 0x27c   : > { %v4439_v26 = vpop.eup %3096  ;;  %v1551_v51 = vmul.f32 0.6931472, %v3095_v22  ;;  %3108 = vlog2.f32 %v1603_v45  ;;  %v1485_v24 = vmul.f32 1.442695, %v4458_v23  ;;  %v1609_v49 = vand.u32 2147483647, %v4423_v48 }
 0x27d   : > { %v3099_v1 = vpop.eup %3098  ;;  %3110 = vpow2.f32 %v1481_v20  ;;  %v1479_v45 = vmul.f32 1.442695, %v4482_v31  ;;  %v4505_v20 = vadd.f32 %v4407_v14, %v4411_v27  ;;  %v1608_v47 = vmul.f32 %v4423_v48, %v1607_v62 }
 0x27e   : > { %v1557_v28 = vsel %vm4449_vm7, %v1554_v41, %v1551_v51  ;;  %v1569_v37 = vmul.f32 0.6931472, %v3099_v1  ;;  %v4460_v21 = vpop.eup %3100  ;;  %3112 = vpow2.f32 %v1463_v12  ;;  %vm4514_vm12 = vcmp.lt.f32.partialorder %v1528_v9, 0.0004427343 }
 0x27f   : > { %v4464_v40 = vpop.f32.mrb[20].mxu1  ;;  %3114 = vpow2.f32 %v1467_v3  ;;  %v1621_v61 = vadd.f32 1.0, %v4460_v21  ;;  %v4473_v19 = vsel %vm1421_vm5, %v4323_v38, %v1557_v28  ;;  %v1589_v38 = vadd.f32 1.0, %v1588_v44 }
 0x280   : > { %v1575_v60 = vsel %vm1574_vm8, %v1572_v57, %v1569_v37  ;;  %v4468_v35 = vpop.f32.mrb[21].mxu1  ;;  %v1624_v41 = vmul.f32 -0.5, %v4460_v21  ;;  %v1627_v28 = vand.u32 2147483647, %v4460_v21  ;;  %vm4530_vm13 = vcmp.lt.f32.partialorder %v1609_v49, 0.0004427343 }
 0x281   : > { %v4478_v12 = vsel %vm1423_vm6, %v4326_v0, %v1575_v60  ;;  %v4485_v15 = vpop.f32.mrb[22].mxu1  ;;  %3116 = vlog2.f32 %v1621_v61  ;;  %v1591_v0 = vand.u32 2147483647, %v4385_v11  ;;  %v1590_v51 = vmul.f32 %v4385_v11, %v1589_v38 }
 0x282   : > { %v4490_v16 = vpop.f32.mrb[23].mxu1  ;;  %3118 = vpow2.f32 %v1485_v24  ;;  %v1543_v60 = vmul.f32 -0.5, %v4409_v46  ;;  %v1625_v38 = vadd.f32 1.0, %v1624_v41  ;;  %vm1429_vm0 = vcmp.gt.f32.partialorder %v4360_v59, 20.0 }
 0x283   : > { %v3103_v50 = vpop.eup %3102  ;;  %3120 = vpow2.f32 %v1471_v18  ;;  %vm4507_vm11 = vcmp.lt.f32.partialorder %v1591_v0, 0.0004427343  ;;  %v4545_v0 = vadd.f32 %v4434_v63, %v4447_v53  ;;  %vm4566_vm1 = vcmp.lt.f32.partialorder %v1627_v28, 0.0004427343 }
 0x284   : > { %v4494_v13 = vpop.eup %3104  ;;  %v1587_v32 = vmul.f32 0.6931472, %v3103_v50  ;;  %3122 = vpow2.f32 %v1475_v30  ;;  %v1483_v50 = vmul.f32 1.442695, %v4505_v20  ;;  %vm1431_vm2 = vcmp.gt.f32.partialorder %v4377_v7, 20.0 }
 0x285   : > { %v3107_v22 = vpop.eup %3106  ;;  %v1639_v3 = vadd.f32 1.0, %v4494_v13  ;;  %3124 = vlog2.f32 %v1540_v17  ;;  %v1642_v37 = vmul.f32 -0.5, %v4494_v13  ;;  %v1544_v1 = vadd.f32 1.0, %v1543_v60 }
 0x286   : > { %v3109_v10 = vpop.eup %3108  ;;  %v1593_v14 = vsel %vm4507_vm11, %v1590_v51, %v1587_v32  ;;  %v1229_v32 = vpop.permute.xlu0 %1228  ;;  %v1524_v63 = vmul.f32 0.6931472, %v3107_v22  ;;  %v1645_v22 = vand.u32 2147483647, %v4494_v13  ;;  %v1626_v9 = vmul.f32 %v4460_v21, %v1625_v38 }
 0x287   : > { %3126 = vlog2.f32 %v1639_v3  ;;  %v4518_v11 = vpop.f32.mrb[24].mxu1  ;;  %v4520_v44 = vpop.eup %3110  ;;  %v1605_v27 = vmul.f32 0.6931472, %v3109_v10  ;;  %v4554_v17 = vsel %vm1425_vm9, %v4335_v52, %v1593_v14  ;;  %v1643_v52 = vadd.f32 1.0, %v1642_v37 }
 0x288   : > { %v4526_v48 = vpop.f32.mrb[25].mxu1  ;;  %v4528_v56 = vpop.eup %3112  ;;  %3128 = vpow2.f32 %v1479_v45  ;;  %v1657_v18 = vadd.f32 1.0, %v4520_v44  ;;  %v1527_v10 = vmul.f32 %v4365_v29, %v1526_v25  ;;  %v1545_v45 = vmul.f32 %v4409_v46, %v1544_v1 }
 0x289   : > { %v4536_v61 = vpop.f32.mrb[26].mxu1  ;;  %v4538_v30 = vpop.eup %3114  ;;  %v1611_v24 = vsel %vm4530_vm13, %v1608_v47, %v1605_v27  ;;  %vm1646_vm4 = vcmp.lt.f32.partialorder %v1645_v22, 0.0004427343  ;;  %vm1433_vm5 = vcmp.gt.f32.partialorder %v4432_v5, 20.0  ;;  %vm1435_vm6 = vcmp.gt.f32.partialorder %v4458_v23, 20.0 }
 0x28a   : > { %v4547_v62 = vpop.f32.mrb[27].mxu1  ;;  %v4559_v49 = vsel %vm1427_vm10, %v4344_v43, %v1611_v24  ;;  %3130 = vlog2.f32 %v1657_v18  ;;  %v4561_v3 = vpop.permute.xlu1 %1233  ;;  %v4572_v43 = vadd.f32 %v4464_v40, %v1229_v32  ;;  %v1546_v40 = vand.u32 2147483647, %v4409_v46 }
 0x28b   : > { %v3117_v53 = vpop.eup %3116  ;;  %v4580_v47 = vadd.f32 %v4485_v15, %v4561_v3  ;;  %3132 = vpow2.f32 %v1483_v50  ;;  %v1487_v18 = vmul.f32 1.442695, %v4545_v0  ;;  %v1530_v29 = vsel %vm4514_vm12, %v1527_v10, %v1524_v63 }
 0x28c   : > { %v4574_v41 = vpop.eup %3118  ;;  %v1623_v27 = vmul.f32 0.6931472, %v3117_v53  ;;  %v1489_v15 = vmul.f32 1.442695, %v4572_v43  ;;  %v1644_v24 = vmul.f32 %v4494_v13, %v1643_v52  ;;  %v1660_v50 = vmul.f32 -0.5, %v4520_v44 }
 0x28d   : > { %v4582_v14 = vpop.eup %3120  ;;  %v1675_v28 = vadd.f32 1.0, %v4574_v41  ;;  %v1558_v53 = vadd.f32 1.0, %v4439_v26  ;;  %v1493_v57 = vmul.f32 1.442695, %v4580_v47  ;;  %v1678_v52 = vmul.f32 -0.5, %v4574_v41 }
 0x28e   : > { %v4586_v37 = vpop.eup %3122  ;;  %v1629_v10 = vsel %vm4566_vm1, %v1626_v9, %v1623_v27  ;;  %vm1547_vm3 = vcmp.lt.f32.partialorder %v1546_v40, 0.0004427343  ;;  %v4612_v46 = vadd.f32 %v4468_v35, %v1229_v32  ;;  %v1802_v51 = vsel %vm1418_vm14, %v4321_v34, %v1530_v29  ;;  %v1239_v9 = vpop.permute.xlu0 %1238 }
 0x28f   : > { %v4593_v25 = vpop.f32.mrb[28].mxu1  ;;  %v3125_v60 = vpop.eup %3124  ;;  %3134 = vlog2.f32 %v1675_v28  ;;  %v4623_v22 = vsel %vm1429_vm0, %v4360_v59, %v1629_v10  ;;  %v1661_v32 = vadd.f32 1.0, %v1660_v50  ;;  %v1679_v29 = vadd.f32 1.0, %v1678_v52 }
 0x290   : > { %v4598_v6 = vpop.f32.mrb[29].mxu1  ;;  %v1542_v38 = vmul.f32 0.6931472, %v3125_v60  ;;  %3136 = vpow2.f32 %v1489_v15  ;;  %v1576_v15 = vadd.f32 1.0, %v4528_v56  ;;  %v4642_v50 = vadd.f32 %v4518_v11, %v1239_v9 }
 0x291   : > { %v3127_v21 = vpop.eup %3126  ;;  %v4602_v63 = vpop.f32.mrb[30].mxu1  ;;  %3138 = vpow2.f32 %v1493_v57  ;;  %v1561_v11 = vmul.f32 -0.5, %v4439_v26  ;;  %v1680_v58 = vmul.f32 %v4574_v41, %v1679_v29  ;;  %v1579_v4 = vmul.f32 -0.5, %v4528_v56 }
 0x292   : > { %v1641_v13 = vmul.f32 0.6931472, %v3127_v21  ;;  %v4607_v28 = vpop.f32.mrb[31].mxu1  ;;  %v4609_v8 = vpop.eup %3128  ;;  %v1548_v60 = vsel %vm1547_vm3, %v1545_v45, %v1542_v38  ;;  %3140 = vlog2.f32 %v1558_v53  ;;  %v1491_v53 = vmul.f32 1.442695, %v4612_v46 }
 0x293   : > { %v1804_v27 = vsel %vm1420_vm15, %v4332_v33, %v1548_v60  ;;  %v1663_v33 = vand.u32 2147483647, %v4520_v44  ;;  %v1681_v38 = vand.u32 2147483647, %v4574_v41  ;;  %3142 = vlog2.f32 %v1576_v15 }
 0x294   : > { %v1647_v1 = vsel %vm1646_vm4, %v1644_v24, %v1641_v13  ;;  %v3131_v40 = vpop.eup %3130  ;;  %v1842_v45 = vpack.c.bf16 %v1804_v27, %v1802_v51  ;;  %v4634_v24 = vpop.permute.xlu1 %1243  ;;  %3144 = vpow2.f32 %v1487_v18  ;;  %v1562_v51 = vadd.f32 1.0, %v1561_v11 }
 0x295   : > { %v4628_v35 = vsel %vm1431_vm2, %v4377_v7, %v1647_v1  ;;  %v1659_v59 = vmul.f32 0.6931472, %v3131_v40  ;;  %v4639_v7 = vadd.f32 %v4490_v16, %v4561_v3  ;;  %v4644_v21 = vpop.eup %3132  ;;  %v4653_v57 = vadd.f32 %v4536_v61, %v4634_v24 }
 0x296   : > { %v1847_v34 = vpack.c.bf16 %v4628_v35, %v4623_v22  ;;  %1929 = vmatprep.subr.bf16.mxu0 %v1842_v45  ;;  %v1662_v16 = vmul.f32 %v4520_v44, %v1661_v32  ;;  %vm4658_vm7 = vcmp.lt.f32.partialorder %v1663_v33, 0.0004427343  ;;  %3146 = vpow2.f32 %v1491_v53 }
 0x297   : > { %1930 = vmatpush1.bf16.msra.mxu0 %v1841_v42  ;;  %v1497_v42 = vmul.f32 1.442695, %v4642_v50  ;;  %v1495_v18 = vmul.f32 1.442695, %v4639_v7  ;;  %vm1682_vm8 = vcmp.lt.f32.partialorder %v1681_v38, 0.0004427343  ;;  %v4691_v38 = vadd.f32 %v4526_v48, %v1239_v9 }
 0x298   : > { %v1665_v44 = vsel %vm4658_vm7, %v1662_v16, %v1659_v59  ;;  %v1501_v60 = vmul.f32 1.442695, %v4653_v57  ;;  %v1564_v27 = vand.u32 2147483647, %v4439_v26  ;;  %v1582_v40 = vand.u32 2147483647, %v4528_v56  ;;  %v1254_v16 = vpop.permute.xlu1 %1253 }
 0x299   : > { %v3135_v3 = vpop.eup %3134  ;;  %3148 = vpow2.f32 %v1497_v42  ;;  %v4679_v45 = vsel %vm1433_vm5, %v4432_v5, %v1665_v44  ;;  %v1580_v29 = vadd.f32 1.0, %v1579_v4  ;;  %vm1422_vm9 = vcmp.gt.f32.partialorder %v4339_v39, 20.0  ;;  %v1249_v44 = vpop.permute.xlu0 %1248 }
 0x29a   : > { %v4665_v61 = vpop.eup %3136  ;;  %v1677_v13 = vmul.f32 0.6931472, %v3135_v3  ;;  %v1594_v5 = vadd.f32 1.0, %v4538_v30  ;;  %vm1424_vm10 = vcmp.gt.f32.partialorder %v4355_v55, 20.0  ;;  %vm4696_vm11 = vcmp.lt.f32.partialorder %v1564_v27, 0.0004427343 }
 0x29b   : > { %v1693_v52 = vadd.f32 1.0, %v4665_v61  ;;  %v4672_v41 = vpop.eup %3138  ;;  %v1696_v3 = vmul.f32 -0.5, %v4665_v61  ;;  %v1581_v10 = vmul.f32 %v4528_v56, %v1580_v29  ;;  %vm4702_vm12 = vcmp.lt.f32.partialorder %v1582_v40, 0.0004427343 }
 0x29c   : > { %v1683_v1 = vsel %vm1682_vm8, %v1680_v58, %v1677_v13  ;;  %v3141_v32 = vpop.eup %3140  ;;  %v1711_v59 = vadd.f32 1.0, %v4672_v41  ;;  %v1612_v9 = vadd.f32 1.0, %v4582_v14  ;;  %v1714_v4 = vmul.f32 -0.5, %v4672_v41 }
 0x29d   : > { %v4684_v33 = vsel %vm1435_vm6, %v4458_v23, %v1683_v1  ;;  %3150 = vlog2.f32 %v1693_v52  ;;  %v1560_v53 = vmul.f32 0.6931472, %v3141_v32  ;;  %v1563_v23 = vmul.f32 %v4439_v26, %v1562_v51  ;;  %v3143_v11 = vpop.eup %3142 }
 0x29e   : > { %v1849_v15 = vpack.c.bf16 %v4684_v33, %v4679_v45  ;;  %3152 = vpow2.f32 %v1495_v18  ;;  %v4707_v58 = vpop.eup %3144  ;;  %v1578_v42 = vmul.f32 0.6931472, %v3143_v11  ;;  %v1499_v13 = vmul.f32 1.442695, %v4691_v38 }
 0x29f   : > { %3154 = vpow2.f32 %v1501_v60  ;;  %v1566_v26 = vsel %vm4696_vm11, %v1563_v23, %v1560_v53  ;;  %v4715_v56 = vadd.f32 %v4547_v62, %v4634_v24  ;;  %v1597_v18 = vmul.f32 -0.5, %v4538_v30 }
 0x2a0   : > { %3156 = vlog2.f32 %v1711_v59  ;;  %v4718_v52 = vpop.eup %3146  ;;  %v1699_v60 = vand.u32 2147483647, %v4665_v61  ;;  %v1584_v1 = vsel %vm4702_vm12, %v1581_v10, %v1578_v42  ;;  %v1615_v51 = vmul.f32 -0.5, %v4582_v14 }
 0x2a1   : > { %3158 = vlog2.f32 %v1594_v5  ;;  %v4725_v27 = vadd.f32 %v4593_v25, %v1249_v44  ;;  %vm1437_vm13 = vcmp.gt.f32.partialorder %v4572_v43, 20.0  ;;  %v1697_v62 = vadd.f32 1.0, %v1696_v3 }
 0x2a2   : > { %3160 = vlog2.f32 %v1612_v9  ;;  %vm1439_vm14 = vcmp.gt.f32.partialorder %v4580_v47, 20.0  ;;  %v1717_v24 = vand.u32 2147483647, %v4672_v41  ;;  %v1806_v32 = vsel %vm1422_vm9, %v4339_v39, %v1566_v26 }
 0x2a3   : > { %v4727_v40 = vpop.eup %3148  ;;  %v1808_v29 = vsel %vm1424_vm10, %v4355_v55, %v1584_v1  ;;  %v1715_v59 = vadd.f32 1.0, %v1714_v4  ;;  %v1600_v5 = vand.u32 2147483647, %v4538_v30  ;;  %3162 = vpow2.f32 %v1499_v13 }
 0x2a4   : > { %v1844_v25 = vpack.c.bf16 %v1808_v29, %v1806_v32  ;;  %v1729_v53 = vadd.f32 1.0, %v4727_v40  ;;  %v1503_v11 = vmul.f32 1.442695, %v4715_v56  ;;  %v1598_v3 = vadd.f32 1.0, %v1597_v18 }
 0x2a5   : > { %v1505_v10 = vmul.f32 1.442695, %v4725_v27  ;;  %vm1426_vm15 = vcmp.gt.f32.partialorder %v4398_v54, 20.0  ;;  %vm1428_vm0 = vcmp.gt.f32.partialorder %v4429_v36, 20.0  ;;  %v1616_v55 = vadd.f32 1.0, %v1615_v51 }
 0x2a6   : > { %1931 = vmatprep.subr.bf16.mxu0 %v1844_v25  ;;  %3164 = vlog2.f32 %v1729_v53  ;;  %v4747_v9 = vadd.f32 %v4602_v63, %v1254_v16  ;;  %v1698_v26 = vmul.f32 %v4665_v61, %v1697_v62  ;;  %vm4752_vm1 = vcmp.lt.f32.partialorder %v1699_v60, 0.0004427343 }
 0x2a7   : > { %v3151_v23 = vpop.eup %3150  ;;  %vm4756_vm2 = vcmp.lt.f32.partialorder %v1717_v24, 0.0004427343  ;;  %v5649_v18 = vpack.c.bf16 %v4478_v12, %v4473_v19  ;;  %3166 = vpow2.f32 %v1505_v10  ;;  %v1716_v63 = vmul.f32 %v4672_v41, %v1715_v59 }
 0x2a8   : > { %v4742_v48 = vpop.eup %3152  ;;  %v1695_v39 = vmul.f32 0.6931472, %v3151_v23  ;;  %vm4765_vm3 = vcmp.lt.f32.partialorder %v1600_v5, 0.0004427343  ;;  %v1618_v60 = vand.u32 2147483647, %v4582_v14  ;;  %v1599_v32 = vmul.f32 %v4538_v30, %v1598_v3 }
 0x2a9   : > { %v4749_v4 = vpop.eup %3154  ;;  %1932 = vmatpush1.bf16.msra.mxu0 %v5649_v18  ;;  %v4774_v19 = vadd.f32 %v4598_v6, %v1249_v44  ;;  %v1732_v41 = vmul.f32 -0.5, %v4727_v40  ;;  %v1617_v29 = vmul.f32 %v4582_v14, %v1616_v55  ;;  %v1509_v59 = vmul.f32 1.442695, %v4747_v9 }
 0x2aa   : > { %v3157_v1 = vpop.eup %3156  ;;  %v1747_v51 = vadd.f32 1.0, %v4749_v4  ;;  %v1701_v62 = vsel %vm4752_vm1, %v1698_v26, %v1695_v39  ;;  %v1750_v5 = vmul.f32 -0.5, %v4749_v4  ;;  %v1630_v30 = vadd.f32 1.0, %v4586_v37 }
 0x2ab   : > { %v1713_v24 = vmul.f32 0.6931472, %v3157_v1  ;;  %v3159_v12 = vpop.eup %3158  ;;  %v4786_v6 = vsel %vm1437_vm13, %v4572_v43, %v1701_v62  ;;  %vm1619_vm4 = vcmp.lt.f32.partialorder %v1618_v60, 0.0004427343  ;;  %v1507_v55 = vmul.f32 1.442695, %v4774_v19 }
 0x2ac   : > { %3168 = vlog2.f32 %v1747_v51  ;;  %v3161_v25 = vpop.eup %3160  ;;  %v1596_v23 = vmul.f32 0.6931472, %v3159_v12  ;;  %v4799_v43 = vadd.f32 %v4607_v28, %v1254_v16  ;;  %v1648_v13 = vadd.f32 1.0, %v4609_v8 }
 0x2ad   : > { %v1719_v53 = vsel %vm4756_vm2, %v1716_v63, %v1713_v24  ;;  %v1614_v44 = vmul.f32 0.6931472, %v3161_v25  ;;  %3170 = vpow2.f32 %v1509_v59  ;;  %v4801_v26 = vpop.eup %3162  ;;  %v1735_v1 = vand.u32 2147483647, %v4727_v40 }
 0x2ae   : > { %v4791_v14 = vsel %vm1439_vm14, %v4580_v47, %v1719_v53  ;;  %3172 = vpow2.f32 %v1503_v11  ;;  %v1602_v10 = vsel %vm4765_vm3, %v1599_v32, %v1596_v23  ;;  %v1733_v47 = vadd.f32 1.0, %v1732_v41 }
 0x2af   : > { %v1851_v3 = vpack.c.bf16 %v4791_v14, %v4786_v6  ;;  %v1620_v39 = vsel %vm1619_vm4, %v1617_v29, %v1614_v44  ;;  %3174 = vlog2.f32 %v1630_v30  ;;  %v1810_v42 = vsel %vm1426_vm15, %v4398_v54, %v1602_v10 }
 0x2b0   : > { %v1812_v11 = vsel %vm1428_vm0, %v4429_v36, %v1620_v39  ;;  %v3165_v18 = vpop.eup %3164  ;;  %v1751_v63 = vadd.f32 1.0, %v1750_v5  ;;  %v1753_v28 = vand.u32 2147483647, %v4749_v4  ;;  %v1633_v60 = vmul.f32 -0.5, %v4586_v37 }
 0x2b1   : > { %v1846_v16 = vpack.c.bf16 %v1812_v11, %v1810_v42  ;;  %v4812_v51 = vpop.eup %3166  ;;  %v1731_v61 = vmul.f32 0.6931472, %v3165_v18  ;;  %3176 = vlog2.f32 %v1648_v13  ;;  %v1666_v54 = vadd.f32 1.0, %v4644_v21 }
 0x2b2   : > { %vm1441_vm5 = vcmp.gt.f32.partialorder %v4642_v50, 20.0  ;;  %v1765_v36 = vadd.f32 1.0, %v4812_v51  ;;  %3178 = vpow2.f32 %v1507_v55  ;;  %v1511_v62 = vmul.f32 1.442695, %v4799_v43 }
 0x2b3   : > { %1933 = vmatprep.subr.bf16.mxu0 %v1846_v16  ;;  %v1734_v24 = vmul.f32 %v4727_v40, %v1733_v47  ;;  %vm1443_vm6 = vcmp.gt.f32.partialorder %v4653_v57, 20.0  ;;  %v5652_v32 = vpack.c.bf16 %v4559_v49, %v4554_v17  ;;  %v1651_v12 = vmul.f32 -0.5, %v4609_v8 }
 0x2b4   : > { %3180 = vlog2.f32 %v1666_v54  ;;  %vm4825_vm7 = vcmp.lt.f32.partialorder %v1735_v1, 0.0004427343  ;;  %v1752_v59 = vmul.f32 %v4749_v4, %v1751_v63  ;;  %vm4830_vm8 = vcmp.lt.f32.partialorder %v1753_v28, 0.0004427343 }
 0x2b5   : > { %1934 = vmatpush1.bf16.msra.mxu0 %v5652_v32  ;;  %3182 = vlog2.f32 %v1765_v36  ;;  %v1737_v40 = vsel %vm4825_vm7, %v1734_v24, %v1731_v61  ;;  %v1634_v49 = vadd.f32 1.0, %v1633_v60  ;;  %v1636_v53 = vand.u32 2147483647, %v4586_v37 }
 0x2b6   : > { %v3169_v41 = vpop.eup %3168  ;;  %vm1430_vm9 = vcmp.gt.f32.partialorder %v4444_v2, 20.0  ;;  %vm1432_vm10 = vcmp.gt.f32.partialorder %v4482_v31, 20.0  ;;  %v1768_v4 = vmul.f32 -0.5, %v4812_v51  ;;  %3184 = vpow2.f32 %v1511_v62 }
 0x2b7   : > { %v1749_v17 = vmul.f32 0.6931472, %v3169_v41  ;;  %v4837_v5 = vpop.eup %3170  ;;  %v1654_v23 = vand.u32 2147483647, %v4609_v8  ;;  %v1684_v30 = vadd.f32 1.0, %v4707_v58  ;;  %v1652_v47 = vadd.f32 1.0, %v1651_v12 }
 0x2b8   : > { %v4844_v44 = vpop.eup %3172  ;;  %v1771_v39 = vand.u32 2147483647, %v4812_v51  ;;  %v1783_v55 = vadd.f32 1.0, %v4837_v5  ;;  %v4853_v11 = vsel %vm1441_vm5, %v4642_v50, %v1737_v40  ;;  %v1669_v18 = vmul.f32 -0.5, %v4644_v21 }
 0x2b9   : > { %v1755_v10 = vsel %vm4830_vm8, %v1752_v59, %v1749_v17  ;;  %v3175_v42 = vpop.eup %3174  ;;  %3186 = vlog2.f32 %v1684_v30  ;;  %v1635_v63 = vmul.f32 %v4586_v37, %v1634_v49  ;;  %vm4864_vm11 = vcmp.lt.f32.partialorder %v1636_v53, 0.0004427343 }
 0x2ba   : > { %v4858_v13 = vsel %vm1443_vm6, %v4653_v57, %v1755_v10  ;;  %3188 = vlog2.f32 %v1783_v55  ;;  %v1769_v50 = vadd.f32 1.0, %v1768_v4  ;;  %v1786_v16 = vmul.f32 -0.5, %v4837_v5 }
 0x2bb   : > { %v1853_v1 = vpack.c.bf16 %v4858_v13, %v4853_v11  ;;  %v1632_v61 = vmul.f32 0.6931472, %v3175_v42  ;;  %vm4869_vm12 = vcmp.lt.f32.partialorder %v1654_v23, 0.0004427343  ;;  %v3177_v60 = vpop.eup %3176  ;;  %vm4873_vm13 = vcmp.lt.f32.partialorder %v1771_v39, 0.0004427343 }
 0x2bc   : > { %v1653_v36 = vmul.f32 %v4609_v8, %v1652_v47  ;;  %v1687_v37 = vmul.f32 -0.5, %v4707_v58  ;;  %v1702_v62 = vadd.f32 1.0, %v4718_v52  ;;  %v4880_v24 = vpop.eup %3178  ;;  %vm1434_vm14 = vcmp.gt.f32.partialorder %v4505_v20, 20.0  ;;  %v2939_v13 = vld [vmem:[%s5570_s5 + $0x8] sm:$0xff]  }
 0x2bd   : > { %v1638_v32 = vsel %vm4864_vm11, %v1635_v63, %v1632_v61  ;;  %v1650_v12 = vmul.f32 0.6931472, %v3177_v60  ;;  %v1670_v41 = vadd.f32 1.0, %v1669_v18  ;;  %v1720_v29 = vadd.f32 1.0, %v4742_v48 }
 0x2be   : > { %v3181_v59 = vpop.eup %3180  ;;  %vm1436_vm15 = vcmp.gt.f32.partialorder %v4545_v0, 20.0  ;;  %v1789_v8 = vand.u32 2147483647, %v4837_v5  ;;  %v1672_v25 = vand.u32 2147483647, %v4644_v21  ;;  %3190 = vlog2.f32 %v1702_v62 }
 0x2bf   : > { %v1690_v40 = vand.u32 2147483647, %v4707_v58  ;;  %v3183_v17 = vpop.eup %3182  ;;  %vm1445_vm0 = vcmp.gt.f32.partialorder %v4725_v27, 20.0  ;;  %vm1447_vm1 = vcmp.gt.f32.partialorder %v4747_v9, 20.0  ;;  %v1787_v49 = vadd.f32 1.0, %v1786_v16 }
 0x2c0   : > { %v1656_v53 = vsel %vm4869_vm12, %v1653_v36, %v1650_v12  ;;  %v1668_v4 = vmul.f32 0.6931472, %v3181_v59  ;;  %3192 = vlog2.f32 %v1720_v29  ;;  %v1814_v23 = vsel %vm1430_vm9, %v4444_v2, %v1638_v32  ;;  %v4901_v55 = vpop.eup %3184 }
 0x2c1   : > { %v1816_v30 = vsel %vm1432_vm10, %v4482_v31, %v1656_v53  ;;  %v1688_v10 = vadd.f32 1.0, %v1687_v37  ;;  %v1705_v39 = vmul.f32 -0.5, %v4718_v52  ;;  %v1767_v47 = vmul.f32 0.6931472, %v3183_v17 }
 0x2c2   : > { %v1848_v42 = vpack.c.bf16 %v1816_v30, %v1814_v23  ;;  %v1671_v18 = vmul.f32 %v4644_v21, %v1670_v41  ;;  %v1738_v63 = vadd.f32 1.0, %v4801_v26  ;;  %v1770_v28 = vmul.f32 %v4812_v51, %v1769_v50 }
 0x2c3   : > { %vm4906_vm2 = vcmp.lt.f32.partialorder %v1789_v8, 0.0004427343  ;;  %vm4910_vm3 = vcmp.lt.f32.partialorder %v1672_v25, 0.0004427343  ;;  %v1723_v31 = vmul.f32 -0.5, %v4742_v48  ;;  %v3187_v61 = vpop.eup %3186  ;;  %v1788_v57 = vmul.f32 %v4837_v5, %v1787_v49 }
 0x2c4   : > { %1935 = vmatprep.subr.bf16.mxu0 %v1848_v42  ;;  %v1674_v21 = vsel %vm4910_vm3, %v1671_v18, %v1668_v4  ;;  %vm4918_vm4 = vcmp.lt.f32.partialorder %v1690_v40, 0.0004427343  ;;  %3194 = vlog2.f32 %v1738_v63  ;;  %v3189_v51 = vpop.eup %3188  ;;  %v1686_v50 = vmul.f32 0.6931472, %v3187_v61 }
 0x2c5   : > { %1936 = vmatpush1.bf16.msra.mxu0 %v1847_v34  ;;  %v1689_v36 = vmul.f32 %v4707_v58, %v1688_v10  ;;  %v1706_v37 = vadd.f32 1.0, %v1705_v39  ;;  %v1756_v5 = vadd.f32 1.0, %v4844_v44  ;;  %v1773_v62 = vsel %vm4873_vm13, %v1770_v28, %v1767_v47 }
 0x2c6   : > { %v1785_v32 = vmul.f32 0.6931472, %v3189_v51  ;;  %v1708_v12 = vand.u32 2147483647, %v4718_v52  ;;  %v1726_v41 = vand.u32 2147483647, %v4742_v48  ;;  %v1818_v22 = vsel %vm1434_vm14, %v4505_v20, %v1674_v21 }
 0x2c7   : > { %v1692_v29 = vsel %vm4918_vm4, %v1689_v36, %v1686_v50  ;;  %v1724_v35 = vadd.f32 1.0, %v1723_v31  ;;  %3196 = vlog2.f32 %v1756_v5  ;;  %v1741_v54 = vmul.f32 -0.5, %v4801_v26 }
 0x2c8   : > { %v1791_v34 = vsel %vm4906_vm2, %v1788_v57, %v1785_v32  ;;  %v1820_v58 = vsel %vm1436_vm15, %v4545_v0, %v1692_v29  ;;  %v1774_v59 = vadd.f32 1.0, %v4880_v24  ;;  %v3191_v8 = vpop.eup %3190  ;;  %v4946_v25 = vsel %vm1445_vm0, %v4725_v27, %v1773_v62 }
 0x2c9   : > { %v4951_v20 = vsel %vm1447_vm1, %v4747_v9, %v1791_v34  ;;  %v1850_v40 = vpack.c.bf16 %v1820_v58, %v1818_v22  ;;  %v1707_v17 = vmul.f32 %v4718_v52, %v1706_v37  ;;  %v1704_v53 = vmul.f32 0.6931472, %v3191_v8  ;;  %v1873_v22 = vpop.permute.xlu1 %1872 }
 0x2ca   : > { %v3193_v49 = vpop.eup %3192  ;;  %v1855_v0 = vpack.c.bf16 %v4951_v20, %v4946_v25  ;;  %v1759_v4 = vmul.f32 -0.5, %v4844_v44  ;;  %3198 = vlog2.f32 %v1774_v59  ;;  %vm1709_vm5 = vcmp.lt.f32.partialorder %v1708_v12, 0.0004427343 }
 0x2cb   : > { %1937 = vmatprep.subr.bf16.mxu0 %v1850_v40  ;;  %v1722_v27 = vmul.f32 0.6931472, %v3193_v49  ;;  %v1725_v23 = vmul.f32 %v4742_v48, %v1724_v35  ;;  %v1792_v30 = vadd.f32 1.0, %v4901_v55  ;;  %vm1438_vm6 = vcmp.gt.f32.partialorder %v4612_v46, 20.0 }
 0x2cc   : > { %1938 = vmatpush1.bf16.msra.mxu0 %v1849_v15  ;;  %v1710_v52 = vsel %vm1709_vm5, %v1707_v17, %v1704_v53  ;;  %vm1727_vm7 = vcmp.lt.f32.partialorder %v1726_v41, 0.0004427343  ;;  %v1742_v9 = vadd.f32 1.0, %v1741_v54  ;;  %vm1440_vm8 = vcmp.gt.f32.partialorder %v4639_v7, 20.0 }
 0x2cd   : > { %v1728_v10 = vsel %vm1727_vm7, %v1725_v23, %v1722_v27  ;;  %v1744_v39 = vand.u32 2147483647, %v4801_v26  ;;  %3200 = vlog2.f32 %v1792_v30  ;;  %v1822_v48 = vsel %vm1438_vm6, %v4612_v46, %v1710_v52 }
 0x2ce   : > { %v3195_v47 = vpop.eup %3194  ;;  %v1824_v42 = vsel %vm1440_vm8, %v4639_v7, %v1728_v10  ;;  %v1760_v18 = vadd.f32 1.0, %v1759_v4  ;;  %v1777_v63 = vmul.f32 -0.5, %v4880_v24  ;;  %v1762_v33 = vand.u32 2147483647, %v4844_v44 }
 0x2cf   : > { %v1852_v28 = vpack.c.bf16 %v1824_v42, %v1822_v48  ;;  %v1740_v45 = vmul.f32 0.6931472, %v3195_v47  ;;  %v1743_v15 = vmul.f32 %v4801_v26, %v1742_v9  ;;  %v1795_v16 = vmul.f32 -0.5, %v4901_v55 }
 0x2d0   : > { %vm1745_vm9 = vcmp.lt.f32.partialorder %v1744_v39, 0.0004427343  ;;  %v1761_v31 = vmul.f32 %v4844_v44, %v1760_v18  ;;  %v1778_v61 = vadd.f32 1.0, %v1777_v63  ;;  %vm1763_vm10 = vcmp.lt.f32.partialorder %v1762_v33, 0.0004427343 }
 0x2d1   : > { %v3197_v2 = vpop.eup %3196  ;;  %1939 = vmatprep.subr.bf16.mxu0 %v1852_v28  ;;  %v1746_v46 = vsel %vm1745_vm9, %v1743_v15, %v1740_v45  ;;  %v1780_v57 = vand.u32 2147483647, %v4880_v24  ;;  %vm1442_vm11 = vcmp.gt.f32.partialorder %v4691_v38, 20.0  ;;  %vm1444_vm12 = vcmp.gt.f32.partialorder %v4715_v56, 20.0 }
 0x2d2   : > { %1940 = vmatpush1.bf16.msra.mxu0 %v1851_v3  ;;  %v1758_v7 = vmul.f32 0.6931472, %v3197_v2  ;;  %v1796_v60 = vadd.f32 1.0, %v1795_v16  ;;  %v1826_v51 = vsel %vm1442_vm11, %v4691_v38, %v1746_v46  ;;  %v1798_v3 = vand.u32 2147483647, %v4901_v55 }
 0x2d3   : > { %v1779_v44 = vmul.f32 %v4880_v24, %v1778_v61  ;;  %vm1781_vm13 = vcmp.lt.f32.partialorder %v1780_v57, 0.0004427343  ;;  %vm1446_vm15 = vcmp.gt.f32.partialorder %v4774_v19, 20.0  ;;  %vm1448_vm0 = vcmp.gt.f32.partialorder %v4799_v43, 20.0 }
 0x2d4   : > { %v3199_v21 = vpop.eup %3198  ;;  %v1764_v26 = vsel %vm1763_vm10, %v1761_v31, %v1758_v7  ;;  %v1797_v62 = vmul.f32 %v4901_v55, %v1796_v60  ;;  %vm1799_vm14 = vcmp.lt.f32.partialorder %v1798_v3, 0.0004427343  ;;  %v2938_v55 = vld [vmem:[%s5570_s5] sm:$0xff]   ;;  %v5669_v11 = vmov 0  }
 0x2d5   : > { %v1828_v6 = vsel %vm1444_vm12, %v4715_v56, %v1764_v26  ;;  %v1776_v14 = vmul.f32 0.6931472, %v3199_v21 }
 0x2d6   : > { %v1854_v50 = vpack.c.bf16 %v1828_v6, %v1826_v51 }
 0x2d7   : > { %v3201_v36 = vpop.eup %3200  ;;  %v1782_v37 = vsel %vm1781_vm13, %v1779_v44, %v1776_v14 }
 0x2d8   : > { %1941 = vmatprep.subr.bf16.mxu0 %v1854_v50  ;;  %v1794_v5 = vmul.f32 0.6931472, %v3201_v36  ;;  %v1830_v56 = vsel %vm1446_vm15, %v4774_v19, %v1782_v37  ;;  %v2940_v19 = vld [vmem:[%s5570_s5 + $0x10] sm:$0xff]  }
 0x2d9   : > { %1942 = vmatpush1.bf16.msra.mxu0 %v1853_v1  ;;  %v1868_v1 = vpop.permute.xlu0 %1867 }
 0x2da   : > { %v1800_v38 = vsel %vm1799_vm14, %v1797_v62, %v1794_v5 }
 0x2db   : > { %v1832_v24 = vsel %vm1448_vm0, %v4799_v43, %v1800_v38  ;;  %v2941_v43 = vld [vmem:[%s5570_s5 + $0x18] sm:$0xff]  }
 0x2dc   : > { %v1856_v32 = vpack.c.bf16 %v1832_v24, %v1830_v56 }
 0x2dd   : > { %v1878_v20 = vpop.permute.xlu0 %1877 }
 0x2de   : > { %1943 = vmatprep.subr.bf16.mxu0 %v1856_v32 }
 0x2df   : > { %1944 = vmatpush1.bf16.msra.mxu0 %v1855_v0  ;;  %v1883_v0 = vpop.permute.xlu1 %1882 }
 0x2e1   : > { %v1888_v39 = vpop.permute.xlu0 %1887 }
 0x2e2   : > { %1962 = vmatmul.mubr.bf16.vlgmr.msra.gmra.mrb[32].mxu0 %v2938_v55 }
 0x2e3   : > { %1971 = vmatprep.mubr.bf16.mxu0 %v5669_v11  ;;  %v1893_v16 = vpop.permute.xlu1 %1892 }
 0x2e5   : > { %v1898_v3 = vpop.permute.xlu0 %1897 }
 0x2ea   : > { %1972 = vmatmul.mubr.bf16.gmra.mrb[36].mxu0 %v2939_v13 }
 0x2eb   : > { %1981 = vmatprep.mubr.bf16.mxu0 %v5669_v11 }
 0x2f2   : > { %1982 = vmatmul.mubr.bf16.gmra.mrb[40].mxu0 %v2940_v19 }
 0x2f3   : > { %1991 = vmatprep.mubr.bf16.mxu0 %v5669_v11 }
 0x2fa   : > { %1992 = vmatmul.mubr.bf16.gmra.mrb[44].mxu0 %v2941_v43 }
 0x2fb   : > { %2339 = vmatprep.mubr.bf16.mxu0 %v5669_v11 }
 0x3b5   : > { %v1963_v12 = vpop.f32.mrb[32].mxu0 }
 0x3b6   : > { %v5009_v41 = vadd.f32 %v1963_v12, %v1868_v1  ;;  %v1965_v29 = vpop.f32.mrb[33].mxu0  ;;  %v1903_v12 = vpop.permute.xlu1 %1902 }
 0x3b7   : > { %v5011_v35 = vadd.f32 %v1965_v29, %v1868_v1  ;;  %v1967_v34 = vpop.f32.mrb[34].mxu0 }
 0x3b8   : > { %v2018_v58 = vmul.f32 1.442695, %v5009_v41  ;;  %v5014_v54 = vadd.f32 %v1967_v34, %v1873_v22  ;;  %v1969_v59 = vpop.f32.mrb[35].mxu0  ;;  %vm2002_vm1 = vcmp.gt.f32.partialorder %v5009_v41, 20.0 }
 0x3b9   : > { %v2020_v25 = vmul.f32 1.442695, %v5011_v35  ;;  %v5024_v52 = vadd.f32 %v1969_v59, %v1873_v22  ;;  %vm2003_vm9 = vcmp.gt.f32.partialorder %v5011_v35, 20.0 }
 0x3ba   : > { %3202 = vpow2.f32 %v2018_v58  ;;  %v2022_v8 = vmul.f32 1.442695, %v5014_v54  ;;  %vm2004_vm2 = vcmp.gt.f32.partialorder %v5014_v54, 20.0 }
 0x3bb   : > { %v2024_v33 = vmul.f32 1.442695, %v5024_v52  ;;  %vm2005_vm12 = vcmp.gt.f32.partialorder %v5024_v52, 20.0 }
 0x3bc   : > { %3204 = vpow2.f32 %v2022_v8 }
 0x3bd   : > { %v1973_v40 = vpop.f32.mrb[36].mxu0  ;;  %3206 = vpow2.f32 %v2020_v25 }
 0x3be   : > { %v5018_v17 = vadd.f32 %v1973_v40, %v1878_v20  ;;  %v1975_v49 = vpop.f32.mrb[37].mxu0 }
 0x3bf   : > { %v1977_v53 = vpop.f32.mrb[38].mxu0  ;;  %v5028_v10 = vadd.f32 %v1975_v49, %v1878_v20 }
 0x3c0   : > { %v2026_v4 = vmul.f32 1.442695, %v5018_v17  ;;  %v5021_v27 = vadd.f32 %v1977_v53, %v1883_v0  ;;  %v1979_v23 = vpop.f32.mrb[39].mxu0  ;;  %vm2006_vm5 = vcmp.gt.f32.partialorder %v5018_v17, 20.0 }
 0x3c1   : > { %v5031_v48 = vadd.f32 %v1979_v23, %v1883_v0  ;;  %v2028_v46 = vmul.f32 1.442695, %v5028_v10 }
 0x3c2   : > { %3208 = vpow2.f32 %v2026_v4  ;;  %v2030_v30 = vmul.f32 1.442695, %v5021_v27  ;;  %vm2008_vm6 = vcmp.gt.f32.partialorder %v5021_v27, 20.0 }
 0x3c3   : > { %v2032_v61 = vmul.f32 1.442695, %v5031_v48 }
 0x3c4   : > { %v5026_v9 = vpop.eup %3202  ;;  %3210 = vpow2.f32 %v2030_v30 }
 0x3c5   : > { %v2050_v47 = vadd.f32 1.0, %v5026_v9  ;;  %v1983_v42 = vpop.f32.mrb[40].mxu0  ;;  %v2053_v2 = vmul.f32 -0.5, %v5026_v9  ;;  %v2056_v38 = vand.u32 2147483647, %v5026_v9 }
 0x3c6   : > { %v5033_v18 = vpop.eup %3204  ;;  %v5035_v63 = vadd.f32 %v1983_v42, %v1888_v39  ;;  %v1985_v28 = vpop.f32.mrb[41].mxu0 }
 0x3c7   : > { %3212 = vlog2.f32 %v2050_v47  ;;  %v2068_v45 = vadd.f32 1.0, %v5033_v18  ;;  %v1987_v15 = vpop.f32.mrb[42].mxu0  ;;  %v5042_v31 = vpop.eup %3206  ;;  %v2054_v51 = vadd.f32 1.0, %v2053_v2  ;;  %v2071_v6 = vmul.f32 -0.5, %v5033_v18 }
 0x3c8   : > { %v2034_v7 = vmul.f32 1.442695, %v5035_v63  ;;  %v5045_v57 = vadd.f32 %v1987_v15, %v1893_v16  ;;  %v1989_v21 = vpop.f32.mrb[43].mxu0  ;;  %v2059_v14 = vadd.f32 1.0, %v5042_v31  ;;  %v5053_v44 = vadd.f32 %v1985_v28, %v1888_v39 }
 0x3c9   : > { %3214 = vlog2.f32 %v2068_v45  ;;  %v2074_v56 = vand.u32 2147483647, %v5033_v18  ;;  %v2055_v55 = vmul.f32 %v5026_v9, %v2054_v51  ;;  %v2072_v13 = vadd.f32 1.0, %v2071_v6 }
 0x3ca   : > { %3216 = vpow2.f32 %v2034_v7  ;;  %v2038_v26 = vmul.f32 1.442695, %v5045_v57  ;;  %v2062_v43 = vmul.f32 -0.5, %v5042_v31  ;;  %v2036_v29 = vmul.f32 1.442695, %v5053_v44 }
 0x3cb   : > { %3218 = vpow2.f32 %v2024_v33  ;;  %v5067_v22 = vadd.f32 %v1989_v21, %v1893_v16  ;;  %vm5074_vm3 = vcmp.lt.f32.partialorder %v2056_v38, 0.0004427343  ;;  %vm5078_vm4 = vcmp.lt.f32.partialorder %v2074_v56, 0.0004427343 }
 0x3cc   : > { %v5048_v60 = vpop.eup %3208  ;;  %3220 = vpow2.f32 %v2028_v46  ;;  %v2065_v0 = vand.u32 2147483647, %v5042_v31  ;;  %v2073_v30 = vmul.f32 %v5033_v18, %v2072_v13  ;;  %v2063_v6 = vadd.f32 1.0, %v2062_v43 }
 0x3cd   : > { %v2086_v50 = vadd.f32 1.0, %v5048_v60  ;;  %3222 = vpow2.f32 %v2032_v61  ;;  %v1993_v36 = vpop.f32.mrb[44].mxu0  ;;  %v2089_v59 = vmul.f32 -0.5, %v5048_v60  ;;  %v2092_v9 = vand.u32 2147483647, %v5048_v60 }
 0x3ce   : > { %v5055_v37 = vpop.eup %3210  ;;  %3224 = vpow2.f32 %v2038_v26  ;;  %v5059_v5 = vadd.f32 %v1993_v36, %v1898_v3  ;;  %v1995_v62 = vpop.f32.mrb[45].mxu0  ;;  %v2040_v42 = vmul.f32 1.442695, %v5067_v22  ;;  %vm5121_vm8 = vcmp.lt.f32.partialorder %v2065_v0, 0.0004427343 }
 0x3cf   : > { %3226 = vlog2.f32 %v2086_v50  ;;  %v2104_v24 = vadd.f32 1.0, %v5055_v37  ;;  %v1997_v32 = vpop.f32.mrb[46].mxu0  ;;  %v2107_v8 = vmul.f32 -0.5, %v5055_v37  ;;  %v5093_v28 = vadd.f32 %v1995_v62, %v1898_v3 }
 0x3d0   : > { %v1999_v19 = vpop.f32.mrb[47].mxu0  ;;  %3228 = vlog2.f32 %v2059_v14  ;;  %v2042_v34 = vmul.f32 1.442695, %v5059_v5  ;;  %v5072_v25 = vadd.f32 %v1997_v32, %v1903_v12  ;;  %v2090_v15 = vadd.f32 1.0, %v2089_v59 }
 0x3d1   : > { %v3213_v1 = vpop.eup %3212  ;;  %3230 = vlog2.f32 %v2104_v24  ;;  %v2108_v18 = vadd.f32 1.0, %v2107_v8  ;;  %v5110_v61 = vadd.f32 %v1999_v19, %v1903_v12  ;;  %vm5114_vm7 = vcmp.lt.f32.partialorder %v2092_v9, 0.0004427343 }
 0x3d2   : > { %v2052_v58 = vmul.f32 0.6931472, %v3213_v1  ;;  %3232 = vpow2.f32 %v2042_v34  ;;  %v2046_v16 = vmul.f32 1.442695, %v5072_v25  ;;  %v2110_v3 = vand.u32 2147483647, %v5055_v37 }
 0x3d3   : > { %v3215_v20 = vpop.eup %3214  ;;  %3234 = vpow2.f32 %v2036_v29  ;;  %v2091_v56 = vmul.f32 %v5048_v60, %v2090_v15  ;;  %v2048_v19 = vmul.f32 1.442695, %v5110_v61  ;;  %v2064_v0 = vmul.f32 %v5042_v31, %v2063_v6 }
 0x3d4   : > { %v5083_v53 = vpop.eup %3216  ;;  %v2058_v4 = vsel %vm5074_vm3, %v2055_v55, %v2052_v58  ;;  %v2070_v23 = vmul.f32 0.6931472, %v3215_v20  ;;  %v2109_v55 = vmul.f32 %v5055_v37, %v2108_v18  ;;  %vm2111_vm10 = vcmp.lt.f32.partialorder %v2110_v3, 0.0004427343 }
 0x3d5   : > { %v5089_v39 = vpop.eup %3218  ;;  %v2122_v47 = vadd.f32 1.0, %v5083_v53  ;;  %v2194_v46 = vsel %vm2002_vm1, %v5009_v41, %v2058_v4  ;;  %v2125_v41 = vmul.f32 -0.5, %v5083_v53  ;;  %v2128_v34 = vand.u32 2147483647, %v5083_v53 }
 0x3d6   : > { %v5095_v45 = vpop.eup %3220  ;;  %v2076_v33 = vsel %vm5078_vm4, %v2073_v30, %v2070_v23  ;;  %v2077_v24 = vadd.f32 1.0, %v5089_v39  ;;  %v2080_v12 = vmul.f32 -0.5, %v5089_v39  ;;  %vm2010_vm11 = vcmp.gt.f32.partialorder %v5035_v63, 20.0 }
 0x3d7   : > { %v5102_v2 = vpop.eup %3222  ;;  %v2196_v7 = vsel %vm2004_vm2, %v5014_v54, %v2076_v33  ;;  %3236 = vlog2.f32 %v2122_v47  ;;  %v2044_v54 = vmul.f32 1.442695, %v5093_v28  ;;  %v2126_v29 = vadd.f32 1.0, %v2125_v41 }
 0x3d8   : > { %v3225_v21 = vpop.eup %3224  ;;  %v5112_v26 = vpack.c.bf16 %v2196_v7, %v2194_v46  ;;  %3238 = vpow2.f32 %v2046_v16  ;;  %v2081_v30 = vadd.f32 1.0, %v2080_v12  ;;  %vm5156_vm13 = vcmp.lt.f32.partialorder %v2128_v34, 0.0004427343 }
 0x3d9   : > { %v3227_v14 = vpop.eup %3226  ;;  %v2140_v50 = vadd.f32 1.0, %v3225_v21  ;;  %3240 = vpow2.f32 %v2040_v42  ;;  %v2143_v13 = vmul.f32 -0.5, %v3225_v21  ;;  %v2146_v58 = vand.u32 2147483647, %v3225_v21 }
 0x3da   : > { %v3229_v62 = vpop.eup %3228  ;;  %v2088_v38 = vmul.f32 0.6931472, %v3227_v14  ;;  %v2095_v42 = vadd.f32 1.0, %v5095_v45  ;;  %vm2012_vm14 = vcmp.gt.f32.partialorder %v5045_v57, 20.0  ;;  %v2127_v16 = vmul.f32 %v5083_v53, %v2126_v29 }
 0x3db   : > { %v3231_v32 = vpop.eup %3230  ;;  %3242 = vlog2.f32 %v2140_v50  ;;  %v2061_v8 = vmul.f32 0.6931472, %v3229_v62  ;;  %v2144_v23 = vadd.f32 1.0, %v2143_v13  ;;  %vm5164_vm15 = vcmp.lt.f32.partialorder %v2146_v58, 0.0004427343 }
 0x3dc   : > { %v2094_v43 = vsel %vm5114_vm7, %v2091_v56, %v2088_v38  ;;  %v2106_v1 = vmul.f32 0.6931472, %v3231_v32  ;;  %3244 = vlog2.f32 %v2077_v24  ;;  %v5133_v60 = vpop.eup %3232  ;;  %v2082_v3 = vmul.f32 %v5089_v39, %v2081_v30 }
 0x3dd   : > { %3246 = vpow2.f32 %v2044_v54  ;;  %v2158_v59 = vadd.f32 1.0, %v5133_v60  ;;  %v5137_v20 = vpop.eup %3234  ;;  %v2198_v40 = vsel %vm2006_vm5, %v5018_v17, %v2094_v43  ;;  %v2161_v47 = vmul.f32 -0.5, %v5133_v60 }
 0x3de   : > { %v2112_v37 = vsel %vm2111_vm10, %v2109_v55, %v2106_v1  ;;  %3248 = vpow2.f32 %v2048_v19  ;;  %v2083_v17 = vand.u32 2147483647, %v5089_v39  ;;  %v2067_v18 = vsel %vm5121_vm8, %v2064_v0, %v2061_v8 }
 0x3df   : > { %v2200_v49 = vsel %vm2008_vm6, %v5021_v27, %v2112_v37  ;;  %3250 = vlog2.f32 %v2158_v59  ;;  %v2113_v27 = vadd.f32 1.0, %v5102_v2  ;;  %v2145_v6 = vmul.f32 %v3225_v21, %v2144_v23 }
 0x3e0   : > { %v5146_v4 = vpack.c.bf16 %v2200_v49, %v2198_v40  ;;  %3252 = vlog2.f32 %v2095_v42  ;;  %v2164_v14 = vand.u32 2147483647, %v5133_v60  ;;  %v2162_v50 = vadd.f32 1.0, %v2161_v47 }
 0x3e1   : > { %v3237_v9 = vpop.eup %3236  ;;  %3254 = vlog2.f32 %v2113_v27  ;;  %vm5173_vm0 = vcmp.lt.f32.partialorder %v2083_v17, 0.0004427343  ;;  %v2195_v54 = vsel %vm2003_vm9, %v5011_v35, %v2067_v18  ;;  %v2098_v38 = vmul.f32 -0.5, %v5095_v45 }
 0x3e2   : > { %v5154_v33 = vpop.eup %3238  ;;  %v2124_v31 = vmul.f32 0.6931472, %v3237_v9  ;;  %v2101_v39 = vand.u32 2147483647, %v5095_v45  ;;  %v2116_v55 = vmul.f32 -0.5, %v5102_v2  ;;  %v2131_v13 = vadd.f32 1.0, %v5137_v20  ;;  %v2242_v9 = vpop.permute.xlu1 %2241 }
 0x3e3   : > { %v2176_v7 = vadd.f32 1.0, %v5154_v33  ;;  %v5169_v51 = vpop.eup %3240  ;;  %v2179_v24 = vmul.f32 -0.5, %v5154_v33  ;;  %v2182_v19 = vand.u32 2147483647, %v5154_v33  ;;  %v2119_v43 = vand.u32 2147483647, %v5102_v2 }
 0x3e4   : > { %v2130_v21 = vsel %vm5156_vm13, %v2127_v16, %v2124_v31  ;;  %v2149_v1 = vadd.f32 1.0, %v5169_v51  ;;  %vm2007_vm1 = vcmp.gt.f32.partialorder %v5028_v10, 20.0  ;;  %vm2009_vm2 = vcmp.gt.f32.partialorder %v5031_v48, 20.0 }
 0x3e5   : > { %v3243_v41 = vpop.eup %3242  ;;  %3256 = vlog2.f32 %v2176_v7  ;;  %v2202_v29 = vsel %vm2010_vm11, %v5035_v63, %v2130_v21  ;;  %vm2014_vm3 = vcmp.gt.f32.partialorder %v5059_v5, 20.0  ;;  %vm2016_vm4 = vcmp.gt.f32.partialorder %v5072_v25, 20.0 }
 0x3e6   : > { %v3245_v36 = vpop.eup %3244  ;;  %v2142_v62 = vmul.f32 0.6931472, %v3243_v41  ;;  %3258 = vlog2.f32 %v2131_v13  ;;  %v2099_v63 = vadd.f32 1.0, %v2098_v38  ;;  %v2180_v40 = vadd.f32 1.0, %v2179_v24 }
 0x3e7   : > { %v5184_v56 = vpop.eup %3246  ;;  %v2079_v32 = vmul.f32 0.6931472, %v3245_v36  ;;  %3260 = vlog2.f32 %v2149_v1  ;;  %v2134_v0 = vmul.f32 -0.5, %v5137_v20  ;;  %v2163_v30 = vmul.f32 %v5133_v60, %v2162_v50 }
 0x3e8   : > { %v2148_v35 = vsel %vm5164_vm15, %v2145_v6, %v2142_v62  ;;  %v5194_v12 = vpop.eup %3248  ;;  %vm5215_vm5 = vcmp.lt.f32.partialorder %v2164_v14, 0.0004427343  ;;  %v2167_v47 = vadd.f32 1.0, %v5184_v56  ;;  %vm5220_vm6 = vcmp.lt.f32.partialorder %v2182_v19, 0.0004427343 }
 0x3e9   : > { %v2204_v34 = vsel %vm2012_vm14, %v5045_v57, %v2148_v35  ;;  %v2085_v37 = vsel %vm5173_vm0, %v2082_v3, %v2079_v32  ;;  %v3251_v58 = vpop.eup %3250  ;;  %v2117_v57 = vadd.f32 1.0, %v2116_v55  ;;  %vm5224_vm7 = vcmp.lt.f32.partialorder %v2101_v39, 0.0004427343 }
 0x3ea   : > { %v5206_v59 = vpack.c.bf16 %v2204_v34, %v2202_v29  ;;  %v2197_v8 = vsel %vm2005_vm12, %v5024_v52, %v2085_v37  ;;  %v2160_v23 = vmul.f32 0.6931472, %v3251_v58  ;;  %v3253_v17 = vpop.eup %3252  ;;  %v2152_v27 = vmul.f32 -0.5, %v5169_v51 }
 0x3eb   : > { %v2219_v49 = vpack.c.bf16 %v2197_v8, %v2195_v54  ;;  %v2185_v60 = vadd.f32 1.0, %v5194_v12  ;;  %v3255_v31 = vpop.eup %3254  ;;  %v2097_v15 = vmul.f32 0.6931472, %v3253_v17  ;;  %v2100_v18 = vmul.f32 %v5095_v45, %v2099_v63 }
 0x3ec   : > { %vm5233_vm8 = vcmp.lt.f32.partialorder %v2119_v43, 0.0004427343  ;;  %3262 = vlog2.f32 %v2167_v47  ;;  %v2181_v7 = vmul.f32 %v5154_v33, %v2180_v40  ;;  %v2115_v6 = vmul.f32 0.6931472, %v3255_v31 }
 0x3ed   : > { %2307 = vmatprep.subr.bf16.mxu0 %v2219_v49  ;;  %2871 = vmatprep.subr.bf16.mxu1 %v2219_v49  ;;  %v2118_v14 = vmul.f32 %v5102_v2, %v2117_v57  ;;  %v2135_v3 = vadd.f32 1.0, %v2134_v0  ;;  %v2166_v41 = vsel %vm5215_vm5, %v2163_v30, %v2160_v23  ;;  %3264 = vlog2.f32 %v2185_v60  ;;  %v2237_v30 = vpop.permute.xlu0 %2236 }
 0x3ee   : > { %2308 = vmatpush1.bf16.msra.mxu0 %v5112_v26  ;;  %2875 = vmatpush1.bf16.msra.mxu1 %v5112_v26  ;;  %v2103_v26 = vsel %vm5224_vm7, %v2100_v18, %v2097_v15  ;;  %v2137_v53 = vand.u32 2147483647, %v5137_v20  ;;  %v2153_v54 = vadd.f32 1.0, %v2152_v27  ;;  %v2170_v33 = vmul.f32 -0.5, %v5184_v56 }
 0x3ef   : > { %v3257_v46 = vpop.eup %3256  ;;  %v2121_v45 = vsel %vm5233_vm8, %v2118_v14, %v2115_v6  ;;  %v2199_v36 = vsel %vm2007_vm1, %v5028_v10, %v2103_v26  ;;  %v2155_v62 = vand.u32 2147483647, %v5169_v51  ;;  %v2206_v39 = vsel %vm2014_vm3, %v5059_v5, %v2166_v41  ;;  %v2252_v6 = vpop.permute.xlu1 %2251 }
 0x3f0   : > { %v2178_v50 = vmul.f32 0.6931472, %v3257_v46  ;;  %v2201_v21 = vsel %vm2009_vm2, %v5031_v48, %v2121_v45  ;;  %v3259_v38 = vpop.eup %3258  ;;  %v2188_v55 = vmul.f32 -0.5, %v5194_v12  ;;  %v2136_v19 = vmul.f32 %v5137_v20, %v2135_v3 }
 0x3f1   : > { %v2221_v32 = vpack.c.bf16 %v2201_v21, %v2199_v36  ;;  %v3261_v13 = vpop.eup %3260  ;;  %v2133_v35 = vmul.f32 0.6931472, %v3259_v38  ;;  %vm2138_vm9 = vcmp.lt.f32.partialorder %v2137_v53, 0.0004427343  ;;  %v2154_v43 = vmul.f32 %v5169_v51, %v2153_v54  ;;  %v2247_v47 = vpop.permute.xlu0 %2246 }
 0x3f2   : > { %v2184_v2 = vsel %vm5220_vm6, %v2181_v7, %v2178_v50  ;;  %v2151_v48 = vmul.f32 0.6931472, %v3261_v13  ;;  %v2171_v1 = vadd.f32 1.0, %v2170_v33  ;;  %vm2156_vm10 = vcmp.lt.f32.partialorder %v2155_v62, 0.0004427343 }
 0x3f3   : > { %v2208_v24 = vsel %vm2016_vm4, %v5072_v25, %v2184_v2  ;;  %2309 = vmatprep.subr.bf16.mxu0 %v2221_v32  ;;  %2872 = vmatprep.subr.bf16.mxu1 %v2221_v32  ;;  %v2139_v5 = vsel %vm2138_vm9, %v2136_v19, %v2133_v35  ;;  %v2173_v25 = vand.u32 2147483647, %v5184_v56  ;;  %vm2011_vm11 = vcmp.gt.f32.partialorder %v5053_v44, 20.0  ;;  %v2262_v32 = vpop.permute.xlu1 %2261 }
 0x3f4   : > { %v2224_v10 = vpack.c.bf16 %v2208_v24, %v2206_v39  ;;  %2310 = vmatpush1.bf16.msra.mxu0 %v5146_v4  ;;  %2876 = vmatpush1.bf16.msra.mxu1 %v5146_v4  ;;  %vm2013_vm12 = vcmp.gt.f32.partialorder %v5067_v22, 20.0  ;;  %v2157_v20 = vsel %vm2156_vm10, %v2154_v43, %v2151_v48  ;;  %v2189_v29 = vadd.f32 1.0, %v2188_v55 }
 0x3f5   : > { %v2203_v37 = vsel %vm2011_vm11, %v5053_v44, %v2139_v5  ;;  %v2205_v51 = vsel %vm2013_vm12, %v5067_v22, %v2157_v20  ;;  %v2191_v58 = vand.u32 2147483647, %v5194_v12  ;;  %v2172_v4 = vmul.f32 %v5184_v56, %v2171_v1  ;;  %v2257_v2 = vpop.permute.xlu0 %2256 }
 0x3f6   : > { %v3263_v34 = vpop.eup %3262  ;;  %v2223_v8 = vpack.c.bf16 %v2205_v51, %v2203_v37  ;;  %vm2174_vm13 = vcmp.lt.f32.partialorder %v2173_v25, 0.0004427343  ;;  %v2190_v0 = vmul.f32 %v5194_v12, %v2189_v29  ;;  %vm2015_vm15 = vcmp.gt.f32.partialorder %v5093_v28, 20.0  ;;  %v2942_v12 = vld [vmem:[%s5572_s7] sm:$0xff]  }
 0x3f7   : > { %v2169_v63 = vmul.f32 0.6931472, %v3263_v34  ;;  %v3265_v40 = vpop.eup %3264  ;;  %vm2192_vm14 = vcmp.lt.f32.partialorder %v2191_v58, 0.0004427343  ;;  %vm2017_vm0 = vcmp.gt.f32.partialorder %v5110_v61, 20.0  ;;  %vm2294_vm1 = vcmask 523264  }
 0x3f8   : > { %2311 = vmatprep.subr.bf16.mxu0 %v2223_v8  ;;  %2873 = vmatprep.subr.bf16.mxu1 %v2223_v8  ;;  %v2187_v57 = vmul.f32 0.6931472, %v3265_v40 }
 0x3f9   : > { %v2175_v49 = vsel %vm2174_vm13, %v2172_v4, %v2169_v63  ;;  %2312 = vmatpush1.bf16.msra.mxu0 %v5206_v59  ;;  %2877 = vmatpush1.bf16.msra.mxu1 %v5206_v59  ;;  %v2943_v59 = vld [vmem:[%s5572_s7 + $0x8] sm:$0xff]  }
 0x3fa   : > { %v2193_v44 = vsel %vm2192_vm14, %v2190_v0, %v2187_v57  ;;  %v2207_v22 = vsel %vm2015_vm15, %v5093_v28, %v2175_v49  ;;  %v2944_v28 = vld [vmem:[%s5572_s7 + $0x10] sm:$0xff]  }
 0x3fb   : > { %v2209_v56 = vsel %vm2017_vm0, %v5110_v61, %v2193_v44  ;;  %v2945_v61 = vld [vmem:[%s5572_s7 + $0x18] sm:$0xff]  }
 0x3fc   : > { %v2225_v23 = vpack.c.bf16 %v2209_v56, %v2207_v22 }
 0x3fe   : > { %2313 = vmatprep.subr.bf16.mxu0 %v2225_v23  ;;  %2874 = vmatprep.subr.bf16.mxu1 %v2225_v23 }
 0x3ff   : > { %2314 = vmatpush1.bf16.msra.mxu0 %v2224_v10  ;;  %2878 = vmatpush1.bf16.msra.mxu1 %v2224_v10 }
 0x402   : > { %2860 = vmatmul.mubr.msk.bf16.vlgmr.msra.gmra.mrb[48].mxu0 %vm2294_vm1, %v2942_v12  ;;  %2861 = vmatmul.mubr.msk.bf16.vlgmr.msra.gmra.mrb[32].mxu1 %vm2294_vm1, %v2943_v59 }
 0x403   : > { %2359 = vmatprep.mubr.bf16.mxu1 %v5669_v11 }
 0x40a   : > { %2862 = vmatmul.mubr.msk.bf16.gmra.mrb[36].mxu1 %vm2294_vm1, %v2944_v28 }
 0x40b   : > { %2369 = vmatprep.mubr.bf16.mxu1 %v5669_v11 }
 0x412   : > { %2863 = vmatmul.mubr.msk.bf16.gmra.mrb[40].mxu1 %vm2294_vm1, %v2945_v61 }
 0x4d5   : > { %v2341_v17 = vpop.f32.mrb[48].mxu0  ;;  %v2351_v42 = vpop.f32.mrb[32].mxu1 }
 0x4d6   : > { %v5295_v52 = vadd.f32 %v2341_v17, %v2237_v30  ;;  %v5297_v27 = vadd.f32 %v2351_v42, %v2247_v47  ;;  %v2343_v60 = vpop.f32.mrb[49].mxu0  ;;  %v2353_v31 = vpop.f32.mrb[33].mxu1 }
 0x4d7   : > { %v5299_v15 = vadd.f32 %v2343_v60, %v2237_v30  ;;  %v5301_v18 = vadd.f32 %v2353_v31, %v2247_v47  ;;  %v2345_v11 = vpop.f32.mrb[50].mxu0  ;;  %v2355_v16 = vpop.f32.mrb[34].mxu1 }
 0x4d8   : > { %v2396_v46 = vmul.f32 1.442695, %v5295_v52  ;;  %v2404_v7 = vmul.f32 1.442695, %v5297_v27  ;;  %v5307_v41 = vadd.f32 %v2345_v11, %v2242_v9  ;;  %v5309_v50 = vadd.f32 %v2355_v16, %v2252_v6  ;;  %v2347_v26 = vpop.f32.mrb[51].mxu0  ;;  %v2357_v45 = vpop.f32.mrb[35].mxu1 }
 0x4d9   : > { %v2398_v14 = vmul.f32 1.442695, %v5299_v15  ;;  %v2406_v3 = vmul.f32 1.442695, %v5301_v18  ;;  %v5311_v53 = vadd.f32 %v2347_v26, %v2242_v9  ;;  %v5313_v54 = vadd.f32 %v2357_v45, %v2252_v6  ;;  %v5343_v47 = vpop.permute.xlu0 %2266 }
 0x4da   : > { %3266 = vpow2.f32 %v2396_v46  ;;  %v2400_v33 = vmul.f32 1.442695, %v5307_v41  ;;  %v2408_v36 = vmul.f32 1.442695, %v5309_v50  ;;  %vm2380_vm4 = vcmp.gt.f32.partialorder %v5295_v52, 20.0 }
 0x4db   : > { %3268 = vpow2.f32 %v2404_v7  ;;  %v2402_v21 = vmul.f32 1.442695, %v5311_v53  ;;  %v2410_v38 = vmul.f32 1.442695, %v5313_v54  ;;  %vm2384_vm5 = vcmp.gt.f32.partialorder %v5297_v27, 20.0 }
 0x4dc   : > { %3270 = vpow2.f32 %v2398_v14  ;;  %vm2381_vm7 = vcmp.gt.f32.partialorder %v5299_v15, 20.0  ;;  %vm2382_vm10 = vcmp.gt.f32.partialorder %v5307_v41, 20.0  ;;  %vm2385_vm11 = vcmp.gt.f32.partialorder %v5301_v18, 20.0 }
 0x4dd   : > { %3272 = vpow2.f32 %v2406_v3  ;;  %v2361_v62 = vpop.f32.mrb[36].mxu1  ;;  %vm2386_vm12 = vcmp.gt.f32.partialorder %v5309_v50, 20.0  ;;  %vm2383_vm14 = vcmp.gt.f32.partialorder %v5311_v53, 20.0  ;;  %vm2387_vm0 = vcmp.gt.f32.partialorder %v5313_v54, 20.0 }
 0x4de   : > { %3274 = vpow2.f32 %v2400_v33  ;;  %v5319_v39 = vadd.f32 %v2361_v62, %v2257_v2  ;;  %v2363_v24 = vpop.f32.mrb[37].mxu1 }
 0x4df   : > { %v5321_v55 = vadd.f32 %v2363_v24, %v2257_v2  ;;  %v2365_v13 = vpop.f32.mrb[38].mxu1  ;;  %3276 = vpow2.f32 %v2408_v36 }
 0x4e0   : > { %v2412_v10 = vmul.f32 1.442695, %v5319_v39  ;;  %v5324_v35 = vadd.f32 %v2365_v13, %v2262_v32  ;;  %v2367_v19 = vpop.f32.mrb[39].mxu1  ;;  %3278 = vpow2.f32 %v2402_v21 }
 0x4e1   : > { %v2414_v48 = vmul.f32 1.442695, %v5321_v55  ;;  %v5327_v43 = vadd.f32 %v2367_v19, %v2262_v32  ;;  %3280 = vpow2.f32 %v2410_v38 }
 0x4e2   : > { %v2416_v1 = vmul.f32 1.442695, %v5324_v35  ;;  %3282 = vpow2.f32 %v2412_v10 }
 0x4e3   : > { %v2418_v5 = vmul.f32 1.442695, %v5327_v43  ;;  %3284 = vpow2.f32 %v2414_v48 }
 0x4e4   : > { %v3267_v25 = vpop.eup %3266  ;;  %3286 = vpow2.f32 %v2416_v1 }
 0x4e5   : > { %v3269_v20 = vpop.eup %3268  ;;  %v2428_v29 = vadd.f32 1.0, %v3267_v25  ;;  %v2371_v34 = vpop.f32.mrb[40].mxu1  ;;  %v2431_v51 = vmul.f32 -0.5, %v3267_v25  ;;  %3288 = vpow2.f32 %v2418_v5  ;;  %v2434_v40 = vand.u32 2147483647, %v3267_v25 }
 0x4e6   : > { %v3271_v37 = vpop.eup %3270  ;;  %v2464_v58 = vadd.f32 1.0, %v3269_v20  ;;  %v2467_v8 = vmul.f32 -0.5, %v3269_v20  ;;  %v5331_v63 = vpop.f32.mrb[41].mxu1  ;;  %v2470_v44 = vand.u32 2147483647, %v3269_v20  ;;  %v5358_v6 = vadd.f32 %v2371_v34, %v5343_v47 }
 0x4e7   : > { %v3273_v4 = vpop.eup %3272  ;;  %3290 = vlog2.f32 %v2428_v29  ;;  %v2437_v49 = vadd.f32 1.0, %v3271_v37  ;;  %v5333_v57 = vpop.f32.mrb[42].mxu1  ;;  %v2440_v22 = vmul.f32 -0.5, %v3271_v37  ;;  %v2432_v59 = vadd.f32 1.0, %v2431_v51 }
 0x4e8   : > { %v5335_v0 = vpop.eup %3274  ;;  %3292 = vlog2.f32 %v2464_v58  ;;  %v5337_v56 = vpop.f32.mrb[43].mxu1  ;;  %v2473_v23 = vadd.f32 1.0, %v3273_v4  ;;  %v2468_v28 = vadd.f32 1.0, %v2467_v8  ;;  %v2443_v61 = vand.u32 2147483647, %v3271_v37 }
 0x4e9   : > { %3294 = vlog2.f32 %v2437_v49  ;;  %v5339_v12 = vpop.eup %3276  ;;  %v2476_v30 = vmul.f32 -0.5, %v3273_v4  ;;  %vm5345_vm2 = vcmp.lt.f32.partialorder %v2434_v40, 0.0004427343  ;;  %v2441_v42 = vadd.f32 1.0, %v2440_v22  ;;  %v2599_v51 = vpop.permute.xlu0 %2598 }
 0x4ea   : > { %v5341_v9 = vpop.eup %3278  ;;  %3296 = vlog2.f32 %v2473_v23  ;;  %v2446_v60 = vadd.f32 1.0, %v5335_v0  ;;  %v2449_v31 = vmul.f32 -0.5, %v5335_v0  ;;  %vm5353_vm3 = vcmp.lt.f32.partialorder %v2470_v44, 0.0004427343  ;;  %v5396_v49 = vpop.permute.xlu1 %2271 }
 0x4eb   : > { %v5351_v11 = vpop.eup %3280  ;;  %v2477_v46 = vadd.f32 1.0, %v2476_v30  ;;  %v2479_v7 = vand.u32 2147483647, %v3273_v4  ;;  %v2452_v3 = vand.u32 2147483647, %v5335_v0  ;;  %v2482_v26 = vadd.f32 1.0, %v5339_v12 }
 0x4ec   : > { %v5360_v14 = vpop.eup %3282  ;;  %3298 = vlog2.f32 %v2446_v60  ;;  %v2485_v45 = vmul.f32 -0.5, %v5339_v12  ;;  %v2433_v2 = vmul.f32 %v3267_v25, %v2432_v59  ;;  %v2469_v36 = vmul.f32 %v3269_v20, %v2468_v28 }
 0x4ed   : > { %v5367_v33 = vpop.eup %3284  ;;  %vm5369_vm6 = vcmp.lt.f32.partialorder %v2443_v61, 0.0004427343  ;;  %v2455_v62 = vadd.f32 1.0, %v5341_v9  ;;  %v2442_v24 = vmul.f32 %v3271_v37, %v2441_v42  ;;  %v2450_v32 = vadd.f32 1.0, %v2449_v31 }
 0x4ee   : > { %v5374_v38 = vpop.eup %3286  ;;  %3300 = vlog2.f32 %v2482_v26  ;;  %v2458_v13 = vmul.f32 -0.5, %v5341_v9  ;;  %v5380_v19 = vmul.f32 %v3273_v4, %v2477_v46  ;;  %vm5382_vm8 = vcmp.lt.f32.partialorder %v2479_v7, 0.0004427343 }
 0x4ef   : > { %v5378_v10 = vpop.eup %3288  ;;  %3302 = vlog2.f32 %v2455_v62  ;;  %v2491_v1 = vadd.f32 1.0, %v5351_v11  ;;  %vm5387_vm9 = vcmp.lt.f32.partialorder %v2452_v3, 0.0004427343  ;;  %v2486_v20 = vadd.f32 1.0, %v2485_v45 }
 0x4f0   : > { %v2488_v29 = vand.u32 2147483647, %v5339_v12  ;;  %v2494_v34 = vmul.f32 -0.5, %v5351_v11  ;;  %v2461_v8 = vand.u32 2147483647, %v5341_v9  ;;  %v2500_v4 = vadd.f32 1.0, %v5360_v14 }
 0x4f1   : > { %v3291_v5 = vpop.eup %3290  ;;  %3304 = vlog2.f32 %v2491_v1  ;;  %v2451_v22 = vmul.f32 %v5335_v0, %v2450_v32  ;;  %v2459_v23 = vadd.f32 1.0, %v2458_v13  ;;  %v2497_v59 = vand.u32 2147483647, %v5351_v11  ;;  %v2604_v32 = vpop.permute.xlu1 %2603 }
 0x4f2   : > { %v3293_v37 = vpop.eup %3292  ;;  %v2430_v58 = vmul.f32 0.6931472, %v3291_v5  ;;  %v2495_v30 = vadd.f32 1.0, %v2494_v34  ;;  %3306 = vlog2.f32 %v2500_v4  ;;  %v2487_v31 = vmul.f32 %v5339_v12, %v2486_v20 }
 0x4f3   : > { %v3295_v40 = vpop.eup %3294  ;;  %v2466_v44 = vmul.f32 0.6931472, %v3293_v37  ;;  %vm5407_vm13 = vcmp.lt.f32.partialorder %v2488_v29, 0.0004427343  ;;  %v2503_v0 = vmul.f32 -0.5, %v5360_v14  ;;  %v2460_v26 = vmul.f32 %v5341_v9, %v2459_v23 }
 0x4f4   : > { %v2436_v28 = vsel %vm5345_vm2, %v2433_v2, %v2430_v58  ;;  %v2439_v61 = vmul.f32 0.6931472, %v3295_v40  ;;  %v3297_v42 = vpop.eup %3296  ;;  %vm5422_vm15 = vcmp.lt.f32.partialorder %v2461_v8, 0.0004427343  ;;  %vm5427_vm1 = vcmp.lt.f32.partialorder %v2497_v59, 0.0004427343 }
 0x4f5   : > { %v2472_v60 = vsel %vm5353_vm3, %v2469_v36, %v2466_v44  ;;  %v2572_v17 = vsel %vm2380_vm4, %v5295_v52, %v2436_v28  ;;  %v2475_v12 = vmul.f32 0.6931472, %v3297_v42  ;;  %v2506_v52 = vand.u32 2147483647, %v5360_v14 }
 0x4f6   : > { %v2576_v7 = vsel %vm2384_vm5, %v5297_v27, %v2472_v60  ;;  %v2445_v16 = vsel %vm5369_vm6, %v2442_v24, %v2439_v61  ;;  %v3299_v3 = vpop.eup %3298  ;;  %v2609_v27 = vpop.permute.xlu0 %2608  ;;  %v2496_v9 = vmul.f32 %v5351_v11, %v2495_v30  ;;  %v2509_v62 = vadd.f32 1.0, %v5367_v33 }
 0x4f7   : > { %v2573_v36 = vsel %vm2381_vm7, %v5299_v15, %v2445_v16  ;;  %v2448_v21 = vmul.f32 0.6931472, %v3299_v3  ;;  %v2636_v13 = vmul.f32 %v2599_v51, %v2572_v17  ;;  %v2640_v1 = vmul.f32 %v2609_v27, %v2576_v7  ;;  %v2614_v30 = vpop.permute.xlu1 %2613 }
 0x4f8   : > { %v3301_v24 = vpop.eup %3300  ;;  %v2481_v5 = vsel %vm5382_vm8, %v5380_v19, %v2475_v12  ;;  %v2504_v20 = vadd.f32 1.0, %v2503_v0  ;;  %3308 = vlog2.f32 %v2509_v62  ;;  %v2512_v15 = vmul.f32 -0.5, %v5367_v33 }
 0x4f9   : > { %v3303_v29 = vpop.eup %3302  ;;  %v2454_v34 = vsel %vm5387_vm9, %v2451_v22, %v2448_v21  ;;  %v2484_v37 = vmul.f32 0.6931472, %v3301_v24  ;;  %v2637_v11 = vmul.f32 %v2599_v51, %v2573_v36  ;;  %vm5446_vm2 = vcmp.lt.f32.partialorder %v2506_v52, 0.0004427343 }
 0x4fa   : > { %v2574_v58 = vsel %vm2382_vm10, %v5307_v41, %v2454_v34  ;;  %v2457_v8 = vmul.f32 0.6931472, %v3303_v29  ;;  %v2577_v48 = vsel %vm2385_vm11, %v5301_v18, %v2481_v5  ;;  %v2518_v51 = vadd.f32 1.0, %v5374_v38  ;;  %v2619_v12 = vpop.permute.xlu0 %2618 }
 0x4fb   : > { %v3305_v19 = vpop.eup %3304  ;;  %v2638_v25 = vmul.f32 %v2604_v32, %v2574_v58  ;;  %v2490_v40 = vsel %vm5407_vm13, %v2487_v31, %v2484_v37  ;;  %v2505_v23 = vmul.f32 %v5360_v14, %v2504_v20  ;;  %v2513_v61 = vadd.f32 1.0, %v2512_v15 }
 0x4fc   : > { %v2578_v41 = vsel %vm2386_vm12, %v5309_v50, %v2490_v40  ;;  %v2463_v44 = vsel %vm5422_vm15, %v2460_v26, %v2457_v8  ;;  %v2493_v22 = vmul.f32 0.6931472, %v3305_v19  ;;  %v3307_v59 = vpop.eup %3306  ;;  %3310 = vlog2.f32 %v2518_v51 }
 0x4fd   : > { %v2652_v28 = vadd.f32 %v2638_v25, %v2636_v13  ;;  %v2575_v18 = vsel %vm2383_vm14, %v5311_v53, %v2463_v44  ;;  %v2502_v50 = vmul.f32 0.6931472, %v3307_v59  ;;  %v2521_v31 = vmul.f32 -0.5, %v5374_v38 }
 0x4fe   : > { %v2639_v42 = vmul.f32 %v2604_v32, %v2575_v18  ;;  %v2499_v60 = vsel %vm5427_vm1, %v2496_v9, %v2493_v22  ;;  %v2642_v46 = vmul.f32 %v2614_v30, %v2578_v41  ;;  %v2527_v17 = vadd.f32 1.0, %v5378_v10 }
 0x4ff   : > { %v2653_v0 = vadd.f32 %v2652_v28, %v2640_v1  ;;  %v2579_v14 = vsel %vm2387_vm0, %v5313_v54, %v2499_v60  ;;  %v2641_v7 = vmul.f32 %v2609_v27, %v2577_v48  ;;  %vm2388_vm3 = vcmp.gt.f32.partialorder %v5319_v39, 20.0 }
 0x500   : > { %v2665_v53 = vadd.f32 %v2639_v42, %v2637_v11  ;;  %v2508_v16 = vsel %vm5446_vm2, %v2505_v23, %v2502_v50  ;;  %v2515_v45 = vand.u32 2147483647, %v5367_v33  ;;  %3312 = vlog2.f32 %v2527_v17 }
 0x501   : > { %v2654_v3 = vadd.f32 %v2653_v0, %v2642_v46  ;;  %v2580_v26 = vsel %vm2388_vm3, %v5319_v39, %v2508_v16  ;;  %v2643_v2 = vmul.f32 %v2614_v30, %v2579_v14  ;;  %v2514_v54 = vmul.f32 %v5367_v33, %v2513_v61 }
 0x502   : > { %v2666_v52 = vadd.f32 %v2665_v53, %v2641_v7  ;;  %v2644_v36 = vmul.f32 %v2619_v12, %v2580_v26  ;;  %v3309_v21 = vpop.eup %3308  ;;  %v2522_v27 = vadd.f32 1.0, %v2521_v31  ;;  %v2420_v9 = vmul.f32 1.442695, %v5358_v6 }
 0x503   : > { %v5481_v62 = vadd.f32 %v5331_v63, %v5343_v47  ;;  %v5485_v24 = vadd.f32 %v5333_v57, %v5396_v49  ;;  %v2511_v13 = vmul.f32 0.6931472, %v3309_v21  ;;  %v2530_v1 = vmul.f32 -0.5, %v5378_v10 }
 0x504   : > { %v2667_v39 = vadd.f32 %v2666_v52, %v2643_v2  ;;  %v2655_v32 = vadd.f32 %v2654_v3, %v2644_v36  ;;  %vm2516_vm4 = vcmp.lt.f32.partialorder %v2515_v45, 0.0004427343  ;;  %v2524_v33 = vand.u32 2147483647, %v5374_v38  ;;  %v2629_v52 = vpop.permute.xlu0 %2628 }
 0x505   : > { %3314 = vpow2.f32 %v2420_v9  ;;  %v2422_v5 = vmul.f32 1.442695, %v5481_v62  ;;  %vm2389_vm5 = vcmp.gt.f32.partialorder %v5321_v55, 20.0  ;;  %v2517_v20 = vsel %vm2516_vm4, %v2514_v54, %v2511_v13 }
 0x506   : > { %v2424_v63 = vmul.f32 1.442695, %v5485_v24  ;;  %v3311_v47 = vpop.eup %3310  ;;  %v2581_v57 = vsel %vm2389_vm5, %v5321_v55, %v2517_v20  ;;  %v2523_v29 = vmul.f32 %v5374_v38, %v2522_v27  ;;  %v5496_v34 = vadd.f32 %v5337_v56, %v5396_v49  ;;  %v2624_v38 = vpop.permute.xlu1 %2623 }
 0x507   : > { %3316 = vpow2.f32 %v2422_v5  ;;  %v2645_v37 = vmul.f32 %v2619_v12, %v2581_v57  ;;  %v2520_v15 = vmul.f32 0.6931472, %v3311_v47  ;;  %v2531_v11 = vadd.f32 1.0, %v2530_v1 }
 0x508   : > { %3318 = vpow2.f32 %v2424_v63  ;;  %vm2525_vm6 = vcmp.lt.f32.partialorder %v2524_v33, 0.0004427343  ;;  %v2533_v58 = vand.u32 2147483647, %v5378_v10  ;;  %v2426_v8 = vmul.f32 1.442695, %v5496_v34 }
 0x509   : > { %v2668_v4 = vadd.f32 %v2667_v39, %v2645_v37  ;;  %vm2390_vm7 = vcmp.gt.f32.partialorder %v5324_v35, 20.0  ;;  %v2526_v55 = vsel %vm2525_vm6, %v2523_v29, %v2520_v15  ;;  %v2532_v25 = vmul.f32 %v5378_v10, %v2531_v11 }
 0x50a   : > { %v3313_v19 = vpop.eup %3312  ;;  %v2582_v48 = vsel %vm2390_vm7, %v5324_v35, %v2526_v55  ;;  %3320 = vpow2.f32 %v2426_v8  ;;  %vm2534_vm8 = vcmp.lt.f32.partialorder %v2533_v58, 0.0004427343  ;;  %vm2391_vm9 = vcmp.gt.f32.partialorder %v5327_v43, 20.0  ;;  %v2634_v47 = vpop.permute.xlu1 %2633 }
 0x50b   : > { %v2646_v56 = vmul.f32 %v2624_v38, %v2582_v48  ;;  %v2529_v49 = vmul.f32 0.6931472, %v3313_v19  ;;  %vm2392_vm11 = vcmp.gt.f32.partialorder %v5358_v6, 20.0  ;;  %vm2393_vm12 = vcmp.gt.f32.partialorder %v5481_v62, 20.0 }
 0x50c   : > { %vm2394_vm14 = vcmp.gt.f32.partialorder %v5485_v24, 20.0  ;;  %vm2395_vm1 = vcmp.gt.f32.partialorder %v5496_v34, 20.0  ;;  %v2684_v8 = vlaneseq }
 0x50d   : > { %v2656_v40 = vadd.f32 %v2655_v32, %v2646_v56  ;;  %v2535_v51 = vsel %vm2534_vm8, %v2532_v25, %v2529_v49 }
 0x50e   : > { %v2583_v44 = vsel %vm2391_vm9, %v5327_v43, %v2535_v51  ;;  %vm2736_vm6 = vcmp.lt.s32.totalorder %v2684_v8, 256 }
 0x50f   : > { %v3315_v41 = vpop.eup %3314  ;;  %v2647_v22 = vmul.f32 %v2624_v38, %v2583_v44 }
 0x510   : > { %v2536_v23 = vadd.f32 1.0, %v3315_v41  ;;  %v2539_v42 = vmul.f32 -0.5, %v3315_v41  ;;  %v2542_v46 = vand.u32 2147483647, %v3315_v41 }
 0x511   : > { %v3317_v59 = vpop.eup %3316  ;;  %v2669_v18 = vadd.f32 %v2668_v4, %v2647_v22 }
 0x512   : > { %v3319_v28 = vpop.eup %3318  ;;  %3322 = vlog2.f32 %v2536_v23  ;;  %v2545_v35 = vadd.f32 1.0, %v3317_v59  ;;  %v2548_v60 = vmul.f32 -0.5, %v3317_v59  ;;  %v2540_v50 = vadd.f32 1.0, %v2539_v42 }
 0x513   : > { %v2554_v61 = vadd.f32 1.0, %v3319_v28  ;;  %v2557_v31 = vmul.f32 -0.5, %v3319_v28  ;;  %v2551_v53 = vand.u32 2147483647, %v3317_v59  ;;  %vm2543_vm10 = vcmp.lt.f32.partialorder %v2542_v46, 0.0004427343 }
 0x514   : > { %v3321_v30 = vpop.eup %3320  ;;  %3324 = vlog2.f32 %v2545_v35  ;;  %v2549_v14 = vadd.f32 1.0, %v2548_v60  ;;  %v2541_v7 = vmul.f32 %v3315_v41, %v2540_v50  ;;  %v2560_v12 = vand.u32 2147483647, %v3319_v28  ;;  %v2682_v41 = vpop.permute.xlu0 %2681 }
 0x515   : > { %3326 = vlog2.f32 %v2554_v61  ;;  %v2563_v10 = vadd.f32 1.0, %v3321_v30  ;;  %v2566_v0 = vmul.f32 -0.5, %v3321_v30  ;;  %v2558_v16 = vadd.f32 1.0, %v2557_v31 }
 0x516   : > { %v2550_v21 = vmul.f32 %v3317_v59, %v2549_v14  ;;  %v2569_v27 = vand.u32 2147483647, %v3321_v30  ;;  %vm2552_vm13 = vcmp.lt.f32.partialorder %v2551_v53, 0.0004427343  ;;  %vm2561_vm15 = vcmp.lt.f32.partialorder %v2560_v12, 0.0004427343 }
 0x517   : > { %3328 = vlog2.f32 %v2563_v10  ;;  %v2567_v3 = vadd.f32 1.0, %v2566_v0  ;;  %v2559_v32 = vmul.f32 %v3319_v28, %v2558_v16  ;;  %v3403_v0 = vmov 1966171168  }
 0x518   : > { %vm2570_vm0 = vcmp.lt.f32.partialorder %v2569_v27, 0.0004427343 }
 0x519   : > { %v2568_v33 = vmul.f32 %v3321_v30, %v2567_v3 }
 0x51c   : > { %v3323_v43 = vpop.eup %3322 }
 0x51d   : > { %v2538_v17 = vmul.f32 0.6931472, %v3323_v43  ;;  %v2720_v43 = vunpack.c.l.s4 %v3403_v0 }
 0x51e   : > { %v3325_v26 = vpop.eup %3324 }
 0x51f   : > { %v2544_v45 = vsel %vm2543_vm10, %v2541_v7, %v2538_v17  ;;  %v3327_v2 = vpop.eup %3326  ;;  %v2547_v54 = vmul.f32 0.6931472, %v3325_v26  ;;  %v2721_v12 = vunpack.c.0.s8 %v2720_v43 }
 0x520   : > { %v2584_v36 = vsel %vm2392_vm11, %v5358_v6, %v2544_v45  ;;  %v2556_v39 = vmul.f32 0.6931472, %v3327_v2 }
 0x521   : > { %v2648_v9 = vmul.f32 %v2629_v52, %v2584_v36  ;;  %v3329_v13 = vpop.eup %3328  ;;  %v2553_v1 = vsel %vm2552_vm13, %v2550_v21, %v2547_v54 }
 0x522   : > { %v2585_v20 = vsel %vm2393_vm12, %v5481_v62, %v2553_v1  ;;  %v2562_v63 = vsel %vm2561_vm15, %v2559_v32, %v2556_v39  ;;  %v2565_v6 = vmul.f32 0.6931472, %v3329_v13  ;;  %v2685_v62 = vshrl.u32 %v2684_v8, 7 }
 0x523   : > { %v2657_v5 = vadd.f32 %v2656_v40, %v2648_v9  ;;  %v2649_v57 = vmul.f32 %v2629_v52, %v2585_v20  ;;  %v2586_v29 = vsel %vm2394_vm14, %v5485_v24, %v2562_v63 }
 0x524   : > { %v2650_v37 = vmul.f32 %v2634_v47, %v2586_v29  ;;  %v2571_v15 = vsel %vm2570_vm0, %v2568_v33, %v2565_v6  ;;  %v2686_v40 = vsub.s32 0, %v2685_v62  ;;  %v2724_v21 = vsub.s32 %v2721_v12, %v2685_v62 }
 0x525   : > { %v2670_v11 = vadd.f32 %v2669_v18, %v2649_v57  ;;  %v2587_v58 = vsel %vm2395_vm1, %v5496_v34, %v2571_v15 }
 0x526   : > { %v2658_v4 = vadd.f32 %v2657_v5, %v2650_v37  ;;  %v2651_v55 = vmul.f32 %v2634_v47, %v2587_v58  ;;  %v2687_v23 = vrot.slane %v2682_v41, %v2686_v40 }
 0x528   : > { %v2659_v19 = vrot.slane %v2658_v4, 4  ;;  %v2671_v38 = vadd.f32 %v2670_v11, %v2651_v55 }
 0x52a   : > { %v2660_v48 = vadd.f32 %v2659_v19, %v2658_v4  ;;  %v2672_v56 = vrot.slane %v2671_v38, 4 }
 0x52c   : > { %v2661_v49 = vrot.slane %v2660_v48, 2  ;;  %v2673_v25 = vadd.f32 %v2672_v56, %v2671_v38 }
 0x52e   : > { %v2662_v24 = vadd.f32 %v2661_v49, %v2660_v48  ;;  %v2674_v51 = vrot.slane %v2673_v25, 2 }
 0x530   : > { %v2663_v44 = vrot.slane %v2662_v24, 1  ;;  %v2675_v22 = vadd.f32 %v2674_v51, %v2673_v25 }
 0x532   : > { %v2664_v59 = vadd.f32 %v2663_v44, %v2662_v24  ;;  %v2676_v28 = vrot.slane %v2675_v22, 1 }
 0x534   : > { %v2688_v34 = vadd.f32 %v2687_v23, %v2664_v59  ;;  %v2677_v18 = vadd.f32 %v2676_v28, %v2675_v22 }
 0x536   : > { %v2692_v35 = vmul.f32 1.442695, %v2688_v34  ;;  %v2689_v61 = vadd.f32 %v2687_v23, %v2677_v18  ;;  %vm2690_vm3 = vcmp.gt.f32.partialorder %v2688_v34, 20.0 }
 0x538   : > { %3330 = vpow2.f32 %v2692_v35  ;;  %v2694_v30 = vmul.f32 1.442695, %v2689_v61  ;;  %vm2691_vm5 = vcmp.gt.f32.partialorder %v2689_v61, 20.0 }
 0x53a   : > { %3332 = vpow2.f32 %v2694_v30 }
 0x542   : > { %v3331_v42 = vpop.eup %3330 }
 0x543   : > { %v2696_v10 = vadd.f32 1.0, %v3331_v42  ;;  %v2699_v31 = vmul.f32 -0.5, %v3331_v42  ;;  %v2702_v17 = vand.u32 2147483647, %v3331_v42 }
 0x544   : > { %v3333_v60 = vpop.eup %3332 }
 0x545   : > { %3334 = vlog2.f32 %v2696_v10  ;;  %v2705_v50 = vadd.f32 1.0, %v3333_v60  ;;  %v2708_v46 = vmul.f32 -0.5, %v3333_v60  ;;  %v2700_v14 = vadd.f32 1.0, %v2699_v31 }
 0x546   : > { %v2711_v16 = vand.u32 2147483647, %v3333_v60  ;;  %vm2703_vm2 = vcmp.lt.f32.partialorder %v2702_v17, 0.0004427343 }
 0x547   : > { %3336 = vlog2.f32 %v2705_v50  ;;  %v2709_v7 = vadd.f32 1.0, %v2708_v46  ;;  %v2701_v26 = vmul.f32 %v3331_v42, %v2700_v14 }
 0x548   : > { %vm2712_vm4 = vcmp.lt.f32.partialorder %v2711_v16, 0.0004427343 }
 0x549   : > { %v2710_v36 = vmul.f32 %v3333_v60, %v2709_v7 }
 0x54f   : > { %v3335_v53 = vpop.eup %3334 }
 0x550   : > { %v2698_v3 = vmul.f32 0.6931472, %v3335_v53 }
 0x551   : > { %v3337_v45 = vpop.eup %3336 }
 0x552   : > { %v2704_v2 = vsel %vm2703_vm2, %v2701_v26, %v2698_v3  ;;  %v2707_v52 = vmul.f32 0.6931472, %v3337_v45 }
 0x553   : > { %v2714_v54 = vsel %vm2690_vm3, %v2688_v34, %v2704_v2 }
 0x554   : > { %v2713_v27 = vsel %vm2712_vm4, %v2710_v36, %v2707_v52 }
 0x555   : > { %v2715_v9 = vsel %vm2691_vm5, %v2689_v61, %v2713_v27 }
 0x556   : > { %v2718_v39 = vcombine.low %v2714_v54, %v2715_v9 }
 0x558   : > { %v2725_v32 = vrot.slane %v2718_v39, %v2724_v21 }
 0x55a   : > { %v2732_v13 = vrot.slane %v2725_v32, %v2724_v21 }
 0x55c   : > { %2738 = vst.msk [vmem:[%s412_s12] sm:$0x3] %vm2736_vm6, %v2732_v13 }
 0x55d   : > { %3351 = shalt.err (!%p3348_p5)
}
 0x55e   : > { %s3352_s18 = scalar_lea.hbm %s5521_s16, 32  ;;  %s3356_s14 = scalar_lea.hbm %s5576_s11, 64 }
 0x55f   : > { %p3353_p7 = scmp.ne.s32.totalorder %s5521_s16, %s3352_s18  ;;  %p3357_p12 = scmp.lt.u32.totalorder %s5521_s16, %s5576_s11 }
 0x560   : > { %p3358_p13 = scmp.lt.u32.totalorder %s3356_s14, %s3352_s18  ;;  %p3360_p1 = scmp.lt.u32.totalorder %s3352_s18, %s5521_s16 }
 0x561   : > { %p3354_p10 = pnand %p3353_p7, %p3506_p6 }
 0x562   : > { %p3359_p0 = por %p3358_p13, %p3357_p12 }
 0x563   : > { %p3355_p11 = pneg %p3354_p10 }
 0x564   : > { %p3361_p2 = por %p3360_p1, %p3359_p0 }
 0x566   : > { %p3362_p3 = pnand %p3361_p2, %p3355_p11 }
 0x568   : > { %3365 = shalt.err (!%p3362_p3)
}
 0x569   : > { %2879 = dma.vmem_to_hbm [thread:$0]  (%p3506_p6), %s5523_s13, 32, %s5521_s16, %s2740_s17  }
 0x56a PF: > { %s2766_s23 = sand.u32 1, %s3388_s19   ;;  %p2882_p4 = pnand %p2821_p9, %p3510_p8 }
 0x56b   : > { %s2767_s25 = scalar_lea.sflag [#allocation5], %s2766_s23 }
 0x56c   : > { %3383 = dma.done.wait (!%p2882_p4), %s2767_s25, 32  }
 0x56d   : > { %3385 = vsyncadd (!%p2882_p4), %s2767_s25, 4294967264  ;;  %p23_p5 = scmp.ge.s32.totalorder %s3491_s24, 4   ;;  %s5710_s19 = smov %s3392_s20 }
 0x56e   : > { %s5711_s20 = smov %s3396_s21  ;;  %s5712_s21 = smov %s3504_s27 }
 0x56f   : > { %s5713_s22 = smov %s3491_s24  ;;  %25 = sbr.rel (!%p23_p5) target bundleno = 6 (0x6), region = 127 }
 0x576   :  { %2772 = vsyncpa [#allocation5], 1 }
 0x577   :  { %2774 = vsyncpa [#allocation5 + $0x1], 1 }

</bundles_post_ra>
